<compile_context>
chip_gen: v7x
topology: tpu7x:2x2x1
jax: 0.10.0
libtpu: 0.0.40
codegen_flags: <defaults>
</compile_context>

<pallas_src>
import functools

import jax
import jax.numpy as jnp
from jax.experimental import pallas as pl
from jax.experimental.pallas import tpu as pltpu


def _densefusion_kernel(feat1_ref, wf_ref, bf_ref, w4_ref, b4_ref,
                        feat2_ref, ap_ref, *, inv_n):
    """Per grid step: one batch element, one tile of points.

    feat1_ref: (1, tn, 96)  bf16   wf_ref: (96, 1024) bf16   bf_ref: (1, 1024) f32
    w4_ref:    (512, 1024)  bf16   b4_ref: (1, 1024)  f32
    feat2_ref: (1, tn, 512) f32    ap_ref: (1, 1, 1024) f32 (resident accumulator)
    """
    t = pl.program_id(1)

    @pl.when(t == 0)
    def _init():
        ap_ref[...] = jnp.zeros_like(ap_ref)

    x = feat1_ref[0]                                        # (tn, 96) bf16

    # Fused conv2_rgb | conv2_cld | conv3: single K=96, N=1024 bf16 MXU pass.
    h = jnp.dot(x, wf_ref[...], preferred_element_type=jnp.float32)
    h = jnp.maximum(h + bf_ref[...], 0.0)                   # (tn, 1024) f32

    # feat_2 = relu(conv2_rgb) | relu(conv2_cld): lane-aligned slice, dense store.
    feat2_ref[0] = h[:, :512].astype(feat2_ref.dtype)

    # conv4(relu(conv3(feat_1))) + relu.
    c3 = h[:, 512:].astype(jnp.bfloat16)                    # (tn, 512)
    rgbd = jnp.dot(c3, w4_ref[...], preferred_element_type=jnp.float32)
    rgbd = jnp.maximum(rgbd + b4_ref[...], 0.0)             # (tn, 1024) f32

    # AvgPool1d(n): accumulate partial sums into the resident ap output block.
    ap_ref[0] += jnp.sum(rgbd, axis=0, keepdims=True)

    @pl.when(t == pl.num_programs(1) - 1)
    def _finalize():
        ap_ref[0] = ap_ref[0] * inv_n


def _pick_tile_n(n, tile_n=None, cap=1024):
    """Largest point-tile <= cap that divides n (cap keeps per-step VMEM well
    under the 32 MiB default scoped limit on all of v5e/v6e/v7x)."""
    if tile_n is not None:
        assert n % tile_n == 0, (n, tile_n)
        return tile_n
    if n <= cap:
        return n
    t = cap - (cap % 8)
    while t > 8 and n % t:
        t -= 8
    assert n % t == 0, f"could not find an n-tile for n={n}"
    return t


def dense_fusion(rgb_emb, cld_emb, params, *, tile_n=None):
    """rgb_emb: (bs, 64, n), cld_emb: (bs, 32, n)  (PyTorch NCW layout).
    Returns (bs, 1632, n) matching the PyTorch module."""
    bs, _, n_pts = cld_emb.shape
    tn = _pick_tile_n(n_pts, tile_n)
    n_tiles = n_pts // tn

    w2r, b2r, w2c, b2c, w3, b3, w4, b4 = params

    # Pack conv2_rgb / conv2_cld / conv3 into one block-diagonal (96, 1024) weight.
    wf = jnp.zeros((96, 1024), jnp.float32)
    wf = wf.at[:64, 0:256].set(w2r)
    wf = wf.at[64:, 256:512].set(w2c)
    wf = wf.at[:, 512:1024].set(w3)
    wf = wf.astype(jnp.bfloat16)
    bf = jnp.concatenate([b2r, b2c, b3], axis=-1).astype(jnp.float32)  # (1, 1024)
    w4_b = w4.astype(jnp.bfloat16)
    b4_f = b4.astype(jnp.float32)

    # feat_1 (pure passthrough of the inputs) stays f32/NCW for the final concat;
    # the kernel only needs its bf16 NWC view for the fused matmul.
    feat1_ncw = jnp.concatenate([rgb_emb, cld_emb], axis=1).astype(jnp.float32)
    feat1_nwc = jnp.transpose(feat1_ncw, (0, 2, 1)).astype(jnp.bfloat16)  # (bs, n, 96)

    kernel = functools.partial(_densefusion_kernel, inv_n=1.0 / n_pts)
    full = lambda shape: pl.BlockSpec(shape, lambda b, t: (0,) * len(shape))

    feat2_nwc, ap = pl.pallas_call(
        kernel,
        out_shape=(jax.ShapeDtypeStruct((bs, n_pts, 512), jnp.float32),
                   jax.ShapeDtypeStruct((bs, 1, 1024), jnp.float32)),
        grid_spec=pltpu.PrefetchScalarGridSpec(
            num_scalar_prefetch=0,
            grid=(bs, n_tiles),
            in_specs=[
                pl.BlockSpec((1, tn, 96), lambda b, t: (b, t, 0)),
                full(wf.shape), full(bf.shape),
                full(w4_b.shape), full(b4_f.shape),
            ],
            out_specs=[
                pl.BlockSpec((1, tn, 512), lambda b, t: (b, t, 0)),
                pl.BlockSpec((1, 1, 1024), lambda b, t: (b, 0, 0)),
            ],
        ),
        compiler_params=pltpu.CompilerParams(
            # n-tile axis carries the avgpool reduction -> "arbitrary";
            # batch axis shards across TensorCores (megacore / v7x 2-TC).
            dimension_semantics=("parallel", "arbitrary")),
    )(feat1_nwc, wf, bf, w4_b, b4_f)

    # Assemble the PyTorch-layout output (bs, 96 + 512 + 1024, n) in the wrapper
    # so every kernel store stays lane-dense.
    feat2_ncw = jnp.transpose(feat2_nwc, (0, 2, 1))                      # (bs, 512, n)
    ap_ncw = jnp.broadcast_to(jnp.transpose(ap, (0, 2, 1)),
                              (bs, 1024, n_pts))                         # (bs, 1024, n)
    return jnp.concatenate([feat1_ncw, feat2_ncw, ap_ncw], axis=1)


def init_params(key):
    """Deterministic synthetic weights. Conv1d weight (Cout, Cin, 1) is stored
    pre-transposed as (Cin, Cout) so the kernel computes x @ W + b directly."""
    ks = jax.random.split(key, 8)

    def mk(k, cin, cout):
        scale = 1.0 / jnp.sqrt(cin)
        return jax.random.uniform(k, (cin, cout), jnp.float32, -scale, scale)

    w2r = mk(ks[0], 64, 256)
    b2r = jax.random.uniform(ks[1], (1, 256), jnp.float32, -0.1, 0.1)
    w2c = mk(ks[2], 32, 256)
    b2c = jax.random.uniform(ks[3], (1, 256), jnp.float32, -0.1, 0.1)
    w3 = mk(ks[4], 96, 512)
    b3 = jax.random.uniform(ks[5], (1, 512), jnp.float32, -0.1, 0.1)
    w4 = mk(ks[6], 512, 1024)
    b4 = jax.random.uniform(ks[7], (1, 1024), jnp.float32, -0.1, 0.1)
    return (w2r, b2r, w2c, b2c, w3, b3, w4, b4)


def dense_fusion_ref(rgb_emb, cld_emb, params):
    """Plain-JAX f32 reference mirroring the PyTorch forward."""
    w2r, b2r, w2c, b2c, w3, b3, w4, b4 = params
    conv = lambda x, w, b: jnp.einsum('bcn,cd->bdn', x, w) + b.T[None, :, :]
    feat_1 = jnp.concatenate([rgb_emb, cld_emb], axis=1)
    rgb = jax.nn.relu(conv(rgb_emb, w2r, b2r))
    cld = jax.nn.relu(conv(cld_emb, w2c, b2c))
    feat_2 = jnp.concatenate([rgb, cld], axis=1)
    rgbd = jax.nn.relu(conv(feat_1, w3, b3))
    rgbd = jax.nn.relu(conv(rgbd, w4, b4))
    ap = jnp.mean(rgbd, axis=2, keepdims=True)
    ap = jnp.broadcast_to(ap, rgbd.shape)
    return jnp.concatenate([feat_1, feat_2, ap], axis=1)


if __name__ == "__main__":
    bs, n_pts = 2, 256  # num_points == n_pts (AvgPool1d kernel covers all points)
    key = jax.random.PRNGKey(0)
    k_rgb, k_cld, k_par = jax.random.split(key, 3)

    rgb_emb = jax.random.normal(k_rgb, (bs, 64, n_pts), jnp.float32)
    cld_emb = jax.random.normal(k_cld, (bs, 32, n_pts), jnp.float32)
    params = init_params(k_par)

    # tile_n=128 -> 2 point-tiles per batch, exercising the avgpool accumulator.
    out = dense_fusion(rgb_emb, cld_emb, params, tile_n=128)
    out = jax.block_until_ready(out)

    assert out.shape == (bs, 1632, n_pts), out.shape

    ref = dense_fusion_ref(rgb_emb, cld_emb, params)
    assert jnp.allclose(out, ref, rtol=5e-2, atol=5e-2), "mismatch vs reference"

    print("KERNEL_OK")
</pallas_src>

<mosaic_0001>
module attributes {stable_mosaic.version = 11 : i64} {
  func.func @_densefusion_kernel(%arg0: i32, %arg1: i32, %arg2: memref<1x128x96xbf16, #tpu.memory_space<vmem>>, %arg3: memref<96x1024xbf16, #tpu.memory_space<vmem>>, %arg4: memref<1x1024xf32, #tpu.memory_space<vmem>>, %arg5: memref<512x1024xbf16, #tpu.memory_space<vmem>>, %arg6: memref<1x1024xf32, #tpu.memory_space<vmem>>, %arg7: memref<1x128x512xf32, #tpu.memory_space<vmem>>, %arg8: memref<1x1x1024xf32, #tpu.memory_space<vmem>>) attributes {dimension_semantics = [#tpu.dimension_semantics<parallel>, #tpu.dimension_semantics<arbitrary>], iteration_bounds = array<i64: 2, 2>, scalar_prefetch = 0 : i64, scratch_operands = 0 : i64, tpu.core_type = #tpu.core_type<tc>, window_params = [{transform_indices = @transform_0, window_bounds = array<i64: 1, 128, 96>}, {pipeline_mode = #tpu.pipeline_mode<synchronous>, transform_indices = @transform_1, window_bounds = array<i64: 96, 1024>}, {pipeline_mode = #tpu.pipeline_mode<synchronous>, transform_indices = @transform_2, window_bounds = array<i64: 1, 1024>}, {pipeline_mode = #tpu.pipeline_mode<synchronous>, transform_indices = @transform_3, window_bounds = array<i64: 512, 1024>}, {pipeline_mode = #tpu.pipeline_mode<synchronous>, transform_indices = @transform_4, window_bounds = array<i64: 1, 1024>}, {transform_indices = @transform_5, window_bounds = array<i64: 1, 128, 512>}, {transform_indices = @transform_6, window_bounds = array<i64: 1, 1, 1024>}]} {
    %c0_i32 = arith.constant 0 : i32
    %0 = arith.cmpi eq, %arg1, %c0_i32 : i32
    %1 = arith.extui %0 : i1 to i32
    %c0_i32_0 = arith.constant 0 : i32
    %2 = arith.cmpi ne, %1, %c0_i32_0 : i32
    scf.if %2 {
      %cst_25 = arith.constant 0.000000e+00 : f32
      %36 = vector.broadcast %cst_25 : f32 to vector<1x1x1024xf32>
      %c0_26 = arith.constant 0 : index
      %c0_27 = arith.constant 0 : index
      %c0_28 = arith.constant 0 : index
      %37 = vector.load %arg8[%c0_26, %c0_27, %c0_28] : memref<1x1x1024xf32, #tpu.memory_space<vmem>>, vector<1x1x1024xf32>
      tpu.vector_store %arg8[%c0_26, %c0_27, %c0_28], %36 {strides = array<i32>} : memref<1x1x1024xf32, #tpu.memory_space<vmem>>, vector<1x1x1024xf32>,
    } else {
    }
    %c0 = arith.constant 0 : index
    %c0_1 = arith.constant 0 : index
    %c0_2 = arith.constant 0 : index
    %3 = vector.load %arg2[%c0, %c0_1, %c0_2] : memref<1x128x96xbf16, #tpu.memory_space<vmem>>, vector<1x128x96xbf16>
    %4 = vector.shape_cast %3 : vector<1x128x96xbf16> to vector<128x96xbf16>
    %c0_3 = arith.constant 0 : index
    %c0_4 = arith.constant 0 : index
    %5 = vector.load %arg3[%c0_3, %c0_4] : memref<96x1024xbf16, #tpu.memory_space<vmem>>, vector<96x1024xbf16>
    %cst = arith.constant dense<0.000000e+00> : vector<128x1024xf32>
    %6 = tpu.matmul %4, %5, %cst {dimension_numbers = #tpu.dot_dimension_numbers<[1], [0], [0], [1], [0, 0, 1, 1], [], []>} : vector<128x96xbf16>, vector<96x1024xbf16>, vector<128x1024xf32> -> vector<128x1024xf32>
    %c0_5 = arith.constant 0 : index
    %c0_6 = arith.constant 0 : index
    %7 = vector.load %arg4[%c0_5, %c0_6] : memref<1x1024xf32, #tpu.memory_space<vmem>>, vector<1x1024xf32>
    %8 = vector.broadcast %7 : vector<1x1024xf32> to vector<128x1024xf32>
    %9 = arith.addf %6, %8 : vector<128x1024xf32>
    %cst_7 = arith.constant 0.000000e+00 : f32
    %10 = vector.broadcast %cst_7 : f32 to vector<128x1024xf32>
    %11 = arith.maximumf %9, %10 : vector<128x1024xf32>
    %12 = vector.extract_strided_slice %11 {offsets = [0, 0], sizes = [128, 512], strides = [1, 1]} : vector<128x1024xf32> to vector<128x512xf32>
    %c0_8 = arith.constant 0 : index
    %c0_9 = arith.constant 0 : index
    %c0_10 = arith.constant 0 : index
    %13 = vector.load %arg7[%c0_8, %c0_9, %c0_10] : memref<1x128x512xf32, #tpu.memory_space<vmem>>, vector<1x128x512xf32>
    %14 = vector.shape_cast %13 : vector<1x128x512xf32> to vector<128x512xf32>
    %15 = vector.shape_cast %12 : vector<128x512xf32> to vector<1x128x512xf32>
    tpu.vector_store %arg7[%c0_8, %c0_9, %c0_10], %15 {strides = array<i32>} : memref<1x128x512xf32, #tpu.memory_space<vmem>>, vector<1x128x512xf32>,
    %16 = vector.extract_strided_slice %11 {offsets = [0, 512], sizes = [128, 512], strides = [1, 1]} : vector<128x1024xf32> to vector<128x512xf32>
    %17 = arith.truncf %16 : vector<128x512xf32> to vector<128x512xbf16>
    %c0_11 = arith.constant 0 : index
    %c0_12 = arith.constant 0 : index
    %18 = vector.load %arg5[%c0_11, %c0_12] : memref<512x1024xbf16, #tpu.memory_space<vmem>>, vector<512x1024xbf16>
    %cst_13 = arith.constant dense<0.000000e+00> : vector<128x1024xf32>
    %19 = tpu.matmul %17, %18, %cst_13 {dimension_numbers = #tpu.dot_dimension_numbers<[1], [0], [0], [1], [0, 0, 1, 1], [], []>} : vector<128x512xbf16>, vector<512x1024xbf16>, vector<128x1024xf32> -> vector<128x1024xf32>
    %c0_14 = arith.constant 0 : index
    %c0_15 = arith.constant 0 : index
    %20 = vector.load %arg6[%c0_14, %c0_15] : memref<1x1024xf32, #tpu.memory_space<vmem>>, vector<1x1024xf32>
    %21 = vector.broadcast %20 : vector<1x1024xf32> to vector<128x1024xf32>
    %22 = arith.addf %19, %21 : vector<128x1024xf32>
    %cst_16 = arith.constant 0.000000e+00 : f32
    %23 = vector.broadcast %cst_16 : f32 to vector<128x1024xf32>
    %24 = arith.maximumf %22, %23 : vector<128x1024xf32>
    %c0_17 = arith.constant 0 : index
    %c0_18 = arith.constant 0 : index
    %c0_19 = arith.constant 0 : index
    %25 = vector.load %arg8[%c0_17, %c0_18, %c0_19] : memref<1x1x1024xf32, #tpu.memory_space<vmem>>, vector<1x1x1024xf32>
    %26 = vector.shape_cast %25 : vector<1x1x1024xf32> to vector<1x1024xf32>
    %cst_20 = arith.constant dense<0.000000e+00> : vector<1024xf32>
    %27 = vector.multi_reduction <add>, %24, %cst_20 [0] : vector<128x1024xf32> to vector<1024xf32>
    %28 = vector.shape_cast %27 : vector<1024xf32> to vector<1x1024xf32>
    %29 = arith.addf %26, %28 : vector<1x1024xf32>
    %c0_21 = arith.constant 0 : index
    %c0_22 = arith.constant 0 : index
    %c0_23 = arith.constant 0 : index
    %30 = vector.load %arg8[%c0_21, %c0_22, %c0_23] : memref<1x1x1024xf32, #tpu.memory_space<vmem>>, vector<1x1x1024xf32>
    %31 = vector.shape_cast %30 : vector<1x1x1024xf32> to vector<1x1024xf32>
    %32 = vector.shape_cast %29 : vector<1x1024xf32> to vector<1x1x1024xf32>
    tpu.vector_store %arg8[%c0_21, %c0_22, %c0_23], %32 {strides = array<i32>} : memref<1x1x1024xf32, #tpu.memory_space<vmem>>, vector<1x1x1024xf32>,
    %c1_i32 = arith.constant 1 : i32
    %33 = arith.cmpi eq, %arg1, %c1_i32 : i32
    %34 = arith.extui %33 : i1 to i32
    %c0_i32_24 = arith.constant 0 : i32
    %35 = arith.cmpi ne, %34, %c0_i32_24 : i32
    scf.if %35 {
      %c0_25 = arith.constant 0 : index
      %c0_26 = arith.constant 0 : index
      %c0_27 = arith.constant 0 : index
      %36 = vector.load %arg8[%c0_25, %c0_26, %c0_27] : memref<1x1x1024xf32, #tpu.memory_space<vmem>>, vector<1x1x1024xf32>
      %37 = vector.shape_cast %36 : vector<1x1x1024xf32> to vector<1x1024xf32>
      %cst_28 = arith.constant 3.906250e-03 : f32
      %38 = vector.broadcast %cst_28 : f32 to vector<1x1024xf32>
      %39 = arith.mulf %37, %38 : vector<1x1024xf32>
      %c0_29 = arith.constant 0 : index
      %c0_30 = arith.constant 0 : index
      %c0_31 = arith.constant 0 : index
      %40 = vector.load %arg8[%c0_29, %c0_30, %c0_31] : memref<1x1x1024xf32, #tpu.memory_space<vmem>>, vector<1x1x1024xf32>
      %41 = vector.shape_cast %40 : vector<1x1x1024xf32> to vector<1x1024xf32>
      %42 = vector.shape_cast %39 : vector<1x1024xf32> to vector<1x1x1024xf32>
      tpu.vector_store %arg8[%c0_29, %c0_30, %c0_31], %42 {strides = array<i32>} : memref<1x1x1024xf32, #tpu.memory_space<vmem>>, vector<1x1x1024xf32>,
    } else {
    }
    return
  }
  func.func @transform_0(%arg0: i32, %arg1: i32) -> (i32, i32, i32) {
    %c0_i32 = arith.constant 0 : i32
    %c0_i32_0 = arith.constant 0 : i32
    return %arg0, %arg1, %c0_i32 : i32, i32, i32
  }
  func.func @transform_1(%arg0: i32, %arg1: i32) -> (i32, i32) {
    %c0_i32 = arith.constant 0 : i32
    %c0_i32_0 = arith.constant 0 : i32
    %c0_i32_1 = arith.constant 0 : i32
    return %c0_i32, %c0_i32_0 : i32, i32
  }
  func.func @transform_2(%arg0: i32, %arg1: i32) -> (i32, i32) {
    %c0_i32 = arith.constant 0 : i32
    %c0_i32_0 = arith.constant 0 : i32
    %c0_i32_1 = arith.constant 0 : i32
    return %c0_i32, %c0_i32_0 : i32, i32
  }
  func.func @transform_3(%arg0: i32, %arg1: i32) -> (i32, i32) {
    %c0_i32 = arith.constant 0 : i32
    %c0_i32_0 = arith.constant 0 : i32
    %c0_i32_1 = arith.constant 0 : i32
    return %c0_i32, %c0_i32_0 : i32, i32
  }
  func.func @transform_4(%arg0: i32, %arg1: i32) -> (i32, i32) {
    %c0_i32 = arith.constant 0 : i32
    %c0_i32_0 = arith.constant 0 : i32
    %c0_i32_1 = arith.constant 0 : i32
    return %c0_i32, %c0_i32_0 : i32, i32
  }
  func.func @transform_5(%arg0: i32, %arg1: i32) -> (i32, i32, i32) {
    %c0_i32 = arith.constant 0 : i32
    %c0_i32_0 = arith.constant 0 : i32
    return %arg0, %arg1, %c0_i32 : i32, i32, i32
  }
  func.func @transform_6(%arg0: i32, %arg1: i32) -> (i32, i32, i32) {
    %c0_i32 = arith.constant 0 : i32
    %c0_i32_0 = arith.constant 0 : i32
    %c0_i32_1 = arith.constant 0 : i32
    return %arg0, %c0_i32, %c0_i32_0 : i32, i32, i32
  }
}

</mosaic_0001>

<bundles_post_ra>
// kernel: tpu_custom_call.1
= control target key start
LH: loop header
LB: loop body
LE: loop exit
PB: predicated region body
PF: predicated region fallthrough
CT: control target
= control target key end

     0   :  { %s6811_s0 = inlined_call_operand.vmem [shape: bf16[2,256,96], index: 0, kind: input, shape index: {}]   ;;  %s6812_s1 = inlined_call_operand.vmem [shape: bf16[96,1024], index: 1, kind: input, shape index: {}]   ;;  %s6813_s2 = inlined_call_operand.vmem [shape: f32[1,1024], index: 2, kind: input, shape index: {}]   ;;  %s6814_s3 = inlined_call_operand.hbm [shape: bf16[512,1024], index: 3, kind: input, shape index: {}]   ;;  %s6815_s4 = inlined_call_operand.vmem [shape: f32[1,1024], index: 4, kind: input, shape index: {}]   ;;  %s6816_s5 = inlined_call_operand.hbm [shape: f32[2,256,512], index: 5, kind: output, shape index: {0}]   ;;  %s6817_s6 = inlined_call_operand.hbm [shape: f32[2,1,1024], index: 6, kind: output, shape index: {1}]  }
   0x1   :  { %6837 = sst [smem:[#allocation19_spill]] %s6811_s0 }
   0x2   :  { %6838 = sst [smem:[#allocation20_spill]] %s6814_s3 }
   0x3   :  { %12 = vsyncpa [#allocation3], 0 }
   0x4   :  { %13 = vsyncpa [#allocation4], 0 }
   0x5   :  { %15 = vsyncpa [#allocation4 + $0x1], 0 }
   0x6   :  { %16 = vsyncpa [#allocation7], 0 }
   0x7   :  { %18 = vsyncpa [#allocation7 + $0x1], 0  ;;  %s5389_s21 = smov 0   ;;  %s5391_s22 = smov 0  }
   0x8   :  { %s5393_s23 = smov 0   ;;  %s5395_s24 = smov 0  }
   0x9   :  { %s5397_s25 = smov 0   ;;  %s5399_s26 = smov 0  }
   0xa   :  { %s5401_s27 = smov 0   ;;  %s5403_s28 = smov 0  }
   0xb   :  { %s5405_s29 = smov 0   ;;  %s5407_s30 = smov 0  }
   0xc   :  { %s5409_s7 = smov 0  }
   0xd LB: > { %6839 = sst [smem:[#allocation11_spill]] %s5310_s23  ;;  %s6818_s8 = sadd.s32 4294967295, %s5342_s7   ;;  %s5342_s7 = sphi %s5409_s7, %s24_s7   ;;  %s5338_s30 = sphi %s5407_s30, %s6879_s30   ;;  %s5334_s29 = sphi %s5405_s29, %s6878_s29   ;;  %s5330_s28 = sphi %s5403_s28, %s6877_s28   ;;  %s5326_s27 = sphi %s5401_s27, %s6876_s27   ;;  %s5322_s26 = sphi %s5399_s26, %s6875_s26   ;;  %s5318_s25 = sphi %s5397_s25, %s6883_s25   ;;  %s5314_s24 = sphi %s5395_s24, %s6882_s24   ;;  %s5310_s23 = sphi %s5393_s23, %s6873_s23   ;;  %s5306_s22 = sphi %s5391_s22, %s6881_s22   ;;  %s5302_s21 = sphi %s5389_s21, %s6880_s21  }
   0xe   : > { %6840 = sst [smem:[#allocation12_spill]] %s5322_s26  ;;  %s4409_s9 = sadd.s32 4294967294, %s5342_s7  }
   0xf   : > { %6841 = sst [smem:[#allocation13_spill]] %s5334_s29  ;;  %s33_s10 = sadd.s32 1, %s5334_s29 }
  0x10   : > { %6842 = sst [smem:[#allocation14_spill]] %s5338_s30  ;;  %s36_s11 = sadd.s32 1, %s5338_s30 }
  0x11   : > { %p34_p0 = scmp.ge.s32.totalorder %s33_s10, 2  ;;  %s157_s12 = sadd.s32 1, %s5322_s26 }
  0x12   : > { %p167_p1 = scmp.ne.s32.totalorder %s5322_s26, %s5318_s25  ;;  %p5453_p2 = scmp.eq.s32.totalorder %s6818_s8, 3 }
  0x13   : > { %s6885_s10 = smov (%p34_p0, %s33_s10), 0  ;;  %s6887_s11 = smov (!%p34_p0, %s36_s11), %s5338_s30 }
  0x14   : > { %6844 = sst [smem:[#allocation15_spill]] %s6885_s10  ;;  %s153_s14 = ssub.s32 %s5334_s29, %s6885_s10 }
  0x15   : > { %p5464_p3 = por %p5453_p2, %p167_p1  ;;  %p38_p4 = scmp.ge.s32.totalorder %s6887_s11, 2 }
  0x16   : > { %p173_p5 = scmp.ne.s32.totalorder %s5318_s25, %s5314_s24  ;;  %p5470_p6 = scmp.eq.s32.totalorder %s4409_s9, 3 }
  0x17   : > { %s6845_s15 = scalar_select %p5464_p3, 1, 0 }
  0x18   : > { %s183_s17 = sadd.s32 1, %s5310_s23  ;;  %s6889_s11 = smov (%p38_p4, %s6887_s11), 0 }
  0x19   : > { %6847 = sst [smem:[#allocation16_spill]] %s6889_s11  ;;  %p5479_p7 = por %p5470_p6, %p173_p5 }
  0x1a   : > { %p193_p8 = scmp.ne.s32.totalorder %s5310_s23, %s5306_s22  ;;  %s152_s19 = ssub.s32 %s5338_s30, %s6889_s11 }
  0x1b   : > { %s6848_s18 = scalar_select %p5479_p7, 1, 0 }
  0x1c   : > { %p199_p9 = scmp.ne.s32.totalorder %s5306_s22, %s5302_s21  ;;  %s154_s20 = sor.u32 %s153_s14, %s152_s19 }
  0x1d   : > { %p181_p10 = scmp.eq.s32.totalorder %s152_s19, 0  ;;  %p155_p11 = scmp.eq.s32.totalorder %s154_s20, 0 }
  0x1e   : > { %p5491_p12 = por %p193_p8, %p5453_p2  ;;  %p5503_p13 = por %p199_p9, %p5470_p6 }
  0x1f   : > { %s5496_s8 = scalar_select %p181_p10, %s5310_s23, %s183_s17  }
  0x20   : > { %s6849_s9 = scalar_select %p5491_p12, 1, 0 }
  0x21   : > { %6850 = sst [smem:[#allocation17_spill]] %s5496_s8  ;;  %p4410_p0 = scmp.ge.s32.totalorder %s5342_s7, 1 }
  0x22   : > { %s5499_s10 = scalar_select %p155_p11, %s5322_s26, %s157_s12  }
  0x23   : > { %s6852_s29 = scalar_select %p5503_p13, 1, 0 }
  0x24   : > { %6851 = sst [smem:[#allocation18_spill]] %s5499_s10  ;;  %p207_p1 = scmp.lt.s32.totalorder %s5342_s7, 5 }
  0x25   : > { %s6853_s11 = sadd.s32 4294967295, %s5342_s7   ;;  %s5344_s12 = smov [#allocation2]  }
  0x26   : > { %p5511_p4 = scmp.eq.s32.totalorder %s6853_s11, 0  ;;  %p5515_p2 = pnand %p4410_p0, %p207_p1 }
  0x27   : > { %s225_s17 = sshll.u32 %s5344_s12, 4  ;;  %s6857_s3 = sld [smem:[#allocation20_spill]]  ;;  %s226_s17 = int_to_ptr.vmem [resolvable:$true] %s225_s17 }
  0x28   : > { %s6854_s14 = scalar_select %p5511_p4, 1, 0 }
  0x29   : > { %s6855_s13 = scalar_select %p5515_p2, 1, 0 }
  0x2a   : > { %p5042_p5 = pneg %p5515_p2 }
  0x2c   : > { %p5523_p6 = pnand %p5511_p4, %p5042_p5 }
  0x2d   : > { %s5160_s20 = scalar_lea.hbm %s6857_s3, 32768 }
  0x2e   : > { %p5161_p8 = scmp.ne.s32.totalorder %s6857_s3, %s5160_s20  ;;  %p5162_p9 = pneg %p5523_p6 }
  0x2f   : > { %p5167_p0 = scmp.lt.u32.totalorder %s5160_s20, %s6857_s3 }
  0x30   : > { %p5163_p10 = pnand %p5162_p9, %p5161_p8 }
  0x32   : > { %p5164_p11 = pneg %p5163_p10 }
  0x34   : > { %p5169_p1 = pnand %p5167_p0, %p5164_p11 }
  0x36   : > { %5172 = shalt.err (!%p5169_p1)
}
  0x37   : > { %s5173_s8 = scalar_lea.vmem %s226_s17, 32768  ;;  %p5181_p12 = scmp.lt.s32.totalorder %s226_s17, %s226_s17 }
  0x38   : > { %p5174_p5 = scmp.ne.s32.totalorder %s226_s17, %s5173_s8  ;;  %p5182_p3 = scmp.lt.s32.totalorder %s5173_s8, %s5173_s8 }
  0x3a   : > { %p5176_p13 = pnand %p5174_p5, %p5162_p9  ;;  %p5183_p4 = por %p5182_p3, %p5181_p12 }
  0x3c   : > { %p5177_p7 = pneg %p5176_p13 }
  0x3e   : > { %p5184_p2 = pnand %p5183_p4, %p5177_p7 }
  0x40   : > { %5187 = shalt.err (!%p5184_p2)
}
  0x41   : > { %s5345_s30 = smov 512   ;;  %s5346_s10 = smov 32  }
  0x42   : > { %5045 = dma.hbm_to_vmem [thread:$0]  (!%p5523_p6), %s6857_s3, 32768, %s226_s17, [#allocation3], %s5345_s30, %s5345_s30, %s5346_s10  }
  0x43   : > { %p6858_p8 = scmp.ne.s32.totalorder %s6855_s13, 0 }
  0x44   : > { %p6859_p10 = scmp.ne.s32.totalorder (!%p6858_p8), %s6854_s14, 0 }
  0x45   : > { %257 = sbr.rel (%p6858_p8) target bundleno = 966 (0x3c6), region = 40 }
  0x4c   : > { %5289 = dma.done.wait (%p6859_p10), [#allocation3], 32768  }
  0x4d   : > { %5291 = vsyncadd (%p6859_p10), [#allocation3], 4294934528  ;;  %s286_s26 = sand.u32 1, %s5318_s25   ;;  %s6830_s8 = sand.u32 1, %s5306_s22  }
  0x4e   : > { %s4415_s17 = sshll.u32 %s286_s26, 9  ;;  %s4416_s13 = sshll.u32 %s6830_s8, 3 }
  0x4f   : > { %s4417_s16 = sshll.u32 %s5326_s27, 4  ;;  %p297_p3 = scmp.lt.s32.totalorder %s5330_s28, 1 }
  0x50   : > { %p299_p7 = scmp.lt.s32.totalorder %s4417_s16, 31  ;;  %s6860_s0 = sld [smem:[#allocation19_spill]] }
  0x51   : > { %s298_s20 = scalar_select %p297_p3, %s5330_s28, 1 }
  0x52   : > { %s6891_s16 = smov (!%p299_p7, %s4417_s16), 31  ;;  %s5563_s3 = scalar_lea.vmem [#allocation5], %s4415_s17 }
  0x53   : > { %s4418_s14 = sshll.u32 %s298_s20, 5  ;;  %s5565_s23 = scalar_lea.vmem [#allocation6], %s4416_s13 }
  0x54   : > { %s302_s12 = sadd.s32 %s4418_s14, %s6891_s16  ;;  %p4420_p12 = scmp.ne.s32.totalorder %s5326_s27, 0 }
  0x55   : > { %s4419_s30 = sshll.u32 %s302_s12, 2  ;;  %v5347_v0 = vmov (!%p4420_p12), 0.0  }
  0x56   : > { %s5561_s19 = scalar_lea.vmem %s6860_s0, %s4419_s30  ;;  %311 = sbr.rel (%p4420_p12) target bundleno = 93 (0x5d), region = 48  ;;  %312 = vst [vmem:[%s5565_s23] sm:$0xff] (!%p4420_p12), %v5347_v0 }
  0x5d PF: > { %v329_v1 = vld [vmem:[%s6812_s1] sm:$0xff]  ;;  %v5348_v7 = vmov 0   ;;  %v330_v19 = vld [vmem:[%s6812_s1 + $0x8] sm:$0xff]  ;;  %v331_v35 = vld [vmem:[%s6812_s1 + $0x10] sm:$0xff]  ;;  %vm699_vm0 = vcmask 785408   ;;  %p4765_p13 = scmp.ne.s32.totalorder %s5326_s27, 1 }
  0x5e   : > { %v333_v2 = vld [vmem:[%s6812_s1 + $0x20] sm:$0xff]  ;;  %756 = vmatprep.mubr.bf16.mxu0 %v5348_v7  ;;  %869 = vmatprep.mubr.bf16.mxu1 %v5348_v7  ;;  %v334_v21 = vld [vmem:[%s6812_s1 + $0x28] sm:$0xff]  ;;  %v335_v36 = vld [vmem:[%s6812_s1 + $0x30] sm:$0xff] }
  0x5f   : > { %v337_v3 = vld [vmem:[%s6812_s1 + $0x40] sm:$0xff]  ;;  %v4430_v4 = vcombine.high %v329_v1, %v333_v2  ;;  %v4429_v5 = vcombine.low %v329_v1, %v333_v2  ;;  %v4432_v23 = vcombine.high %v330_v19, %v334_v21  ;;  %v4431_v24 = vcombine.low %v330_v19, %v334_v21  ;;  %v338_v25 = vld [vmem:[%s6812_s1 + $0x48] sm:$0xff]  ;;  %v339_v44 = vld [vmem:[%s6812_s1 + $0x50] sm:$0xff] }
  0x60   : > { %v341_v6 = vld [vmem:[%s6812_s1 + $0x60] sm:$0xff]  ;;  %v342_v26 = vld [vmem:[%s6812_s1 + $0x68] sm:$0xff]  ;;  %v4434_v42 = vcombine.high %v331_v35, %v335_v36  ;;  %v343_v45 = vld [vmem:[%s6812_s1 + $0x70] sm:$0xff]  ;;  %v4433_v49 = vcombine.low %v331_v35, %v335_v36 }
  0x61   : > { %v4438_v8 = vcombine.high %v337_v3, %v341_v6  ;;  %v345_v9 = vld [vmem:[%s6812_s1 + $0x80] sm:$0xff]  ;;  %724 = vmatprep.subr.bf16.mxu0 %v4430_v4  ;;  %v4437_v11 = vcombine.low %v337_v3, %v341_v6  ;;  %v4440_v29 = vcombine.high %v338_v25, %v342_v26  ;;  %v346_v30 = vld [vmem:[%s6812_s1 + $0x88] sm:$0xff]  ;;  %837 = vmatprep.subr.bf16.mxu1 %v4432_v23  ;;  %v347_v52 = vld [vmem:[%s6812_s1 + $0x90] sm:$0xff] }
  0x62   : > { %v349_v10 = vld [vmem:[%s6812_s1 + $0xa0] sm:$0xff]  ;;  %725 = vmatpush1.bf16.msra.mxu0 %v4429_v5  ;;  %v350_v31 = vld [vmem:[%s6812_s1 + $0xa8] sm:$0xff]  ;;  %838 = vmatpush1.bf16.msra.mxu1 %v4431_v24  ;;  %v4439_v33 = vcombine.low %v338_v25, %v342_v26  ;;  %v4442_v50 = vcombine.high %v339_v44, %v343_v45  ;;  %v351_v53 = vld [vmem:[%s6812_s1 + $0xb0] sm:$0xff]  ;;  %v4441_v57 = vcombine.low %v339_v44, %v343_v45 }
  0x63   : > { %726 = vmatprep.subr.bf16.mxu0 %v4438_v8  ;;  %v4446_v12 = vcombine.high %v345_v9, %v349_v10  ;;  %v353_v13 = vld [vmem:[%s6812_s1 + $0xc0] sm:$0xff]  ;;  %v4445_v15 = vcombine.low %v345_v9, %v349_v10  ;;  %839 = vmatprep.subr.bf16.mxu1 %v4440_v29  ;;  %v4448_v37 = vcombine.high %v346_v30, %v350_v31  ;;  %v354_v38 = vld [vmem:[%s6812_s1 + $0xc8] sm:$0xff]  ;;  %v355_v60 = vld [vmem:[%s6812_s1 + $0xd0] sm:$0xff] }
  0x64   : > { %v357_v14 = vld [vmem:[%s6812_s1 + $0xe0] sm:$0xff]  ;;  %v358_v39 = vld [vmem:[%s6812_s1 + $0xe8] sm:$0xff]  ;;  %v4447_v41 = vcombine.low %v346_v30, %v350_v31  ;;  %v4450_v58 = vcombine.high %v347_v52, %v351_v53  ;;  %v359_v61 = vld [vmem:[%s6812_s1 + $0xf0] sm:$0xff]  ;;  %v4449_v2 = vcombine.low %v347_v52, %v351_v53 }
  0x65   : > { %v4454_v16 = vcombine.high %v353_v13, %v357_v14  ;;  %v361_v17 = vld [vmem:[%s6812_s1 + $0x100] sm:$0xff]  ;;  %v4453_v20 = vcombine.low %v353_v13, %v357_v14  ;;  %v4456_v43 = vcombine.high %v354_v38, %v358_v39  ;;  %v362_v47 = vld [vmem:[%s6812_s1 + $0x108] sm:$0xff]  ;;  %v4455_v51 = vcombine.low %v354_v38, %v358_v39  ;;  %v332_v0 = vld [vmem:[%s6812_s1 + $0x18] sm:$0xff] }
  0x66   : > { %727 = vmatpush1.bf16.msra.mxu0 %v4437_v11  ;;  %v365_v18 = vld [vmem:[%s6812_s1 + $0x120] sm:$0xff]  ;;  %840 = vmatpush1.bf16.msra.mxu1 %v4439_v33  ;;  %v366_v48 = vld [vmem:[%s6812_s1 + $0x128] sm:$0xff]  ;;  %v336_v1 = vld [vmem:[%s6812_s1 + $0x38] sm:$0xff]  ;;  %v4458_v3 = vcombine.high %v355_v60, %v359_v61  ;;  %v4457_v11 = vcombine.low %v355_v60, %v359_v61 }
  0x67   : > { %728 = vmatprep.subr.bf16.mxu0 %v4446_v12  ;;  %v4462_v22 = vcombine.high %v361_v17, %v365_v18  ;;  %v369_v27 = vld [vmem:[%s6812_s1 + $0x140] sm:$0xff]  ;;  %v4461_v32 = vcombine.low %v361_v17, %v365_v18  ;;  %841 = vmatprep.subr.bf16.mxu1 %v4448_v37  ;;  %v4464_v54 = vcombine.high %v362_v47, %v366_v48  ;;  %v370_v55 = vld [vmem:[%s6812_s1 + $0x148] sm:$0xff]  ;;  %v363_v5 = vld [vmem:[%s6812_s1 + $0x110] sm:$0xff] }
  0x68   : > { %v373_v28 = vld [vmem:[%s6812_s1 + $0x160] sm:$0xff]  ;;  %v374_v56 = vld [vmem:[%s6812_s1 + $0x168] sm:$0xff]  ;;  %v4463_v59 = vcombine.low %v362_v47, %v366_v48  ;;  %v367_v6 = vld [vmem:[%s6812_s1 + $0x130] sm:$0xff]  ;;  %v4436_v8 = vcombine.high %v332_v0, %v336_v1  ;;  %v4435_v13 = vcombine.low %v332_v0, %v336_v1 }
  0x69   : > { %v4470_v34 = vcombine.high %v369_v27, %v373_v28  ;;  %v4469_v40 = vcombine.low %v369_v27, %v373_v28  ;;  %v5644_v46 = vld [vmem:[%s5561_s19] sm:$0xff]   ;;  %v4472_v62 = vcombine.high %v370_v55, %v374_v56  ;;  %v5674_v63 = vld [vmem:[%s5561_s19 + $0x8] sm:$0xff]   ;;  %v4471_v4 = vcombine.low %v370_v55, %v374_v56  ;;  %v340_v9 = vld [vmem:[%s6812_s1 + $0x58] sm:$0xff] }
  0x6a   : > { %729 = vmatpush1.bf16.msra.mxu0 %v4445_v15  ;;  %842 = vmatpush1.bf16.msra.mxu1 %v4447_v41  ;;  %v344_v10 = vld [vmem:[%s6812_s1 + $0x78] sm:$0xff]  ;;  %v4466_v12 = vcombine.high %v363_v5, %v367_v6  ;;  %v371_v14 = vld [vmem:[%s6812_s1 + $0x150] sm:$0xff]  ;;  %v5746_v38 = vld [vmem:[%s5561_s19 + $0x20] sm:$0xff]  }
  0x6b   : > { %730 = vmatprep.subr.bf16.mxu0 %v4454_v16  ;;  %843 = vmatprep.subr.bf16.mxu1 %v4456_v43  ;;  %v375_v15 = vld [vmem:[%s6812_s1 + $0x170] sm:$0xff]  ;;  %v4444_v16 = vcombine.high %v340_v9, %v344_v10  ;;  %v348_v18 = vld [vmem:[%s6812_s1 + $0x98] sm:$0xff]  ;;  %v1400_v43 = vld [vmem:[#allocation2] sm:$0xff] }
  0x6c   : > { %v5704_v17 = vld [vmem:[%s5561_s19 + $0x10] sm:$0xff]   ;;  %v352_v19 = vld [vmem:[%s6812_s1 + $0xb8] sm:$0xff]  ;;  %v4474_v21 = vcombine.high %v371_v14, %v375_v15  ;;  %v4473_v26 = vcombine.low %v371_v14, %v375_v15  ;;  %v1404_v44 = vld [vmem:[#allocation2 + $0x20] sm:$0xff] }
  0x6d   : > { %v4452_v23 = vcombine.high %v348_v18, %v352_v19  ;;  %v356_v24 = vld [vmem:[%s6812_s1 + $0xd8] sm:$0xff]  ;;  %v4451_v27 = vcombine.low %v348_v18, %v352_v19  ;;  %v5764_v41 = vld [vmem:[%s5561_s19 + $0x30] sm:$0xff]   ;;  %v1401_v45 = vld [vmem:[#allocation2 + $0x8] sm:$0xff]  ;;  %v4509_v48 = vcombine.low %v1400_v43, %v1404_v44 }
  0x6e   : > { %731 = vmatpush1.bf16.msra.mxu0 %v4453_v20  ;;  %844 = vmatpush1.bf16.msra.mxu1 %v4455_v51  ;;  %v4465_v20 = vcombine.low %v363_v5, %v367_v6  ;;  %v360_v25 = vld [vmem:[%s6812_s1 + $0xf8] sm:$0xff]  ;;  %v1405_v47 = vld [vmem:[#allocation2 + $0x28] sm:$0xff]  ;;  %v1408_v51 = vld [vmem:[#allocation2 + $0x40] sm:$0xff] }
  0x6f   : > { %732 = vmatprep.subr.bf16.mxu0 %v4462_v22  ;;  %845 = vmatprep.subr.bf16.mxu1 %v4464_v54  ;;  %v4443_v22 = vcombine.low %v340_v9, %v344_v10  ;;  %v4460_v28 = vcombine.high %v356_v24, %v360_v25  ;;  %v5725_v29 = vld [vmem:[%s5561_s19 + $0x18] sm:$0xff]   ;;  %v1412_v52 = vld [vmem:[#allocation2 + $0x60] sm:$0xff]  ;;  %v1409_v53 = vld [vmem:[#allocation2 + $0x48] sm:$0xff] }
  0x70   : > { %v364_v30 = vld [vmem:[%s6812_s1 + $0x118] sm:$0xff]  ;;  %v4518_v54 = vcombine.high %v1408_v51, %v1412_v52  ;;  %v1413_v55 = vld [vmem:[#allocation2 + $0x68] sm:$0xff]  ;;  %v4517_v56 = vcombine.low %v1408_v51, %v1412_v52  ;;  %v1420_v60 = vld [vmem:[#allocation2 + $0xa0] sm:$0xff] }
  0x71   : > { %v368_v31 = vld [vmem:[%s6812_s1 + $0x138] sm:$0xff]  ;;  %v1417_v61 = vld [vmem:[#allocation2 + $0x88] sm:$0xff] }
  0x72   : > { %733 = vmatpush1.bf16.msra.mxu0 %v4461_v32  ;;  %846 = vmatpush1.bf16.msra.mxu1 %v4463_v59  ;;  %v4459_v32 = vcombine.low %v356_v24, %v360_v25  ;;  %v4468_v33 = vcombine.high %v364_v30, %v368_v31  ;;  %v376_v35 = vld [vmem:[%s6812_s1 + $0x178] sm:$0xff]  ;;  %v4467_v36 = vcombine.low %v364_v30, %v368_v31  ;;  %v1416_v59 = vld [vmem:[#allocation2 + $0x80] sm:$0xff]  ;;  %v1425_v5 = vld [vmem:[#allocation2 + $0xc8] sm:$0xff] }
  0x73   : > { %734 = vmatprep.subr.bf16.mxu0 %v4470_v34  ;;  %847 = vmatprep.subr.bf16.mxu1 %v4472_v62  ;;  %v372_v34 = vld [vmem:[%s6812_s1 + $0x158] sm:$0xff]  ;;  %v4526_v62 = vcombine.high %v1416_v59, %v1420_v60  ;;  %v4525_v0 = vcombine.low %v1416_v59, %v1420_v60  ;;  %v1433_v14 = vld [vmem:[#allocation2 + $0x108] sm:$0xff] }
  0x74   : > { %v4476_v37 = vcombine.high %v372_v34, %v376_v35  ;;  %v4475_v39 = vcombine.low %v372_v34, %v376_v35  ;;  %v1445_v24 = vld [vmem:[#allocation2 + $0x168] sm:$0xff] }
  0x75   : > { %v1449_v30 = vld [vmem:[#allocation2 + $0x188] sm:$0xff] }
  0x76   : > { %735 = vmatpush1.bf16.msra.mxu0 %v4469_v40  ;;  %848 = vmatpush1.bf16.msra.mxu1 %v4471_v4  ;;  %v5755_v40 = vld [vmem:[%s5561_s19 + $0x28] sm:$0xff]   ;;  %v1428_v4 = vld [vmem:[#allocation2 + $0xe0] sm:$0xff] }
  0x77   : > { %950 = vmatprep.subr.bf16.mxu0 %v4434_v42  ;;  %1063 = vmatprep.subr.bf16.mxu1 %v4436_v8  ;;  %v5773_v42 = vld [vmem:[%s5561_s19 + $0x38] sm:$0xff]   ;;  %v1429_v8 = vld [vmem:[#allocation2 + $0xe8] sm:$0xff] }
  0x78   : > { %v4535_v10 = vcombine.low %v1425_v5, %v1429_v8 }
  0x79   : > { %4477 = vmatmul.mubr.msk.bf16.vlgmr.msra.gmra.mrb[0].mxu0 %vm699_vm0, %v5644_v46  ;;  %4485 = vmatmul.mubr.msk.bf16.vlgmr.msra.gmra.mrb[0].mxu1 %vm699_vm0, %v5644_v46 }
  0x7a   : > { %951 = vmatpush1.bf16.msra.mxu0 %v4433_v49  ;;  %766 = vmatprep.mubr.bf16.mxu0 %v5348_v7  ;;  %v4511_v49 = vcombine.low %v1401_v45, %v1405_v47 }
  0x7b   : > { %952 = vmatprep.subr.bf16.mxu0 %v4442_v50  ;;  %1064 = vmatpush1.bf16.msra.mxu1 %v4435_v13  ;;  %v4512_v50 = vcombine.high %v1401_v45, %v1405_v47  ;;  %v1436_v13 = vld [vmem:[#allocation2 + $0x120] sm:$0xff] }
  0x7c   : > { %879 = vmatprep.mubr.bf16.mxu1 %v5348_v7  ;;  %1065 = vmatprep.subr.bf16.mxu1 %v4444_v16  ;;  %v1437_v16 = vld [vmem:[#allocation2 + $0x128] sm:$0xff]  ;;  %v1468_v47 = vld [vmem:[#allocation2 + $0x220] sm:$0xff] }
  0x7d   : > { %v4543_v18 = vcombine.low %v1433_v14, %v1437_v16  ;;  %v4544_v19 = vcombine.high %v1433_v14, %v1437_v16  ;;  %v1497_v14 = vld [vmem:[#allocation2 + $0x308] sm:$0xff] }
  0x7e   : > { %953 = vmatpush1.bf16.msra.mxu0 %v4441_v57  ;;  %v4519_v57 = vcombine.low %v1409_v53, %v1413_v55  ;;  %v1501_v16 = vld [vmem:[#allocation2 + $0x328] sm:$0xff] }
  0x7f   : > { %954 = vmatprep.subr.bf16.mxu0 %v4450_v58  ;;  %1066 = vmatpush1.bf16.msra.mxu1 %v4443_v22  ;;  %v4520_v58 = vcombine.high %v1409_v53, %v1413_v55  ;;  %v1441_v22 = vld [vmem:[#allocation2 + $0x148] sm:$0xff]  ;;  %v1476_v55 = vld [vmem:[#allocation2 + $0x260] sm:$0xff] }
  0x80   : > { %1067 = vmatprep.subr.bf16.mxu1 %v4452_v23 }
  0x81   : > { %4478 = vmatmul.mubr.msk.bf16.gmra.mrb[4].mxu0 %vm699_vm0, %v5674_v63  ;;  %4486 = vmatmul.mubr.msk.bf16.gmra.mrb[4].mxu1 %vm699_vm0, %v5674_v63 }
  0x82   : > { %776 = vmatprep.mubr.bf16.mxu0 %v5348_v7  ;;  %955 = vmatpush1.bf16.msra.mxu0 %v4449_v2 }
  0x83   : > { %956 = vmatprep.subr.bf16.mxu0 %v4458_v3  ;;  %889 = vmatprep.mubr.bf16.mxu1 %v5348_v7  ;;  %v1424_v3 = vld [vmem:[#allocation2 + $0xc0] sm:$0xff] }
  0x84   : > { %1068 = vmatpush1.bf16.msra.mxu1 %v4451_v27  ;;  %v4534_v6 = vcombine.high %v1424_v3, %v1428_v4  ;;  %v4533_v9 = vcombine.low %v1424_v3, %v1428_v4  ;;  %v4552_v27 = vcombine.high %v1441_v22, %v1445_v24  ;;  %v1488_v4 = vld [vmem:[#allocation2 + $0x2c0] sm:$0xff] }
  0x85   : > { %1069 = vmatprep.subr.bf16.mxu1 %v4460_v28  ;;  %v1448_v28 = vld [vmem:[#allocation2 + $0x180] sm:$0xff] }
  0x86   : > { %957 = vmatpush1.bf16.msra.mxu0 %v4457_v11  ;;  %v4536_v11 = vcombine.high %v1425_v5, %v1429_v8  ;;  %v1492_v5 = vld [vmem:[#allocation2 + $0x2e0] sm:$0xff] }
  0x87   : > { %958 = vmatprep.subr.bf16.mxu0 %v4466_v12  ;;  %v1432_v12 = vld [vmem:[#allocation2 + $0x100] sm:$0xff]  ;;  %v4598_v8 = vcombine.high %v1488_v4, %v1492_v5 }
  0x88   : > { %1070 = vmatpush1.bf16.msra.mxu1 %v4459_v32  ;;  %v4542_v15 = vcombine.high %v1432_v12, %v1436_v13  ;;  %v1453_v32 = vld [vmem:[#allocation2 + $0x1a8] sm:$0xff] }
  0x89   : > { %4479 = vmatmul.mubr.msk.bf16.gmra.mrb[8].mxu0 %vm699_vm0, %v5704_v17  ;;  %1071 = vmatprep.subr.bf16.mxu1 %v4468_v33  ;;  %v4559_v34 = vcombine.low %v1449_v30, %v1453_v32  ;;  %v4560_v35 = vcombine.high %v1449_v30, %v1453_v32  ;;  %v1513_v30 = vld [vmem:[#allocation2 + $0x388] sm:$0xff] }
  0x8a   : > { %786 = vmatprep.mubr.bf16.mxu0 %v5348_v7  ;;  %959 = vmatpush1.bf16.msra.mxu0 %v4465_v20  ;;  %v1440_v20 = vld [vmem:[#allocation2 + $0x140] sm:$0xff]  ;;  %v1517_v32 = vld [vmem:[#allocation2 + $0x3a8] sm:$0xff] }
  0x8b   : > { %960 = vmatprep.subr.bf16.mxu0 %v4474_v21  ;;  %4487 = vmatmul.mubr.msk.bf16.gmra.mrb[8].mxu1 %vm699_vm0, %v5704_v17  ;;  %v1444_v21 = vld [vmem:[#allocation2 + $0x160] sm:$0xff] }
  0x8c   : > { %899 = vmatprep.mubr.bf16.mxu1 %v5348_v7  ;;  %1072 = vmatpush1.bf16.msra.mxu1 %v4467_v36  ;;  %v4550_v23 = vcombine.high %v1440_v20, %v1444_v21  ;;  %v4549_v25 = vcombine.low %v1440_v20, %v1444_v21  ;;  %v1456_v36 = vld [vmem:[#allocation2 + $0x1c0] sm:$0xff] }
  0x8d   : > { %1073 = vmatprep.subr.bf16.mxu1 %v4476_v37  ;;  %v1460_v37 = vld [vmem:[#allocation2 + $0x1e0] sm:$0xff] }
  0x8e   : > { %961 = vmatpush1.bf16.msra.mxu0 %v4473_v26  ;;  %v4551_v26 = vcombine.low %v1441_v22, %v1445_v24  ;;  %v1504_v20 = vld [vmem:[#allocation2 + $0x340] sm:$0xff]  ;;  %v1505_v22 = vld [vmem:[#allocation2 + $0x348] sm:$0xff] }
  0x8f   : > { %v1508_v21 = vld [vmem:[#allocation2 + $0x360] sm:$0xff]  ;;  %v1509_v24 = vld [vmem:[#allocation2 + $0x368] sm:$0xff] }
  0x90   : > { %1074 = vmatpush1.bf16.msra.mxu1 %v4475_v39  ;;  %v4566_v39 = vcombine.high %v1456_v36, %v1460_v37 }
  0x91   : > { %4480 = vmatmul.mubr.msk.bf16.gmra.mrb[12].mxu0 %vm699_vm0, %v5725_v29  ;;  %3204 = vmatprep.subr.bf16.mxu1 %v4512_v50  ;;  %v1469_v50 = vld [vmem:[#allocation2 + $0x228] sm:$0xff] }
  0x92   : > { %796 = vmatprep.mubr.bf16.mxu0 %v5348_v7 }
  0x93   : > { %4488 = vmatmul.mubr.msk.bf16.gmra.mrb[12].mxu1 %vm699_vm0, %v5725_v29 }
  0x94   : > { %909 = vmatprep.mubr.bf16.mxu1 %v5348_v7 }
  0x99   : > { %4481 = vmatmul.mubr.msk.bf16.gmra.mrb[16].mxu0 %vm699_vm0, %v5746_v38 }
  0x9a   : > { %806 = vmatprep.mubr.bf16.mxu0 %v5348_v7 }
  0x9b   : > { %4489 = vmatmul.mubr.msk.bf16.gmra.mrb[16].mxu1 %vm699_vm0, %v5746_v38 }
  0x9c   : > { %919 = vmatprep.mubr.bf16.mxu1 %v5348_v7 }
  0xa1   : > { %4482 = vmatmul.mubr.msk.bf16.gmra.mrb[20].mxu0 %vm699_vm0, %v5755_v40 }
  0xa2   : > { %816 = vmatprep.mubr.bf16.mxu0 %v5348_v7 }
  0xa3   : > { %4490 = vmatmul.mubr.msk.bf16.gmra.mrb[20].mxu1 %vm699_vm0, %v5755_v40 }
  0xa4   : > { %929 = vmatprep.mubr.bf16.mxu1 %v5348_v7 }
  0xa9   : > { %4483 = vmatmul.mubr.msk.bf16.gmra.mrb[24].mxu0 %vm699_vm0, %v5764_v41 }
  0xaa   : > { %826 = vmatprep.mubr.bf16.mxu0 %v5348_v7 }
  0xab   : > { %4491 = vmatmul.mubr.msk.bf16.gmra.mrb[24].mxu1 %vm699_vm0, %v5764_v41 }
  0xac   : > { %939 = vmatprep.mubr.bf16.mxu1 %v5348_v7 }
  0xb1   : > { %4484 = vmatmul.mubr.msk.bf16.gmra.mrb[28].mxu0 %vm699_vm0, %v5773_v42 }
  0xb2   : > { %982 = vmatprep.mubr.bf16.mxu0 %v5348_v7 }
  0xb3   : > { %4492 = vmatmul.mubr.msk.bf16.gmra.mrb[28].mxu1 %vm699_vm0, %v5773_v42 }
  0xb4   : > { %1095 = vmatprep.mubr.bf16.mxu1 %v5348_v7 }
  0xb9   : > { %4493 = vmatmul.mubr.msk.bf16.vlgmr.msra.gmra.mrb[32].mxu0 %vm699_vm0, %v5644_v46 }
  0xba   : > { %992 = vmatprep.mubr.bf16.mxu0 %v5348_v7 }
  0xbb   : > { %4501 = vmatmul.mubr.msk.bf16.vlgmr.msra.gmra.mrb[32].mxu1 %vm699_vm0, %v5644_v46  ;;  %v4510_v46 = vcombine.high %v1400_v43, %v1404_v44  ;;  %v1461_v43 = vld [vmem:[#allocation2 + $0x1e8] sm:$0xff]  ;;  %v4565_v44 = vcombine.low %v1456_v36, %v1460_v37  ;;  %v1520_v36 = vld [vmem:[#allocation2 + $0x3c0] sm:$0xff] }
  0xbc   : > { %1105 = vmatprep.mubr.bf16.mxu1 %v5348_v7  ;;  %3205 = vmatpush1.bf16.msra.mxu1 %v4511_v49  ;;  %v1524_v37 = vld [vmem:[#allocation2 + $0x3e0] sm:$0xff] }
  0xbd   : > { %2978 = vmatprep.subr.bf16.mxu0 %v4510_v46  ;;  %3206 = vmatprep.subr.bf16.mxu1 %v4520_v58  ;;  %v1464_v46 = vld [vmem:[#allocation2 + $0x200] sm:$0xff]  ;;  %v1477_v58 = vld [vmem:[#allocation2 + $0x268] sm:$0xff] }
  0xbe   : > { %2979 = vmatpush1.bf16.msra.mxu0 %v4509_v48  ;;  %v1465_v48 = vld [vmem:[#allocation2 + $0x208] sm:$0xff]  ;;  %v4574_v49 = vcombine.high %v1464_v46, %v1468_v47  ;;  %v4573_v51 = vcombine.low %v1464_v46, %v1468_v47  ;;  %v5833_v46 = vld [vmem:[#allocation2 + $0x400] sm:$0xff] }
  0xbf   : > { %2980 = vmatprep.subr.bf16.mxu0 %v4518_v54  ;;  %v4575_v52 = vcombine.low %v1465_v48, %v1469_v50  ;;  %v4576_v53 = vcombine.high %v1465_v48, %v1469_v50  ;;  %v1472_v54 = vld [vmem:[#allocation2 + $0x240] sm:$0xff]  ;;  %v5837_v48 = vld [vmem:[#allocation2 + $0x408] sm:$0xff] }
  0xc0   : > { %3207 = vmatpush1.bf16.msra.mxu1 %v4519_v57  ;;  %v4582_v57 = vcombine.high %v1472_v54, %v1476_v55  ;;  %v4581_v59 = vcombine.low %v1472_v54, %v1476_v55  ;;  %v5835_v47 = vld [vmem:[#allocation2 + $0x420] sm:$0xff]  ;;  %v5841_v50 = vld [vmem:[#allocation2 + $0x428] sm:$0xff]  ;;  %v379_v54 = vlaneseq }
  0xc1   : > { %4494 = vmatmul.mubr.msk.bf16.gmra.mrb[36].mxu0 %vm699_vm0, %v5674_v63 }
  0xc2   : > { %1002 = vmatprep.mubr.bf16.mxu0 %v5348_v7  ;;  %2981 = vmatpush1.bf16.msra.mxu0 %v4517_v56  ;;  %v1473_v56 = vld [vmem:[#allocation2 + $0x248] sm:$0xff]  ;;  %v5849_v55 = vshrl.u32 %v379_v54, 7 }
  0xc3   : > { %4502 = vmatmul.mubr.msk.bf16.gmra.mrb[36].mxu1 %vm699_vm0, %v5674_v63  ;;  %v1421_v63 = vld [vmem:[#allocation2 + $0xa8] sm:$0xff]  ;;  %2982 = vmatprep.subr.bf16.mxu0 %v4526_v62  ;;  %v4583_v60 = vcombine.low %v1473_v56, %v1477_v58  ;;  %v1484_v62 = vld [vmem:[#allocation2 + $0x2a0] sm:$0xff] }
  0xc4   : > { %1115 = vmatprep.mubr.bf16.mxu1 %v5348_v7  ;;  %v4527_v1 = vcombine.low %v1417_v61, %v1421_v63  ;;  %v4528_v2 = vcombine.high %v1417_v61, %v1421_v63  ;;  %v4584_v61 = vcombine.high %v1473_v56, %v1477_v58  ;;  %v1481_v63 = vld [vmem:[#allocation2 + $0x288] sm:$0xff]  ;;  %v381_v56 = vsub.s32 0, %v5849_v55 }
  0xc5   : > { %v6836_v58 = vsub.s32 1, %v5849_v55 }
  0xc6   : > { %3208 = vmatprep.subr.bf16.mxu1 %v4528_v2  ;;  %2983 = vmatpush1.bf16.msra.mxu0 %v4525_v0  ;;  %v1485_v0 = vld [vmem:[#allocation2 + $0x2a8] sm:$0xff] }
  0xc7   : > { %3209 = vmatpush1.bf16.msra.mxu1 %v4527_v1  ;;  %2984 = vmatprep.subr.bf16.mxu0 %v4534_v6  ;;  %v4591_v2 = vcombine.low %v1481_v63, %v1485_v0  ;;  %v4592_v3 = vcombine.high %v1481_v63, %v1485_v0  ;;  %v1489_v6 = vld [vmem:[#allocation2 + $0x2c8] sm:$0xff] }
  0xc8   : > { %3210 = vmatprep.subr.bf16.mxu1 %v4536_v11 }
  0xc9   : > { %4495 = vmatmul.mubr.msk.bf16.gmra.mrb[40].mxu0 %vm699_vm0, %v5704_v17 }
  0xca   : > { %1012 = vmatprep.mubr.bf16.mxu0 %v5348_v7  ;;  %2985 = vmatpush1.bf16.msra.mxu0 %v4533_v9  ;;  %v1493_v9 = vld [vmem:[#allocation2 + $0x2e8] sm:$0xff] }
  0xcb   : > { %4503 = vmatmul.mubr.msk.bf16.gmra.mrb[40].mxu1 %vm699_vm0, %v5704_v17  ;;  %v4541_v17 = vcombine.low %v1432_v12, %v1436_v13  ;;  %2986 = vmatprep.subr.bf16.mxu0 %v4542_v15  ;;  %v4599_v11 = vcombine.low %v1489_v6, %v1493_v9  ;;  %v4600_v12 = vcombine.high %v1489_v6, %v1493_v9  ;;  %v1496_v13 = vld [vmem:[#allocation2 + $0x300] sm:$0xff]  ;;  %v6835_v9 = vsub.s32 3, %v5849_v55 }
  0xcc   : > { %1125 = vmatprep.mubr.bf16.mxu1 %v5348_v7  ;;  %3211 = vmatpush1.bf16.msra.mxu1 %v4535_v10  ;;  %v4597_v10 = vcombine.low %v1488_v4, %v1492_v5 }
  0xcd   : > { %3212 = vmatprep.subr.bf16.mxu1 %v4544_v19  ;;  %v4608_v19 = vcombine.high %v1497_v14, %v1501_v16 }
  0xce   : > { %2987 = vmatpush1.bf16.msra.mxu0 %v4541_v17 }
  0xcf   : > { %2988 = vmatprep.subr.bf16.mxu0 %v4550_v23  ;;  %v4614_v23 = vcombine.high %v1504_v20, %v1508_v21 }
  0xd0   : > { %3213 = vmatpush1.bf16.msra.mxu1 %v4543_v18  ;;  %v4607_v18 = vcombine.low %v1497_v14, %v1501_v16 }
  0xd1   : > { %4496 = vmatmul.mubr.msk.bf16.gmra.mrb[44].mxu0 %vm699_vm0, %v5725_v29  ;;  %3214 = vmatprep.subr.bf16.mxu1 %v4552_v27  ;;  %v4616_v27 = vcombine.high %v1505_v22, %v1509_v24 }
  0xd2   : > { %1022 = vmatprep.mubr.bf16.mxu0 %v5348_v7  ;;  %2989 = vmatpush1.bf16.msra.mxu0 %v4549_v25  ;;  %v4613_v25 = vcombine.low %v1504_v20, %v1508_v21 }
  0xd3   : > { %4504 = vmatmul.mubr.msk.bf16.gmra.mrb[44].mxu1 %vm699_vm0, %v5725_v29  ;;  %v1452_v29 = vld [vmem:[#allocation2 + $0x1a0] sm:$0xff] }
  0xd4   : > { %1135 = vmatprep.mubr.bf16.mxu1 %v5348_v7  ;;  %3215 = vmatpush1.bf16.msra.mxu1 %v4551_v26  ;;  %v4558_v31 = vcombine.high %v1448_v28, %v1452_v29  ;;  %v4557_v33 = vcombine.low %v1448_v28, %v1452_v29  ;;  %v4615_v26 = vcombine.low %v1505_v22, %v1509_v24  ;;  %v1512_v28 = vld [vmem:[#allocation2 + $0x380] sm:$0xff] }
  0xd5   : > { %3216 = vmatprep.subr.bf16.mxu1 %v4560_v35  ;;  %v1516_v29 = vld [vmem:[#allocation2 + $0x3a0] sm:$0xff]  ;;  %v4624_v35 = vcombine.high %v1513_v30, %v1517_v32 }
  0xd6   : > { %2990 = vmatprep.subr.bf16.mxu0 %v4558_v31  ;;  %v4622_v31 = vcombine.high %v1512_v28, %v1516_v29 }
  0xd7   : > { %2991 = vmatpush1.bf16.msra.mxu0 %v4557_v33  ;;  %v4621_v33 = vcombine.low %v1512_v28, %v1516_v29 }
  0xd8   : > { %3217 = vmatpush1.bf16.msra.mxu1 %v4559_v34  ;;  %2992 = vmatprep.subr.bf16.mxu0 %v4566_v39  ;;  %v4623_v34 = vcombine.low %v1513_v30, %v1517_v32  ;;  %v4630_v39 = vcombine.high %v1520_v36, %v1524_v37 }
  0xd9   : > { %4497 = vmatmul.mubr.msk.bf16.gmra.mrb[48].mxu0 %vm699_vm0, %v5746_v38 }
  0xda   : > { %1032 = vmatprep.mubr.bf16.mxu0 %v5348_v7 }
  0xdb   : > { %4505 = vmatmul.mubr.msk.bf16.gmra.mrb[48].mxu1 %vm699_vm0, %v5746_v38  ;;  %v1457_v38 = vld [vmem:[#allocation2 + $0x1c8] sm:$0xff]  ;;  %2993 = vmatpush1.bf16.msra.mxu0 %v4565_v44  ;;  %v4629_v44 = vcombine.low %v1520_v36, %v1524_v37 }
  0xdc   : > { %1145 = vmatprep.mubr.bf16.mxu1 %v5348_v7  ;;  %v4567_v45 = vcombine.low %v1457_v38, %v1461_v43  ;;  %2994 = vmatprep.subr.bf16.mxu0 %v4574_v49  ;;  %v4638_v49 = vcombine.high %v5833_v46, %v5835_v47 }
  0xdf   : > { %2995 = vmatpush1.bf16.msra.mxu0 %v4573_v51  ;;  %v4637_v51 = vcombine.low %v5833_v46, %v5835_v47  ;;  %v6081_v47 = vld [vmem:[#allocation2 + $0x4c0] sm:$0xff] }
  0xe0   : > { %2996 = vmatprep.subr.bf16.mxu0 %v4582_v57  ;;  %v5855_v57 = vld [vmem:[%s6813_s2] sm:$0xff] }
  0xe1   : > { %4498 = vmatmul.mubr.msk.bf16.gmra.mrb[52].mxu0 %vm699_vm0, %v5755_v40 }
  0xe2   : > { %1042 = vmatprep.mubr.bf16.mxu0 %v5348_v7 }
  0xe3   : > { %4506 = vmatmul.mubr.msk.bf16.gmra.mrb[52].mxu1 %vm699_vm0, %v5755_v40  ;;  %v4568_v40 = vcombine.high %v1457_v38, %v1461_v43  ;;  %2997 = vmatpush1.bf16.msra.mxu0 %v4581_v59  ;;  %v1521_v38 = vld [vmem:[#allocation2 + $0x3c8] sm:$0xff]  ;;  %v5861_v59 = vrot.slane %v5855_v57, %v381_v56 }
  0xe4   : > { %1155 = vmatprep.mubr.bf16.mxu1 %v5348_v7  ;;  %v1525_v43 = vld [vmem:[#allocation2 + $0x3e8] sm:$0xff] }
  0xe5   : > { %3218 = vmatprep.subr.bf16.mxu1 %v4568_v40  ;;  %v4632_v40 = vcombine.high %v1521_v38, %v1525_v43 }
  0xe6   : > { %3219 = vmatpush1.bf16.msra.mxu1 %v4567_v45  ;;  %v4631_v45 = vcombine.low %v1521_v38, %v1525_v43 }
  0xe7   : > { %3220 = vmatprep.subr.bf16.mxu1 %v4576_v53  ;;  %v4640_v53 = vcombine.high %v5837_v48, %v5841_v50 }
  0xe9   : > { %4499 = vmatmul.mubr.msk.bf16.gmra.mrb[56].mxu0 %vm699_vm0, %v5764_v41 }
  0xea   : > { %1052 = vmatprep.mubr.bf16.mxu0 %v5348_v7  ;;  %3221 = vmatpush1.bf16.msra.mxu1 %v4575_v52  ;;  %v4639_v52 = vcombine.low %v5837_v48, %v5841_v50  ;;  %v6083_v48 = vld [vmem:[#allocation2 + $0x4e0] sm:$0xff] }
  0xeb   : > { %4507 = vmatmul.mubr.msk.bf16.gmra.mrb[56].mxu1 %vm699_vm0, %v5764_v41  ;;  %3222 = vmatprep.subr.bf16.mxu1 %v4584_v61  ;;  %v1480_v41 = vld [vmem:[#allocation2 + $0x280] sm:$0xff] }
  0xec   : > { %1165 = vmatprep.mubr.bf16.mxu1 %v5348_v7  ;;  %v4590_v7 = vcombine.high %v1480_v41, %v1484_v62  ;;  %v4589_v1 = vcombine.low %v1480_v41, %v1484_v62 }
  0xee   : > { %3223 = vmatpush1.bf16.msra.mxu1 %v4583_v60  ;;  %2998 = vmatprep.subr.bf16.mxu0 %v4590_v7  ;;  %v5866_v60 = vrot.slane %v5855_v57, %v6836_v58 }
  0xef   : > { %3224 = vmatprep.subr.bf16.mxu1 %v4592_v3  ;;  %2999 = vmatpush1.bf16.msra.mxu0 %v4589_v1 }
  0xf0   : > { %3000 = vmatprep.subr.bf16.mxu0 %v4598_v8  ;;  %v389_v8 = vsub.s32 2, %v5849_v55 }
  0xf1   : > { %4500 = vmatmul.mubr.msk.bf16.gmra.mrb[60].mxu0 %vm699_vm0, %v5773_v42 }
  0xf2   : > { %3225 = vmatpush1.bf16.msra.mxu1 %v4591_v2  ;;  %v5883_v14 = vrot.slane %v5855_v57, %v389_v8 }
  0xf3   : > { %4508 = vmatmul.mubr.msk.bf16.gmra.mrb[60].mxu1 %vm699_vm0, %v5773_v42  ;;  %3226 = vmatprep.subr.bf16.mxu1 %v4600_v12  ;;  %v1500_v42 = vld [vmem:[#allocation2 + $0x320] sm:$0xff] }
  0xf4   : > { %3001 = vmatpush1.bf16.msra.mxu0 %v4597_v10  ;;  %v4606_v15 = vcombine.high %v1496_v13, %v1500_v42  ;;  %v4605_v17 = vcombine.low %v1496_v13, %v1500_v42 }
  0xf6   : > { %3227 = vmatpush1.bf16.msra.mxu1 %v4599_v11  ;;  %3002 = vmatprep.subr.bf16.mxu0 %v4606_v15 }
  0xf7   : > { %3228 = vmatprep.subr.bf16.mxu1 %v4608_v19 }
  0xf8   : > { %3003 = vmatpush1.bf16.msra.mxu0 %v4605_v17 }
  0xf9   : > { %3004 = vmatprep.subr.bf16.mxu0 %v4614_v23 }
  0xfa   : > { %3229 = vmatpush1.bf16.msra.mxu1 %v4607_v18  ;;  %v5889_v18 = vrot.slane %v5855_v57, %v6835_v9  ;;  %v1419_v9 = vld [vmem:[#allocation2 + $0x98] sm:$0xff] }
  0xfb   : > { %3230 = vmatprep.subr.bf16.mxu1 %v4616_v27 }
  0xfc   : > { %3005 = vmatpush1.bf16.msra.mxu0 %v4613_v25 }
  0xfd   : > { %3006 = vmatprep.subr.bf16.mxu0 %v4622_v31 }
  0xfe   : > { %3231 = vmatpush1.bf16.msra.mxu1 %v4615_v26 }
  0xff   : > { %3232 = vmatprep.subr.bf16.mxu1 %v4624_v35 }
 0x100   : > { %3007 = vmatpush1.bf16.msra.mxu0 %v4621_v33 }
 0x101   : > { %3008 = vmatprep.subr.bf16.mxu0 %v4630_v39 }
 0x102   : > { %3233 = vmatpush1.bf16.msra.mxu1 %v4623_v34 }
 0x103   : > { %3234 = vmatprep.subr.bf16.mxu1 %v4632_v40 }
 0x104   : > { %3009 = vmatpush1.bf16.msra.mxu0 %v4629_v44 }
 0x105   : > { %3091 = vmatprep.subr.bf16.mxu0 %v4638_v49 }
 0x106   : > { %3235 = vmatpush1.bf16.msra.mxu1 %v4631_v45 }
 0x107   : > { %3317 = vmatprep.subr.bf16.mxu1 %v4640_v53 }
 0x14c   : > { %v758_v61 = vpop.f32.mrb[0].mxu0  ;;  %v871_v22 = vpop.f32.mrb[0].mxu1 }
 0x14d   : > { %v759_v41 = vadd.f32 %v758_v61, %v5861_v59  ;;  %v760_v62 = vpop.f32.mrb[1].mxu0  ;;  %v872_v24 = vadd.f32 %v871_v22, %v5883_v14  ;;  %v873_v25 = vpop.f32.mrb[1].mxu1 }
 0x14e   : > { %v761_v63 = vadd.f32 %v760_v62, %v5866_v60  ;;  %v762_v7 = vpop.f32.mrb[2].mxu0  ;;  %v874_v26 = vadd.f32 %v873_v25, %v5889_v18  ;;  %v875_v27 = vpop.f32.mrb[2].mxu1 }
 0x14f   : > { %v1176_v0 = vmax.f32 %v759_v41, 0.0  ;;  %v763_v1 = vadd.f32 %v762_v7, %v5861_v59  ;;  %v764_v2 = vpop.f32.mrb[3].mxu0  ;;  %v1178_v29 = vmax.f32 %v872_v24, 0.0  ;;  %v876_v30 = vadd.f32 %v875_v27, %v5883_v14  ;;  %v877_v31 = vpop.f32.mrb[3].mxu1 }
 0x150   : > { %v1177_v3 = vmax.f32 %v761_v63, 0.0  ;;  %v765_v4 = vadd.f32 %v764_v2, %v5866_v60  ;;  %v1179_v34 = vmax.f32 %v874_v26, 0.0  ;;  %v878_v35 = vadd.f32 %v877_v31, %v5889_v18 }
 0x151   : > { %1304 = vst [vmem:[%s5563_s3] sm:$0xff] %v1176_v0  ;;  %v1184_v5 = vmax.f32 %v763_v1, 0.0  ;;  %1306 = vst [vmem:[%s5563_s3 + $0x10] sm:$0xff] %v1178_v29  ;;  %v1186_v38 = vmax.f32 %v876_v30, 0.0 }
 0x152   : > { %1305 = vst [vmem:[%s5563_s3 + $0x8] sm:$0xff] %v1177_v3  ;;  %v1185_v6 = vmax.f32 %v765_v4, 0.0  ;;  %1307 = vst [vmem:[%s5563_s3 + $0x18] sm:$0xff] %v1179_v34  ;;  %v1187_v45 = vmax.f32 %v878_v35, 0.0 }
 0x153   : > { %1308 = vst [vmem:[%s5563_s3 + $0x20] sm:$0xff] %v1184_v5  ;;  %1310 = vst [vmem:[%s5563_s3 + $0x30] sm:$0xff] %v1186_v38 }
 0x154   : > { %1309 = vst [vmem:[%s5563_s3 + $0x28] sm:$0xff] %v1185_v6  ;;  %v768_v10 = vpop.f32.mrb[4].mxu0  ;;  %1311 = vst [vmem:[%s5563_s3 + $0x38] sm:$0xff] %v1187_v45  ;;  %v881_v54 = vpop.f32.mrb[4].mxu1 }
 0x155   : > { %v769_v11 = vadd.f32 %v768_v10, %v5861_v59  ;;  %v770_v12 = vpop.f32.mrb[5].mxu0  ;;  %v882_v41 = vadd.f32 %v881_v54, %v5883_v14  ;;  %v883_v62 = vpop.f32.mrb[5].mxu1 }
 0x156   : > { %v771_v13 = vadd.f32 %v770_v12, %v5866_v60  ;;  %v772_v42 = vpop.f32.mrb[6].mxu0  ;;  %v884_v63 = vadd.f32 %v883_v62, %v5889_v18  ;;  %v885_v7 = vpop.f32.mrb[6].mxu1 }
 0x157   : > { %v1192_v15 = vmax.f32 %v769_v11, 0.0  ;;  %v773_v16 = vadd.f32 %v772_v42, %v5861_v59  ;;  %v774_v17 = vpop.f32.mrb[7].mxu0  ;;  %v1194_v1 = vmax.f32 %v882_v41, 0.0  ;;  %v886_v2 = vadd.f32 %v885_v7, %v5883_v14  ;;  %v887_v3 = vpop.f32.mrb[7].mxu1 }
 0x158   : > { %v1193_v19 = vmax.f32 %v771_v13, 0.0  ;;  %v775_v20 = vadd.f32 %v774_v17, %v5866_v60  ;;  %v1195_v6 = vmax.f32 %v884_v63, 0.0  ;;  %v888_v10 = vadd.f32 %v887_v3, %v5889_v18 }
 0x159   : > { %1312 = vst [vmem:[%s5563_s3 + $0x40] sm:$0xff] %v1192_v15  ;;  %v1200_v21 = vmax.f32 %v773_v16, 0.0  ;;  %1314 = vst [vmem:[%s5563_s3 + $0x50] sm:$0xff] %v1194_v1  ;;  %v1202_v13 = vmax.f32 %v886_v2, 0.0 }
 0x15a   : > { %1313 = vst [vmem:[%s5563_s3 + $0x48] sm:$0xff] %v1193_v19  ;;  %v1201_v23 = vmax.f32 %v775_v20, 0.0  ;;  %1315 = vst [vmem:[%s5563_s3 + $0x58] sm:$0xff] %v1195_v6  ;;  %v1203_v17 = vmax.f32 %v888_v10, 0.0 }
 0x15b   : > { %1316 = vst [vmem:[%s5563_s3 + $0x60] sm:$0xff] %v1200_v21  ;;  %1318 = vst [vmem:[%s5563_s3 + $0x70] sm:$0xff] %v1202_v13 }
 0x15c   : > { %1317 = vst [vmem:[%s5563_s3 + $0x68] sm:$0xff] %v1201_v23  ;;  %v778_v28 = vpop.f32.mrb[8].mxu0  ;;  %1319 = vst [vmem:[%s5563_s3 + $0x78] sm:$0xff] %v1203_v17 }
 0x15d   : > { %v779_v32 = vadd.f32 %v778_v28, %v5861_v59  ;;  %v780_v33 = vpop.f32.mrb[9].mxu0 }
 0x15e   : > { %v781_v36 = vadd.f32 %v780_v33, %v5866_v60  ;;  %v782_v37 = vpop.f32.mrb[10].mxu0  ;;  %v891_v22 = vpop.f32.mrb[8].mxu1 }
 0x15f   : > { %v1208_v39 = vmax.f32 %v779_v32, 0.0  ;;  %v783_v43 = vadd.f32 %v782_v37, %v5861_v59  ;;  %v784_v44 = vpop.f32.mrb[11].mxu0  ;;  %v892_v24 = vadd.f32 %v891_v22, %v5883_v14  ;;  %v893_v25 = vpop.f32.mrb[9].mxu1 }
 0x160   : > { %v1209_v40 = vmax.f32 %v781_v36, 0.0  ;;  %v785_v49 = vadd.f32 %v784_v44, %v5866_v60  ;;  %v894_v26 = vadd.f32 %v893_v25, %v5889_v18  ;;  %v895_v27 = vpop.f32.mrb[10].mxu1 }
 0x161   : > { %1320 = vst [vmem:[%s5563_s3 + $0x80] sm:$0xff] %v1208_v39  ;;  %v1216_v53 = vmax.f32 %v783_v43, 0.0  ;;  %v1210_v29 = vmax.f32 %v892_v24, 0.0  ;;  %v896_v30 = vadd.f32 %v895_v27, %v5883_v14  ;;  %v897_v31 = vpop.f32.mrb[11].mxu1 }
 0x162   : > { %1321 = vst [vmem:[%s5563_s3 + $0x88] sm:$0xff] %v1209_v40  ;;  %v1217_v61 = vmax.f32 %v785_v49, 0.0  ;;  %v1211_v34 = vmax.f32 %v894_v26, 0.0  ;;  %v898_v35 = vadd.f32 %v897_v31, %v5889_v18 }
 0x163   : > { %1324 = vst [vmem:[%s5563_s3 + $0xa0] sm:$0xff] %v1216_v53  ;;  %1322 = vst [vmem:[%s5563_s3 + $0x90] sm:$0xff] %v1210_v29  ;;  %v1218_v38 = vmax.f32 %v896_v30, 0.0 }
 0x164   : > { %1325 = vst [vmem:[%s5563_s3 + $0xa8] sm:$0xff] %v1217_v61  ;;  %v788_v0 = vpop.f32.mrb[12].mxu0  ;;  %1323 = vst [vmem:[%s5563_s3 + $0x98] sm:$0xff] %v1211_v34  ;;  %v1219_v45 = vmax.f32 %v898_v35, 0.0 }
 0x165   : > { %v789_v4 = vadd.f32 %v788_v0, %v5861_v59  ;;  %v790_v5 = vpop.f32.mrb[13].mxu0  ;;  %1326 = vst [vmem:[%s5563_s3 + $0xb0] sm:$0xff] %v1218_v38 }
 0x166   : > { %v791_v11 = vadd.f32 %v790_v5, %v5866_v60  ;;  %v792_v12 = vpop.f32.mrb[14].mxu0  ;;  %1327 = vst [vmem:[%s5563_s3 + $0xb8] sm:$0xff] %v1219_v45  ;;  %v901_v54 = vpop.f32.mrb[12].mxu1 }
 0x167   : > { %v1224_v42 = vmax.f32 %v789_v4, 0.0  ;;  %v793_v15 = vadd.f32 %v792_v12, %v5861_v59  ;;  %v794_v16 = vpop.f32.mrb[15].mxu0  ;;  %v902_v41 = vadd.f32 %v901_v54, %v5883_v14  ;;  %v903_v62 = vpop.f32.mrb[13].mxu1 }
 0x168   : > { %v1225_v19 = vmax.f32 %v791_v11, 0.0  ;;  %v795_v20 = vadd.f32 %v794_v16, %v5866_v60  ;;  %v904_v63 = vadd.f32 %v903_v62, %v5889_v18  ;;  %v905_v7 = vpop.f32.mrb[14].mxu1 }
 0x169   : > { %1328 = vst [vmem:[%s5563_s3 + $0xc0] sm:$0xff] %v1224_v42  ;;  %v1232_v21 = vmax.f32 %v793_v15, 0.0  ;;  %v1226_v1 = vmax.f32 %v902_v41, 0.0  ;;  %v906_v2 = vadd.f32 %v905_v7, %v5883_v14  ;;  %v907_v3 = vpop.f32.mrb[15].mxu1 }
 0x16a   : > { %1329 = vst [vmem:[%s5563_s3 + $0xc8] sm:$0xff] %v1225_v19  ;;  %v1233_v23 = vmax.f32 %v795_v20, 0.0  ;;  %v1227_v6 = vmax.f32 %v904_v63, 0.0  ;;  %v908_v10 = vadd.f32 %v907_v3, %v5889_v18 }
 0x16b   : > { %1332 = vst [vmem:[%s5563_s3 + $0xe0] sm:$0xff] %v1232_v21  ;;  %1330 = vst [vmem:[%s5563_s3 + $0xd0] sm:$0xff] %v1226_v1  ;;  %v1234_v13 = vmax.f32 %v906_v2, 0.0 }
 0x16c   : > { %1333 = vst [vmem:[%s5563_s3 + $0xe8] sm:$0xff] %v1233_v23  ;;  %v798_v28 = vpop.f32.mrb[16].mxu0  ;;  %1331 = vst [vmem:[%s5563_s3 + $0xd8] sm:$0xff] %v1227_v6  ;;  %v1235_v17 = vmax.f32 %v908_v10, 0.0  ;;  %v6834_v6 = vsub.s32 4, %v5849_v55 }
 0x16d   : > { %v799_v32 = vadd.f32 %v798_v28, %v5861_v59  ;;  %v800_v33 = vpop.f32.mrb[17].mxu0  ;;  %1334 = vst [vmem:[%s5563_s3 + $0xf0] sm:$0xff] %v1234_v13 }
 0x16e   : > { %v801_v36 = vadd.f32 %v800_v33, %v5866_v60  ;;  %v802_v37 = vpop.f32.mrb[18].mxu0  ;;  %1335 = vst [vmem:[%s5563_s3 + $0xf8] sm:$0xff] %v1235_v17  ;;  %v911_v22 = vpop.f32.mrb[16].mxu1 }
 0x16f   : > { %v1240_v39 = vmax.f32 %v799_v32, 0.0  ;;  %v803_v43 = vadd.f32 %v802_v37, %v5861_v59  ;;  %v804_v44 = vpop.f32.mrb[19].mxu0  ;;  %v912_v24 = vadd.f32 %v911_v22, %v5883_v14  ;;  %v913_v25 = vpop.f32.mrb[17].mxu1 }
 0x170   : > { %v1241_v40 = vmax.f32 %v801_v36, 0.0  ;;  %v805_v49 = vadd.f32 %v804_v44, %v5866_v60  ;;  %v914_v26 = vadd.f32 %v913_v25, %v5889_v18  ;;  %v915_v27 = vpop.f32.mrb[18].mxu1 }
 0x171   : > { %1336 = vst [vmem:[%s5563_s3 + $0x100] sm:$0xff] %v1240_v39  ;;  %v1248_v53 = vmax.f32 %v803_v43, 0.0  ;;  %v1242_v29 = vmax.f32 %v912_v24, 0.0  ;;  %v916_v30 = vadd.f32 %v915_v27, %v5883_v14  ;;  %v917_v31 = vpop.f32.mrb[19].mxu1  ;;  %v5993_v24 = vrot.slane %v5855_v57, %v6834_v6  ;;  %v1422_v6 = vld [vmem:[#allocation2 + $0xb0] sm:$0xff] }
 0x172   : > { %1337 = vst [vmem:[%s5563_s3 + $0x108] sm:$0xff] %v1241_v40  ;;  %v1249_v61 = vmax.f32 %v805_v49, 0.0  ;;  %v1243_v34 = vmax.f32 %v914_v26, 0.0  ;;  %v918_v35 = vadd.f32 %v917_v31, %v5889_v18 }
 0x173   : > { %1340 = vst [vmem:[%s5563_s3 + $0x120] sm:$0xff] %v1248_v53  ;;  %1338 = vst [vmem:[%s5563_s3 + $0x110] sm:$0xff] %v1242_v29  ;;  %v1250_v38 = vmax.f32 %v916_v30, 0.0 }
 0x174   : > { %1341 = vst [vmem:[%s5563_s3 + $0x128] sm:$0xff] %v1249_v61  ;;  %v808_v0 = vpop.f32.mrb[20].mxu0  ;;  %1339 = vst [vmem:[%s5563_s3 + $0x118] sm:$0xff] %v1243_v34  ;;  %v1251_v45 = vmax.f32 %v918_v35, 0.0 }
 0x175   : > { %v809_v4 = vadd.f32 %v808_v0, %v5861_v59  ;;  %v810_v5 = vpop.f32.mrb[21].mxu0  ;;  %1342 = vst [vmem:[%s5563_s3 + $0x130] sm:$0xff] %v1250_v38 }
 0x176   : > { %v811_v11 = vadd.f32 %v810_v5, %v5866_v60  ;;  %v812_v12 = vpop.f32.mrb[22].mxu0  ;;  %1343 = vst [vmem:[%s5563_s3 + $0x138] sm:$0xff] %v1251_v45  ;;  %v921_v54 = vpop.f32.mrb[20].mxu1 }
 0x177   : > { %v1256_v42 = vmax.f32 %v809_v4, 0.0  ;;  %v813_v15 = vadd.f32 %v812_v12, %v5861_v59  ;;  %v814_v16 = vpop.f32.mrb[23].mxu0  ;;  %v922_v41 = vadd.f32 %v921_v54, %v5883_v14  ;;  %v923_v62 = vpop.f32.mrb[21].mxu1 }
 0x178   : > { %v1257_v19 = vmax.f32 %v811_v11, 0.0  ;;  %v815_v20 = vadd.f32 %v814_v16, %v5866_v60  ;;  %v924_v63 = vadd.f32 %v923_v62, %v5889_v18  ;;  %v925_v7 = vpop.f32.mrb[22].mxu1 }
 0x179   : > { %1344 = vst [vmem:[%s5563_s3 + $0x140] sm:$0xff] %v1256_v42  ;;  %v1264_v21 = vmax.f32 %v813_v15, 0.0  ;;  %v1258_v1 = vmax.f32 %v922_v41, 0.0  ;;  %v926_v2 = vadd.f32 %v925_v7, %v5883_v14  ;;  %v927_v3 = vpop.f32.mrb[23].mxu1  ;;  %v6832_v42 = vsub.s32 5, %v5849_v55  ;;  %v6017_v41 = vld [vmem:[#allocation2 + $0x460] sm:$0xff] }
 0x17a   : > { %1345 = vst [vmem:[%s5563_s3 + $0x148] sm:$0xff] %v1257_v19  ;;  %v1265_v23 = vmax.f32 %v815_v20, 0.0  ;;  %v1259_v10 = vmax.f32 %v924_v63, 0.0  ;;  %v928_v11 = vadd.f32 %v927_v3, %v5889_v18 }
 0x17b   : > { %1348 = vst [vmem:[%s5563_s3 + $0x160] sm:$0xff] %v1264_v21  ;;  %1346 = vst [vmem:[%s5563_s3 + $0x150] sm:$0xff] %v1258_v1  ;;  %v1266_v15 = vmax.f32 %v926_v2, 0.0  ;;  %v6000_v26 = vrot.slane %v5855_v57, %v6832_v42  ;;  %v6022_v1 = vld [vmem:[#allocation2 + $0x468] sm:$0xff]  ;;  %v1648_v42 = vld [vmem:[#allocation2 + $0x7c0] sm:$0xff] }
 0x17c   : > { %1349 = vst [vmem:[%s5563_s3 + $0x168] sm:$0xff] %v1265_v23  ;;  %v818_v28 = vpop.f32.mrb[24].mxu0  ;;  %1347 = vst [vmem:[%s5563_s3 + $0x158] sm:$0xff] %v1259_v10  ;;  %v1267_v20 = vmax.f32 %v928_v11, 0.0 }
 0x17d   : > { %v819_v32 = vadd.f32 %v818_v28, %v5861_v59  ;;  %v820_v33 = vpop.f32.mrb[25].mxu0  ;;  %1350 = vst [vmem:[%s5563_s3 + $0x170] sm:$0xff] %v1266_v15 }
 0x17e   : > { %v821_v36 = vadd.f32 %v820_v33, %v5866_v60  ;;  %v822_v37 = vpop.f32.mrb[26].mxu0  ;;  %1351 = vst [vmem:[%s5563_s3 + $0x178] sm:$0xff] %v1267_v20  ;;  %v931_v25 = vpop.f32.mrb[24].mxu1 }
 0x17f   : > { %v1272_v39 = vmax.f32 %v819_v32, 0.0  ;;  %v823_v43 = vadd.f32 %v822_v37, %v5861_v59  ;;  %v824_v44 = vpop.f32.mrb[27].mxu0  ;;  %v932_v27 = vadd.f32 %v931_v25, %v5883_v14  ;;  %v6038_v25 = vld [vmem:[#allocation2 + $0x480] sm:$0xff] }
 0x180   : > { %v1273_v40 = vmax.f32 %v821_v36, 0.0  ;;  %v825_v49 = vadd.f32 %v824_v44, %v5866_v60 }
 0x181   : > { %1352 = vst [vmem:[%s5563_s3 + $0x180] sm:$0xff] %v1272_v39  ;;  %v1280_v53 = vmax.f32 %v823_v43, 0.0  ;;  %v1274_v31 = vmax.f32 %v932_v27, 0.0 }
 0x182   : > { %1353 = vst [vmem:[%s5563_s3 + $0x188] sm:$0xff] %v1273_v40  ;;  %v1281_v61 = vmax.f32 %v825_v49, 0.0 }
 0x183   : > { %1356 = vst [vmem:[%s5563_s3 + $0x1a0] sm:$0xff] %v1280_v53  ;;  %1354 = vst [vmem:[%s5563_s3 + $0x190] sm:$0xff] %v1274_v31 }
 0x184   : > { %1357 = vst [vmem:[%s5563_s3 + $0x1a8] sm:$0xff] %v1281_v61  ;;  %v828_v0 = vpop.f32.mrb[28].mxu0  ;;  %v6015_v61 = vld [vmem:[#allocation2 + $0x440] sm:$0xff] }
 0x185   : > { %v829_v4 = vadd.f32 %v828_v0, %v5861_v59  ;;  %v830_v5 = vpop.f32.mrb[29].mxu0  ;;  %v6020_v0 = vld [vmem:[#allocation2 + $0x448] sm:$0xff] }
 0x186   : > { %v831_v12 = vadd.f32 %v830_v5, %v5866_v60  ;;  %v832_v13 = vpop.f32.mrb[30].mxu0 }
 0x187   : > { %v1288_v16 = vmax.f32 %v829_v4, 0.0  ;;  %v833_v17 = vadd.f32 %v832_v13, %v5861_v59  ;;  %v834_v19 = vpop.f32.mrb[31].mxu0  ;;  %v6833_v4 = vsub.s32 6, %v5849_v55 }
 0x188   : > { %v1289_v21 = vmax.f32 %v831_v12, 0.0  ;;  %v835_v22 = vadd.f32 %v834_v19, %v5866_v60  ;;  %v933_v60 = vpop.f32.mrb[25].mxu1  ;;  %v6831_v12 = vsub.s32 7, %v5849_v55 }
 0x189   : > { %1360 = vst [vmem:[%s5563_s3 + $0x1c0] sm:$0xff] %v1288_v16  ;;  %v1296_v23 = vmax.f32 %v833_v17, 0.0  ;;  %v934_v28 = vadd.f32 %v933_v60, %v5889_v18  ;;  %v935_v29 = vpop.f32.mrb[26].mxu1  ;;  %v4646_v16 = vcombine.high %v6015_v61, %v6017_v41 }
 0x18a   : > { %1361 = vst [vmem:[%s5563_s3 + $0x1c8] sm:$0xff] %v1289_v21  ;;  %v1297_v59 = vmax.f32 %v835_v22, 0.0  ;;  %v936_v32 = vadd.f32 %v935_v29, %v5883_v14  ;;  %v937_v33 = vpop.f32.mrb[27].mxu1  ;;  %v6046_v29 = vld [vmem:[#allocation2 + $0x488] sm:$0xff] }
 0x18b   : > { %1364 = vst [vmem:[%s5563_s3 + $0x1e0] sm:$0xff] %v1296_v23  ;;  %v1275_v36 = vmax.f32 %v934_v28, 0.0  ;;  %v938_v37 = vadd.f32 %v937_v33, %v5889_v18  ;;  %v941_v62 = vpop.f32.mrb[28].mxu1  ;;  %v4648_v23 = vcombine.high %v6020_v0, %v6022_v1 }
 0x18c   : > { %1365 = vst [vmem:[%s5563_s3 + $0x1e8] sm:$0xff] %v1297_v59  ;;  %v984_v30 = vpop.f32.mrb[32].mxu0  ;;  %v1282_v43 = vmax.f32 %v936_v32, 0.0  ;;  %v942_v2 = vadd.f32 %v941_v62, %v5883_v14  ;;  %v943_v3 = vpop.f32.mrb[29].mxu1 }
 0x18d   : > { %v985_v34 = vadd.f32 %v984_v30, %v5993_v24  ;;  %v986_v35 = vpop.f32.mrb[33].mxu0  ;;  %1355 = vst [vmem:[%s5563_s3 + $0x198] sm:$0xff] %v1275_v36  ;;  %v1283_v40 = vmax.f32 %v938_v37, 0.0  ;;  %v944_v10 = vadd.f32 %v943_v3, %v5889_v18  ;;  %v945_v11 = vpop.f32.mrb[30].mxu1  ;;  %v6048_v30 = vld [vmem:[#allocation2 + $0x4a8] sm:$0xff]  ;;  %v4645_v37 = vcombine.low %v6015_v61, %v6017_v41 }
 0x18e   : > { %v987_v38 = vadd.f32 %v986_v35, %v6000_v26  ;;  %v988_v39 = vpop.f32.mrb[34].mxu0  ;;  %1358 = vst [vmem:[%s5563_s3 + $0x1b0] sm:$0xff] %v1282_v43  ;;  %v1290_v17 = vmax.f32 %v942_v2, 0.0  ;;  %v946_v19 = vadd.f32 %v945_v11, %v5883_v14  ;;  %v947_v20 = vpop.f32.mrb[31].mxu1  ;;  %v6044_v14 = vld [vmem:[#allocation2 + $0x4a0] sm:$0xff]  ;;  %v6063_v35 = vrot.slane %v5855_v57, %v6831_v12 }
 0x18f   : > { %v989_v44 = vadd.f32 %v988_v39, %v5993_v24  ;;  %v990_v45 = vpop.f32.mrb[35].mxu0  ;;  %v1180_v53 = vmax.f32 %v985_v34, 0.0  ;;  %1359 = vst [vmem:[%s5563_s3 + $0x1b8] sm:$0xff] %v1283_v40  ;;  %v1291_v59 = vmax.f32 %v944_v10, 0.0  ;;  %v948_v27 = vadd.f32 %v947_v20, %v5889_v18  ;;  %v1097_v50 = vpop.f32.mrb[32].mxu1 }
 0x190   : > { %v991_v49 = vadd.f32 %v990_v45, %v6000_v26  ;;  %v1181_v63 = vmax.f32 %v987_v38, 0.0  ;;  %1362 = vst [vmem:[%s5563_s3 + $0x1d0] sm:$0xff] %v1290_v17  ;;  %v1298_v31 = vmax.f32 %v946_v19, 0.0  ;;  %v6054_v18 = vrot.slane %v5855_v57, %v6833_v4  ;;  %v6088_v45 = vld [vmem:[#allocation2 + $0x4e8] sm:$0xff]  ;;  %v6108_v17 = vld [vmem:[#allocation2 + $0x520] sm:$0xff] }
 0x191   : > { %v1188_v54 = vmax.f32 %v989_v44, 0.0  ;;  %1363 = vst [vmem:[%s5563_s3 + $0x1d8] sm:$0xff] %v1291_v59  ;;  %v1299_v34 = vmax.f32 %v948_v27, 0.0  ;;  %v4647_v38 = vcombine.low %v6020_v0, %v6022_v1  ;;  %v4654_v43 = vcombine.high %v6038_v25, %v6044_v14  ;;  %v6086_v44 = vld [vmem:[#allocation2 + $0x4c8] sm:$0xff] }
 0x192   : > { %v1189_v7 = vmax.f32 %v991_v49, 0.0  ;;  %1366 = vst [vmem:[%s5563_s3 + $0x1f0] sm:$0xff] %v1298_v31  ;;  %v4656_v46 = vcombine.high %v6046_v29, %v6048_v30  ;;  %v1098_v40 = vadd.f32 %v1097_v50, %v6054_v18  ;;  %v1099_v49 = vpop.f32.mrb[33].mxu1  ;;  %v4655_v61 = vcombine.low %v6046_v29, %v6048_v30 }
 0x193   : > { %v6026_v5 = vpack.c.bf16 %v1188_v54, %v1180_v53  ;;  %1367 = vst [vmem:[%s5563_s3 + $0x1f8] sm:$0xff] %v1299_v34  ;;  %v4653_v54 = vcombine.low %v6038_v25, %v6044_v14  ;;  %v1100_v41 = vadd.f32 %v1099_v49, %v6063_v35  ;;  %v1101_v62 = vpop.f32.mrb[34].mxu1  ;;  %v4662_v0 = vcombine.high %v6081_v47, %v6083_v48  ;;  %v6116_v25 = vld [vmem:[#allocation2 + $0x528] sm:$0xff] }
 0x194   : > { %v6030_v13 = vpack.c.bf16 %v1189_v7, %v1181_v63  ;;  %v994_v15 = vpop.f32.mrb[36].mxu0  ;;  %v1182_v1 = vmax.f32 %v1098_v40, 0.0  ;;  %v1102_v2 = vadd.f32 %v1101_v62, %v6054_v18  ;;  %v1103_v3 = vpop.f32.mrb[35].mxu1  ;;  %v4663_v14 = vcombine.low %v6086_v44, %v6088_v45 }
 0x195   : > { %v995_v21 = vadd.f32 %v994_v15, %v5993_v24  ;;  %v996_v22 = vpop.f32.mrb[37].mxu0  ;;  %v4664_v15 = vcombine.high %v6086_v44, %v6088_v45  ;;  %v1183_v19 = vmax.f32 %v1100_v41, 0.0  ;;  %v1104_v20 = vadd.f32 %v1103_v3, %v6063_v35 }
 0x196   : > { %v997_v60 = vadd.f32 %v996_v22, %v6000_v26  ;;  %v998_v28 = vpop.f32.mrb[38].mxu0  ;;  %3010 = vmatprep.mubr.bf16.mxu0 %v6030_v13  ;;  %3236 = vmatprep.mubr.bf16.mxu1 %v6030_v13  ;;  %v1190_v59 = vmax.f32 %v1102_v2, 0.0 }
 0x197   : > { %v999_v32 = vadd.f32 %v998_v28, %v5993_v24  ;;  %v1000_v33 = vpop.f32.mrb[39].mxu0  ;;  %3011 = vmatmul.mubr.bf16.vlgmr.msra.gmra.mrb[64].mxu0 %v6026_v5  ;;  %3237 = vmatmul.mubr.bf16.vlgmr.msra.gmra.mrb[64].mxu1 %v6026_v5  ;;  %v1196_v39 = vmax.f32 %v995_v21, 0.0  ;;  %v4661_v28 = vcombine.low %v6081_v47, %v6083_v48  ;;  %v1191_v29 = vmax.f32 %v1104_v20, 0.0  ;;  %v6138_v47 = vld [vmem:[#allocation2 + $0x548] sm:$0xff] }
 0x198   : > { %v1001_v36 = vadd.f32 %v1000_v33, %v6000_v26  ;;  %3092 = vmatpush1.bf16.msra.mxu0 %v4637_v51  ;;  %3318 = vmatpush1.bf16.msra.mxu1 %v4639_v52  ;;  %v1197_v51 = vmax.f32 %v997_v60, 0.0  ;;  %v6140_v48 = vld [vmem:[#allocation2 + $0x568] sm:$0xff] }
 0x199   : > { %v1204_v57 = vmax.f32 %v999_v32, 0.0  ;;  %3093 = vmatprep.subr.bf16.mxu0 %v4646_v16  ;;  %3319 = vmatprep.subr.bf16.mxu1 %v4648_v23  ;;  %v6106_v16 = vld [vmem:[#allocation2 + $0x500] sm:$0xff]  ;;  %v6114_v23 = vld [vmem:[#allocation2 + $0x508] sm:$0xff]  ;;  %v6128_v32 = vpack.c.bf16 %v1190_v59, %v1182_v1  ;;  %v4680_v3 = vcombine.high %v6138_v47, %v6140_v48 }
 0x19a   : > { %v1205_v52 = vmax.f32 %v1001_v36, 0.0  ;;  %v4670_v31 = vcombine.high %v6106_v16, %v6108_v17  ;;  %v4672_v36 = vcombine.high %v6114_v23, %v6116_v25  ;;  %v4669_v44 = vcombine.low %v6106_v16, %v6108_v17  ;;  %v6166_v20 = vld [vmem:[#allocation2 + $0x588] sm:$0xff] }
 0x19b   : > { %v6091_v53 = vpack.c.bf16 %v1204_v57, %v1196_v39  ;;  %v6136_v39 = vpack.c.bf16 %v1191_v29, %v1183_v19  ;;  %v1107_v57 = vpop.f32.mrb[36].mxu1  ;;  %v4671_v45 = vcombine.low %v6114_v23, %v6116_v25 }
 0x19c   : > { %v6098_v63 = vpack.c.bf16 %v1205_v52, %v1197_v51  ;;  %v1004_v7 = vpop.f32.mrb[40].mxu0  ;;  %3094 = vmatpush1.bf16.msra.mxu0 %v4645_v37  ;;  %3320 = vmatpush1.bf16.msra.mxu1 %v4647_v38  ;;  %v6132_v37 = vld [vmem:[#allocation2 + $0x540] sm:$0xff]  ;;  %v1108_v50 = vadd.f32 %v1107_v57, %v6054_v18  ;;  %v1109_v51 = vpop.f32.mrb[37].mxu1 }
 0x19d   : > { %v1005_v10 = vadd.f32 %v1004_v7, %v5993_v24  ;;  %v1006_v11 = vpop.f32.mrb[41].mxu0  ;;  %3095 = vmatprep.subr.bf16.mxu0 %v4654_v43  ;;  %3321 = vmatprep.subr.bf16.mxu1 %v4656_v46  ;;  %v6134_v38 = vld [vmem:[#allocation2 + $0x560] sm:$0xff]  ;;  %v1110_v40 = vadd.f32 %v1109_v51, %v6063_v35  ;;  %v1111_v49 = vpop.f32.mrb[38].mxu1 }
 0x19e   : > { %v1007_v21 = vadd.f32 %v1006_v11, %v6000_v26  ;;  %v1008_v22 = vpop.f32.mrb[42].mxu0  ;;  %3020 = vmatprep.mubr.bf16.mxu0 %v6098_v63  ;;  %3246 = vmatprep.mubr.bf16.mxu1 %v6098_v63  ;;  %v4678_v41 = vcombine.high %v6132_v37, %v6134_v38  ;;  %v1198_v62 = vmax.f32 %v1108_v50, 0.0  ;;  %v1112_v7 = vadd.f32 %v1111_v49, %v6054_v18  ;;  %v6160_v11 = vld [vmem:[#allocation2 + $0x5a0] sm:$0xff] }
 0x19f   : > { %v1009_v27 = vadd.f32 %v1008_v22, %v5993_v24  ;;  %v1010_v60 = vpop.f32.mrb[43].mxu0  ;;  %3021 = vmatmul.mubr.bf16.gmra.mrb[68].mxu0 %v6091_v53  ;;  %3247 = vmatmul.mubr.bf16.gmra.mrb[68].mxu1 %v6091_v53  ;;  %v1212_v33 = vmax.f32 %v1005_v10, 0.0  ;;  %v6158_v10 = vld [vmem:[#allocation2 + $0x580] sm:$0xff]  ;;  %v4677_v59 = vcombine.low %v6132_v37, %v6134_v38 }
 0x1a0   : > { %v1011_v30 = vadd.f32 %v1010_v60, %v6000_v26  ;;  %3096 = vmatpush1.bf16.msra.mxu0 %v4653_v54  ;;  %3322 = vmatpush1.bf16.msra.mxu1 %v4655_v61  ;;  %v1213_v43 = vmax.f32 %v1007_v21, 0.0  ;;  %v6168_v21 = vld [vmem:[#allocation2 + $0x5a8] sm:$0xff]  ;;  %v1206_v22 = vmax.f32 %v1112_v7, 0.0 }
 0x1a1   : > { %v1220_v34 = vmax.f32 %v1009_v27, 0.0  ;;  %3097 = vmatprep.subr.bf16.mxu0 %v4662_v0  ;;  %3323 = vmatprep.subr.bf16.mxu1 %v4664_v15  ;;  %v1113_v0 = vpop.f32.mrb[39].mxu1  ;;  %v1199_v15 = vmax.f32 %v1110_v40, 0.0  ;;  %v4679_v27 = vcombine.low %v6138_v47, %v6140_v48  ;;  %v6192_v47 = vld [vmem:[#allocation2 + $0x5e8] sm:$0xff] }
 0x1a2   : > { %v1221_v46 = vmax.f32 %v1011_v30, 0.0  ;;  %v1114_v16 = vadd.f32 %v1113_v0, %v6063_v35  ;;  %v6180_v29 = vpack.c.bf16 %v1206_v22, %v1198_v62  ;;  %v1117_v38 = vpop.f32.mrb[40].mxu1  ;;  %v6220_v22 = vld [vmem:[#allocation2 + $0x628] sm:$0xff] }
 0x1a3   : > { %v6143_v52 = vpack.c.bf16 %v1220_v34, %v1212_v33  ;;  %v4688_v33 = vcombine.high %v6166_v20, %v6168_v21  ;;  %v6184_v34 = vld [vmem:[#allocation2 + $0x5c0] sm:$0xff]  ;;  %v1118_v48 = vadd.f32 %v1117_v38, %v6054_v18  ;;  %v1119_v50 = vpop.f32.mrb[41].mxu1 }
 0x1a4   : > { %v6150_v54 = vpack.c.bf16 %v1221_v46, %v1213_v43  ;;  %v1014_v61 = vpop.f32.mrb[44].mxu0  ;;  %3098 = vmatpush1.bf16.msra.mxu0 %v4661_v28  ;;  %3324 = vmatpush1.bf16.msra.mxu1 %v4663_v14  ;;  %v1207_v60 = vmax.f32 %v1114_v16, 0.0  ;;  %v4686_v14 = vcombine.high %v6158_v10, %v6160_v11  ;;  %v6190_v46 = vld [vmem:[#allocation2 + $0x5c8] sm:$0xff]  ;;  %v1120_v40 = vadd.f32 %v1119_v50, %v6063_v35  ;;  %v1121_v49 = vpop.f32.mrb[42].mxu1 }
 0x1a5   : > { %v1015_v1 = vadd.f32 %v1014_v61, %v5993_v24  ;;  %v1016_v2 = vpop.f32.mrb[45].mxu0  ;;  %3099 = vmatprep.subr.bf16.mxu0 %v4670_v31  ;;  %3325 = vmatprep.subr.bf16.mxu1 %v4672_v36  ;;  %v6186_v36 = vld [vmem:[#allocation2 + $0x5e0] sm:$0xff]  ;;  %v1214_v7 = vmax.f32 %v1118_v48, 0.0  ;;  %v1122_v0 = vadd.f32 %v1121_v49, %v6054_v18  ;;  %v6242_v50 = vld [vmem:[#allocation2 + $0x648] sm:$0xff] }
 0x1a6   : > { %v1017_v17 = vadd.f32 %v1016_v2, %v6000_v26  ;;  %v1018_v19 = vpop.f32.mrb[46].mxu0  ;;  %3030 = vmatprep.mubr.bf16.mxu0 %v6150_v54  ;;  %3256 = vmatprep.mubr.bf16.mxu1 %v6150_v54  ;;  %v6188_v37 = vpack.c.bf16 %v1207_v60, %v1199_v15  ;;  %v4694_v62 = vcombine.high %v6184_v34, %v6186_v36  ;;  %v6212_v15 = vld [vmem:[#allocation2 + $0x620] sm:$0xff]  ;;  %v1215_v16 = vmax.f32 %v1120_v40, 0.0 }
 0x1a7   : > { %v1019_v23 = vadd.f32 %v1018_v19, %v5993_v24  ;;  %v1020_v25 = vpop.f32.mrb[47].mxu0  ;;  %3031 = vmatmul.mubr.bf16.gmra.mrb[72].mxu0 %v6143_v52  ;;  %3257 = vmatmul.mubr.bf16.gmra.mrb[72].mxu1 %v6143_v52  ;;  %v1228_v30 = vmax.f32 %v1015_v1, 0.0  ;;  %v1123_v1 = vpop.f32.mrb[43].mxu1  ;;  %v4695_v60 = vcombine.low %v6190_v46, %v6192_v47 }
 0x1a8   : > { %v1021_v28 = vadd.f32 %v1020_v25, %v6000_v26  ;;  %3100 = vmatpush1.bf16.msra.mxu0 %v4669_v44  ;;  %3326 = vmatpush1.bf16.msra.mxu1 %v4671_v45  ;;  %v1229_v57 = vmax.f32 %v1017_v17, 0.0  ;;  %v4685_v44 = vcombine.low %v6158_v10, %v6160_v11  ;;  %v4687_v45 = vcombine.low %v6166_v20, %v6168_v21  ;;  %v6210_v11 = vld [vmem:[#allocation2 + $0x600] sm:$0xff]  ;;  %v6218_v21 = vld [vmem:[#allocation2 + $0x608] sm:$0xff] }
 0x1a9   : > { %v1236_v31 = vmax.f32 %v1019_v23, 0.0  ;;  %3101 = vmatprep.subr.bf16.mxu0 %v4678_v41  ;;  %3327 = vmatprep.subr.bf16.mxu1 %v4680_v3  ;;  %v4696_v10 = vcombine.high %v6190_v46, %v6192_v47  ;;  %v1124_v17 = vadd.f32 %v1123_v1, %v6063_v35  ;;  %v1222_v23 = vmax.f32 %v1122_v0, 0.0  ;;  %v1127_v46 = vpop.f32.mrb[44].mxu1 }
 0x1aa   : > { %v1237_v43 = vmax.f32 %v1021_v28, 0.0  ;;  %v1129_v40 = vpop.f32.mrb[45].mxu1 }
 0x1ab   : > { %v6195_v51 = vpack.c.bf16 %v1236_v31, %v1228_v30  ;;  %v1223_v28 = vmax.f32 %v1124_v17, 0.0  ;;  %v4702_v30 = vcombine.high %v6210_v11, %v6212_v15  ;;  %v6232_v31 = vpack.c.bf16 %v1222_v23, %v1214_v7  ;;  %v1131_v0 = vpop.f32.mrb[46].mxu1 }
 0x1ac   : > { %v6202_v61 = vpack.c.bf16 %v1237_v43, %v1229_v57  ;;  %v1024_v41 = vpop.f32.mrb[48].mxu0  ;;  %3102 = vmatpush1.bf16.msra.mxu0 %v4677_v59  ;;  %3328 = vmatpush1.bf16.msra.mxu1 %v4679_v27  ;;  %v4693_v27 = vcombine.low %v6184_v34, %v6186_v36  ;;  %v4704_v34 = vcombine.high %v6218_v21, %v6220_v22  ;;  %v6236_v36 = vld [vmem:[#allocation2 + $0x640] sm:$0xff]  ;;  %v1133_v17 = vpop.f32.mrb[47].mxu1 }
 0x1ad   : > { %v1025_v2 = vadd.f32 %v1024_v41, %v5993_v24  ;;  %v1026_v3 = vpop.f32.mrb[49].mxu0  ;;  %3103 = vmatprep.subr.bf16.mxu0 %v4686_v14  ;;  %3329 = vmatprep.subr.bf16.mxu1 %v4688_v33  ;;  %v6238_v57 = vld [vmem:[#allocation2 + $0x660] sm:$0xff]  ;;  %v6240_v43 = vpack.c.bf16 %v1223_v28, %v1215_v16  ;;  %v4701_v41 = vcombine.low %v6210_v11, %v6212_v15 }
 0x1ae   : > { %v1027_v19 = vadd.f32 %v1026_v3, %v6000_v26  ;;  %v1028_v20 = vpop.f32.mrb[50].mxu0  ;;  %3040 = vmatprep.mubr.bf16.mxu0 %v6202_v61  ;;  %3266 = vmatprep.mubr.bf16.mxu1 %v6202_v61  ;;  %v1130_v7 = vadd.f32 %v1129_v40, %v6063_v35  ;;  %v4710_v3 = vcombine.high %v6236_v36, %v6238_v57 }
 0x1af   : > { %v1029_v25 = vadd.f32 %v1028_v20, %v5993_v24  ;;  %v1030_v59 = vpop.f32.mrb[51].mxu0  ;;  %3041 = vmatmul.mubr.bf16.gmra.mrb[76].mxu0 %v6195_v51  ;;  %3267 = vmatmul.mubr.bf16.gmra.mrb[76].mxu1 %v6195_v51  ;;  %v1244_v33 = vmax.f32 %v1025_v2, 0.0  ;;  %v1132_v16 = vadd.f32 %v1131_v0, %v6054_v18  ;;  %v6262_v20 = vld [vmem:[#allocation2 + $0x680] sm:$0xff]  ;;  %v1134_v23 = vadd.f32 %v1133_v17, %v6063_v35  ;;  %v6294_v0 = vld [vmem:[#allocation2 + $0x6c8] sm:$0xff] }
 0x1b0   : > { %v1031_v14 = vadd.f32 %v1030_v59, %v6000_v26  ;;  %3104 = vmatpush1.bf16.msra.mxu0 %v4685_v44  ;;  %3330 = vmatpush1.bf16.msra.mxu1 %v4687_v45  ;;  %v1245_v47 = vmax.f32 %v1027_v19, 0.0  ;;  %v6244_v44 = vld [vmem:[#allocation2 + $0x668] sm:$0xff]  ;;  %v1128_v45 = vadd.f32 %v1127_v46, %v6054_v18 }
 0x1b1   : > { %v1252_v38 = vmax.f32 %v1029_v25, 0.0  ;;  %3105 = vmatprep.subr.bf16.mxu0 %v4694_v62  ;;  %3331 = vmatprep.subr.bf16.mxu1 %v4696_v10  ;;  %v4703_v62 = vcombine.low %v6218_v21, %v6220_v22  ;;  %v4712_v19 = vcombine.high %v6242_v50, %v6244_v44  ;;  %v6264_v21 = vld [vmem:[#allocation2 + $0x6a0] sm:$0xff]  ;;  %v1231_v22 = vmax.f32 %v1130_v7, 0.0 }
 0x1b2   : > { %v1253_v48 = vmax.f32 %v1031_v14, 0.0  ;;  %v1230_v10 = vmax.f32 %v1128_v45, 0.0  ;;  %v1238_v28 = vmax.f32 %v1132_v16, 0.0  ;;  %v4717_v17 = vcombine.low %v6262_v20, %v6264_v21 }
 0x1b3   : > { %v6247_v49 = vpack.c.bf16 %v1252_v38, %v1244_v33  ;;  %v4709_v33 = vcombine.low %v6236_v36, %v6238_v57  ;;  %v4711_v38 = vcombine.low %v6242_v50, %v6244_v44  ;;  %v6288_v57 = vld [vmem:[#allocation2 + $0x6c0] sm:$0xff] }
 0x1b4   : > { %v6254_v1 = vpack.c.bf16 %v1253_v48, %v1245_v47  ;;  %v1034_v2 = vpop.f32.mrb[52].mxu0  ;;  %3106 = vmatpush1.bf16.msra.mxu0 %v4693_v27  ;;  %3332 = vmatpush1.bf16.msra.mxu1 %v4695_v60  ;;  %v6270_v27 = vld [vmem:[#allocation2 + $0x688] sm:$0xff]  ;;  %v4718_v47 = vcombine.high %v6262_v20, %v6264_v21  ;;  %v6284_v48 = vpack.c.bf16 %v1238_v28, %v1230_v10  ;;  %v6290_v50 = vld [vmem:[#allocation2 + $0x6e0] sm:$0xff] }
 0x1b5   : > { %v1035_v11 = vadd.f32 %v1034_v2, %v5993_v24  ;;  %v1036_v15 = vpop.f32.mrb[53].mxu0  ;;  %3107 = vmatprep.subr.bf16.mxu0 %v4702_v30  ;;  %3333 = vmatprep.subr.bf16.mxu1 %v4704_v34  ;;  %v6272_v60 = vld [vmem:[#allocation2 + $0x6a8] sm:$0xff]  ;;  %v1239_v34 = vmax.f32 %v1134_v23, 0.0 }
 0x1b6   : > { %v1037_v25 = vadd.f32 %v1036_v15, %v6000_v26  ;;  %v1038_v59 = vpop.f32.mrb[54].mxu0  ;;  %3050 = vmatprep.mubr.bf16.mxu0 %v6254_v1  ;;  %3276 = vmatprep.mubr.bf16.mxu1 %v6254_v1  ;;  %v4720_v36 = vcombine.high %v6270_v27, %v6272_v60  ;;  %v6296_v2 = vld [vmem:[#allocation2 + $0x6e8] sm:$0xff] }
 0x1b7   : > { %v1039_v14 = vadd.f32 %v1038_v59, %v5993_v24  ;;  %v1040_v30 = vpop.f32.mrb[55].mxu0  ;;  %3051 = vmatmul.mubr.bf16.gmra.mrb[80].mxu0 %v6247_v49  ;;  %3277 = vmatmul.mubr.bf16.gmra.mrb[80].mxu1 %v6247_v49  ;;  %v1260_v45 = vmax.f32 %v1035_v11, 0.0  ;;  %v6292_v44 = vpack.c.bf16 %v1239_v34, %v1231_v22  ;;  %v4719_v11 = vcombine.low %v6270_v27, %v6272_v60  ;;  %v6314_v60 = vld [vmem:[#allocation2 + $0x700] sm:$0xff] }
 0x1b8   : > { %v1041_v46 = vadd.f32 %v1040_v30, %v6000_v26  ;;  %3108 = vmatpush1.bf16.msra.mxu0 %v4701_v41  ;;  %3334 = vmatpush1.bf16.msra.mxu1 %v4703_v62  ;;  %v1137_v41 = vpop.f32.mrb[48].mxu1  ;;  %v1261_v62 = vmax.f32 %v1037_v25, 0.0  ;;  %v4726_v25 = vcombine.high %v6288_v57, %v6290_v50  ;;  %v4728_v27 = vcombine.high %v6294_v0, %v6296_v2  ;;  %v6316_v30 = vld [vmem:[#allocation2 + $0x720] sm:$0xff] }
 0x1b9   : > { %v1268_v40 = vmax.f32 %v1039_v14, 0.0  ;;  %3109 = vmatprep.subr.bf16.mxu0 %v4710_v3  ;;  %3335 = vmatprep.subr.bf16.mxu1 %v4712_v19  ;;  %v1138_v10 = vadd.f32 %v1137_v41, %v6054_v18  ;;  %v1139_v3 = vpop.f32.mrb[49].mxu1 }
 0x1ba   : > { %v1269_v7 = vmax.f32 %v1041_v46, 0.0  ;;  %v1140_v15 = vadd.f32 %v1139_v3, %v6063_v35  ;;  %v1141_v19 = vpop.f32.mrb[50].mxu1 }
 0x1bb   : > { %v6299_v16 = vpack.c.bf16 %v1268_v40, %v1260_v45  ;;  %v1246_v59 = vmax.f32 %v1138_v10, 0.0  ;;  %v1142_v28 = vadd.f32 %v1141_v19, %v6054_v18  ;;  %v1143_v14 = vpop.f32.mrb[51].mxu1  ;;  %v6322_v45 = vld [vmem:[#allocation2 + $0x708] sm:$0xff] }
 0x1bc   : > { %v6306_v22 = vpack.c.bf16 %v1269_v7, %v1261_v62  ;;  %v1044_v23 = vpop.f32.mrb[56].mxu0  ;;  %3110 = vmatpush1.bf16.msra.mxu0 %v4709_v33  ;;  %3336 = vmatpush1.bf16.msra.mxu1 %v4711_v38  ;;  %v1247_v33 = vmax.f32 %v1140_v15, 0.0  ;;  %v1144_v38 = vadd.f32 %v1143_v14, %v6063_v35  ;;  %v4725_v62 = vcombine.low %v6288_v57, %v6290_v50  ;;  %v6340_v50 = vld [vmem:[#allocation2 + $0x740] sm:$0xff] }
 0x1bd   : > { %v1045_v20 = vadd.f32 %v1044_v23, %v5993_v24  ;;  %v1046_v21 = vpop.f32.mrb[57].mxu0  ;;  %3111 = vmatprep.subr.bf16.mxu0 %v4718_v47  ;;  %3337 = vmatprep.subr.bf16.mxu1 %v4720_v36  ;;  %v6324_v47 = vld [vmem:[#allocation2 + $0x728] sm:$0xff]  ;;  %v1254_v40 = vmax.f32 %v1142_v28, 0.0  ;;  %v4727_v7 = vcombine.low %v6294_v0, %v6296_v2  ;;  %v4734_v15 = vcombine.high %v6314_v60, %v6316_v30  ;;  %v6342_v0 = vld [vmem:[#allocation2 + $0x760] sm:$0xff] }
 0x1be   : > { %v1047_v34 = vadd.f32 %v1046_v21, %v6000_v26  ;;  %v1048_v46 = vpop.f32.mrb[58].mxu0  ;;  %3060 = vmatprep.mubr.bf16.mxu0 %v6306_v22  ;;  %3286 = vmatprep.mubr.bf16.mxu1 %v6306_v22  ;;  %v1255_v10 = vmax.f32 %v1144_v38, 0.0  ;;  %v4736_v57 = vcombine.high %v6322_v45, %v6324_v47  ;;  %v6346_v21 = vld [vmem:[#allocation2 + $0x748] sm:$0xff]  ;;  %v4733_v38 = vcombine.low %v6314_v60, %v6316_v30 }
 0x1bf   : > { %v1049_v36 = vadd.f32 %v1048_v46, %v5993_v24  ;;  %v1050_v41 = vpop.f32.mrb[59].mxu0  ;;  %3061 = vmatmul.mubr.bf16.gmra.mrb[84].mxu0 %v6299_v16  ;;  %3287 = vmatmul.mubr.bf16.gmra.mrb[84].mxu1 %v6299_v16  ;;  %v6336_v19 = vpack.c.bf16 %v1254_v40, %v1246_v59  ;;  %v1276_v23 = vmax.f32 %v1045_v20, 0.0  ;;  %v6348_v59 = vld [vmem:[#allocation2 + $0x768] sm:$0xff]  ;;  %v4735_v46 = vcombine.low %v6322_v45, %v6324_v47  ;;  %v6366_v47 = vld [vmem:[#allocation2 + $0x780] sm:$0xff] }
 0x1c0   : > { %v1051_v3 = vadd.f32 %v1050_v41, %v6000_v26  ;;  %3112 = vmatpush1.bf16.msra.mxu0 %v4717_v17  ;;  %3338 = vmatpush1.bf16.msra.mxu1 %v4719_v11  ;;  %v6344_v2 = vpack.c.bf16 %v1255_v10, %v1247_v33  ;;  %v1147_v17 = vpop.f32.mrb[52].mxu1  ;;  %v1277_v11 = vmax.f32 %v1047_v34, 0.0  ;;  %v4742_v41 = vcombine.high %v6340_v50, %v6342_v0 }
 0x1c1   : > { %v1284_v28 = vmax.f32 %v1049_v36, 0.0  ;;  %3113 = vmatprep.subr.bf16.mxu0 %v4726_v25  ;;  %3339 = vmatprep.subr.bf16.mxu1 %v4728_v27  ;;  %v1148_v20 = vadd.f32 %v1147_v17, %v6054_v18  ;;  %v1149_v25 = vpop.f32.mrb[53].mxu1  ;;  %v4744_v45 = vcombine.high %v6346_v21, %v6348_v59 }
 0x1c2   : > { %v1285_v14 = vmax.f32 %v1051_v3, 0.0  ;;  %v1150_v33 = vadd.f32 %v1149_v25, %v6063_v35  ;;  %v1151_v40 = vpop.f32.mrb[54].mxu1 }
 0x1c3   : > { %v6351_v27 = vpack.c.bf16 %v1284_v28, %v1276_v23  ;;  %v1262_v10 = vmax.f32 %v1148_v20, 0.0  ;;  %v1152_v3 = vadd.f32 %v1151_v40, %v6054_v18  ;;  %v1153_v23 = vpop.f32.mrb[55].mxu1  ;;  %v6368_v28 = vld [vmem:[#allocation2 + $0x7a0] sm:$0xff]  ;;  %v4743_v40 = vcombine.low %v6346_v21, %v6348_v59 }
 0x1c4   : > { %v6358_v34 = vpack.c.bf16 %v1285_v14, %v1277_v11  ;;  %v1054_v36 = vpop.f32.mrb[60].mxu0  ;;  %3114 = vmatpush1.bf16.msra.mxu0 %v4725_v62  ;;  %3340 = vmatpush1.bf16.msra.mxu1 %v4727_v7  ;;  %v1263_v62 = vmax.f32 %v1150_v33, 0.0  ;;  %v1154_v7 = vadd.f32 %v1153_v23, %v6063_v35  ;;  %v1641_v14 = vld [vmem:[#allocation2 + $0x788] sm:$0xff]  ;;  %v4741_v33 = vcombine.low %v6340_v50, %v6342_v0  ;;  %v1157_v0 = vpop.f32.mrb[56].mxu1 }
 0x1c5   : > { %v1055_v60 = vadd.f32 %v1054_v36, %v5993_v24  ;;  %v1056_v30 = vpop.f32.mrb[61].mxu0  ;;  %3115 = vmatprep.subr.bf16.mxu0 %v4734_v15  ;;  %3341 = vmatprep.subr.bf16.mxu1 %v4736_v57  ;;  %v1645_v15 = vld [vmem:[#allocation2 + $0x7a8] sm:$0xff]  ;;  %v1270_v57 = vmax.f32 %v1152_v3, 0.0  ;;  %v4750_v3 = vcombine.high %v6366_v47, %v6368_v28 }
 0x1c6   : > { %v1057_v17 = vadd.f32 %v1056_v30, %v6000_v26  ;;  %v1058_v11 = vpop.f32.mrb[62].mxu0  ;;  %3070 = vmatprep.mubr.bf16.mxu0 %v6358_v34  ;;  %3296 = vmatprep.mubr.bf16.mxu1 %v6358_v34  ;;  %v1271_v36 = vmax.f32 %v1154_v7, 0.0  ;;  %v4752_v12 = vcombine.high %v1641_v14, %v1645_v15  ;;  %v1652_v7 = vld [vmem:[#allocation2 + $0x7e0] sm:$0xff] }
 0x1c7   : > { %v1059_v20 = vadd.f32 %v1058_v11, %v5993_v24  ;;  %v1060_v25 = vpop.f32.mrb[63].mxu0  ;;  %3071 = vmatmul.mubr.bf16.gmra.mrb[88].mxu0 %v6351_v27  ;;  %3297 = vmatmul.mubr.bf16.gmra.mrb[88].mxu1 %v6351_v27  ;;  %v6384_v24 = vpack.c.bf16 %v1270_v57, %v1262_v10  ;;  %v1292_v30 = vmax.f32 %v1055_v60, 0.0  ;;  %v4749_v10 = vcombine.low %v6366_v47, %v6368_v28  ;;  %v1406_v28 = vld [vmem:[#allocation2 + $0x30] sm:$0xff] }
 0x1c8   : > { %v1061_v23 = vadd.f32 %v1060_v25, %v6000_v26  ;;  %3116 = vmatpush1.bf16.msra.mxu0 %v4733_v38  ;;  %3342 = vmatpush1.bf16.msra.mxu1 %v4735_v46  ;;  %v6386_v50 = vpack.c.bf16 %v1271_v36, %v1263_v62  ;;  %v1293_v21 = vmax.f32 %v1057_v17, 0.0  ;;  %v1649_v26 = vld [vmem:[#allocation2 + $0x7c8] sm:$0xff]  ;;  %v1158_v46 = vadd.f32 %v1157_v0, %v6054_v18  ;;  %v1159_v25 = vpop.f32.mrb[57].mxu1 }
 0x1c9   : > { %v1300_v11 = vmax.f32 %v1059_v20, 0.0  ;;  %3117 = vmatprep.subr.bf16.mxu0 %v4742_v41  ;;  %3343 = vmatprep.subr.bf16.mxu1 %v4744_v45  ;;  %v1653_v38 = vld [vmem:[#allocation2 + $0x7e8] sm:$0xff]  ;;  %v1160_v41 = vadd.f32 %v1159_v25, %v6063_v35  ;;  %v1161_v60 = vpop.f32.mrb[58].mxu1  ;;  %v4751_v62 = vcombine.low %v1641_v14, %v1645_v15  ;;  %v4758_v36 = vcombine.high %v1648_v42, %v1652_v7 }
 0x1ca   : > { %v1301_v59 = vmax.f32 %v1061_v23, 0.0  ;;  %v1278_v17 = vmax.f32 %v1158_v46, 0.0  ;;  %v1162_v57 = vadd.f32 %v1161_v60, %v6054_v18  ;;  %v1163_v20 = vpop.f32.mrb[59].mxu1  ;;  %v4760_v23 = vcombine.high %v1649_v26, %v1653_v38  ;;  %v1410_v46 = vld [vmem:[#allocation2 + $0x50] sm:$0xff] }
 0x1cb   : > { %v6389_v4 = vpack.c.bf16 %v1300_v11, %v1292_v30  ;;  %v1402_v30 = vld [vmem:[#allocation2 + $0x10] sm:$0xff]  ;;  %v1279_v11 = vmax.f32 %v1160_v41, 0.0  ;;  %v1164_v47 = vadd.f32 %v1163_v20, %v6063_v35  ;;  %v1167_v41 = vpop.f32.mrb[60].mxu1 }
 0x1cc   : > { %v6394_v45 = vpack.c.bf16 %v1301_v59, %v1293_v21  ;;  %3118 = vmatpush1.bf16.msra.mxu0 %v4741_v33  ;;  %3344 = vmatpush1.bf16.msra.mxu1 %v4743_v40  ;;  %v1403_v33 = vld [vmem:[#allocation2 + $0x18] sm:$0xff]  ;;  %v1286_v14 = vmax.f32 %v1162_v57, 0.0  ;;  %v4514_v21 = vcombine.high %v1402_v30, %v1406_v28  ;;  %v1414_v60 = vld [vmem:[#allocation2 + $0x70] sm:$0xff] }
 0x1cd   : > { %3119 = vmatprep.subr.bf16.mxu0 %v4750_v3  ;;  %3345 = vmatprep.subr.bf16.mxu1 %v4752_v12  ;;  %v1407_v40 = vld [vmem:[#allocation2 + $0x38] sm:$0xff]  ;;  %v1287_v15 = vmax.f32 %v1164_v47, 0.0  ;;  %v4757_v12 = vcombine.low %v1648_v42, %v1652_v7  ;;  %v4759_v3 = vcombine.low %v1649_v26, %v1653_v38  ;;  %v1168_v42 = vadd.f32 %v1167_v41, %v6054_v18  ;;  %v1169_v7 = vpop.f32.mrb[61].mxu1 }
 0x1ce   : > { %3080 = vmatprep.mubr.bf16.mxu0 %v6394_v45  ;;  %3306 = vmatprep.mubr.bf16.mxu1 %v6394_v45  ;;  %v6402_v0 = vpack.c.bf16 %v1286_v14, %v1278_v17  ;;  %v4516_v59 = vcombine.high %v1403_v33, %v1407_v40  ;;  %v1411_v57 = vld [vmem:[#allocation2 + $0x58] sm:$0xff]  ;;  %v1170_v26 = vadd.f32 %v1169_v7, %v6063_v35  ;;  %v1171_v38 = vpop.f32.mrb[62].mxu1  ;;  %v1418_v14 = vld [vmem:[#allocation2 + $0x90] sm:$0xff] }
 0x1cf   : > { %3081 = vmatmul.mubr.bf16.gmra.mrb[92].mxu0 %v6389_v4  ;;  %3307 = vmatmul.mubr.bf16.gmra.mrb[92].mxu1 %v6389_v4  ;;  %v6404_v25 = vpack.c.bf16 %v1287_v15, %v1279_v11  ;;  %v4515_v17 = vcombine.low %v1403_v33, %v1407_v40  ;;  %v1294_v20 = vmax.f32 %v1168_v42, 0.0  ;;  %v4522_v11 = vcombine.high %v1410_v46, %v1414_v60  ;;  %v1423_v7 = vld [vmem:[#allocation2 + $0xb8] sm:$0xff] }
 0x1d0   : > { %3120 = vmatpush1.bf16.msra.mxu0 %v4749_v10  ;;  %3346 = vmatpush1.bf16.msra.mxu1 %v4751_v62  ;;  %v1415_v10 = vld [vmem:[#allocation2 + $0x78] sm:$0xff]  ;;  %v4513_v62 = vcombine.low %v1402_v30, %v1406_v28  ;;  %v1295_v15 = vmax.f32 %v1170_v26, 0.0  ;;  %v4530_v40 = vcombine.high %v1418_v14, %v1422_v6  ;;  %v1438_v26 = vld [vmem:[#allocation2 + $0x130] sm:$0xff] }
 0x1d1   : > { %3121 = vmatprep.subr.bf16.mxu0 %v4758_v36  ;;  %3347 = vmatprep.subr.bf16.mxu1 %v4760_v23  ;;  %v1172_v36 = vadd.f32 %v1171_v38, %v6054_v18  ;;  %v1173_v23 = vpop.f32.mrb[63].mxu1  ;;  %v4524_v47 = vcombine.high %v1411_v57, %v1415_v10  ;;  %v4521_v18 = vcombine.low %v1410_v46, %v1414_v60  ;;  %v1431_v42 = vld [vmem:[#allocation2 + $0xf8] sm:$0xff] }
 0x1d2   : > { %3123 = vmatprep.mubr.bf16.mxu0 %v6136_v39  ;;  %3349 = vmatprep.mubr.bf16.mxu1 %v6136_v39  ;;  %v1174_v41 = vadd.f32 %v1173_v23, %v6063_v35  ;;  %v4523_v28 = vcombine.low %v1411_v57, %v1415_v10  ;;  %v1426_v35 = vld [vmem:[#allocation2 + $0xd0] sm:$0xff]  ;;  %v4529_v46 = vcombine.low %v1418_v14, %v1422_v6  ;;  %v1435_v38 = vld [vmem:[#allocation2 + $0x118] sm:$0xff] }
 0x1d3   : > { %v1302_v58 = vmax.f32 %v1172_v36, 0.0  ;;  %v4531_v60 = vcombine.low %v1419_v9, %v1423_v7  ;;  %v1434_v10 = vld [vmem:[#allocation2 + $0x110] sm:$0xff] }
 0x1d4   : > { %3122 = vmatpush1.bf16.msra.mxu0 %v4757_v12  ;;  %3348 = vmatpush1.bf16.msra.mxu1 %v4759_v3  ;;  %v1303_v30 = vmax.f32 %v1174_v41, 0.0  ;;  %v4532_v12 = vcombine.high %v1419_v9, %v1423_v7  ;;  %v4546_v6 = vcombine.high %v1434_v10, %v1438_v26  ;;  %v1442_v36 = vld [vmem:[#allocation2 + $0x150] sm:$0xff]  ;;  %v4545_v14 = vcombine.low %v1434_v10, %v1438_v26 }
 0x1d5   : > { %3430 = vmatprep.subr.bf16.mxu0 %v4514_v21  ;;  %3656 = vmatprep.subr.bf16.mxu1 %v4516_v59  ;;  %v6414_v33 = vpack.c.bf16 %v1302_v58, %v1294_v20  ;;  %v1430_v21 = vld [vmem:[#allocation2 + $0xf0] sm:$0xff]  ;;  %v1427_v59 = vld [vmem:[#allocation2 + $0xd8] sm:$0xff] }
 0x1d6   : > { %v6416_v3 = vpack.c.bf16 %v1303_v30, %v1295_v15  ;;  %v4538_v58 = vcombine.high %v1426_v35, %v1430_v21  ;;  %v4540_v57 = vcombine.high %v1427_v59, %v1431_v42  ;;  %v4539_v20 = vcombine.low %v1427_v59, %v1431_v42  ;;  %v1446_v23 = vld [vmem:[#allocation2 + $0x170] sm:$0xff] }
 0x1d7   : > { %3124 = vmatmul.mubr.bf16.vlgmr.msra.gmra.mrb[64].mxu0 %v6128_v32  ;;  %3350 = vmatmul.mubr.bf16.vlgmr.msra.gmra.mrb[64].mxu1 %v6128_v32  ;;  %v4554_v41 = vcombine.high %v1442_v36, %v1446_v23  ;;  %v1450_v30 = vld [vmem:[#allocation2 + $0x190] sm:$0xff] }
 0x1d8   : > { %3431 = vmatpush1.bf16.msra.mxu0 %v4513_v62  ;;  %3657 = vmatpush1.bf16.msra.mxu1 %v4515_v17  ;;  %v1439_v62 = vld [vmem:[#allocation2 + $0x138] sm:$0xff]  ;;  %v4537_v17 = vcombine.low %v1426_v35, %v1430_v21  ;;  %v1458_v42 = vld [vmem:[#allocation2 + $0x1d0] sm:$0xff] }
 0x1d9   : > { %3432 = vmatprep.subr.bf16.mxu0 %v4522_v11  ;;  %3658 = vmatprep.subr.bf16.mxu1 %v4524_v47  ;;  %v4548_v9 = vcombine.high %v1435_v38, %v1439_v62  ;;  %v1443_v11 = vld [vmem:[#allocation2 + $0x158] sm:$0xff]  ;;  %v4547_v15 = vcombine.low %v1435_v38, %v1439_v62  ;;  %v1466_v62 = vld [vmem:[#allocation2 + $0x210] sm:$0xff] }
 0x1da   : > { %3133 = vmatprep.mubr.bf16.mxu0 %v6188_v37  ;;  %3359 = vmatprep.mubr.bf16.mxu1 %v6188_v37  ;;  %v1447_v47 = vld [vmem:[#allocation2 + $0x178] sm:$0xff] }
 0x1db   : > { %v4556_v7 = vcombine.high %v1443_v11, %v1447_v47  ;;  %v4555_v35 = vcombine.low %v1443_v11, %v1447_v47  ;;  %v1474_v47 = vld [vmem:[#allocation2 + $0x250] sm:$0xff] }
 0x1dc   : > { %3433 = vmatpush1.bf16.msra.mxu0 %v4521_v18  ;;  %3659 = vmatpush1.bf16.msra.mxu1 %v4523_v28  ;;  %v1454_v18 = vld [vmem:[#allocation2 + $0x1b0] sm:$0xff]  ;;  %v1451_v28 = vld [vmem:[#allocation2 + $0x198] sm:$0xff] }
 0x1dd   : > { %3434 = vmatprep.subr.bf16.mxu0 %v4530_v40  ;;  %3660 = vmatprep.subr.bf16.mxu1 %v4532_v12  ;;  %v1455_v40 = vld [vmem:[#allocation2 + $0x1b8] sm:$0xff]  ;;  %v4553_v12 = vcombine.low %v1442_v36, %v1446_v23  ;;  %v4562_v21 = vcombine.high %v1450_v30, %v1454_v18 }
 0x1de   : > { %v4564_v59 = vcombine.high %v1451_v28, %v1455_v40  ;;  %v4563_v10 = vcombine.low %v1451_v28, %v1455_v40  ;;  %v1482_v40 = vld [vmem:[#allocation2 + $0x290] sm:$0xff] }
 0x1df   : > { %3134 = vmatmul.mubr.bf16.gmra.mrb[68].mxu0 %v6180_v29  ;;  %3360 = vmatmul.mubr.bf16.gmra.mrb[68].mxu1 %v6180_v29 }
 0x1e0   : > { %3435 = vmatpush1.bf16.msra.mxu0 %v4529_v46  ;;  %3661 = vmatpush1.bf16.msra.mxu1 %v4531_v60  ;;  %v1462_v46 = vld [vmem:[#allocation2 + $0x1f0] sm:$0xff]  ;;  %v1459_v60 = vld [vmem:[#allocation2 + $0x1d8] sm:$0xff] }
 0x1e1   : > { %3436 = vmatprep.subr.bf16.mxu0 %v4538_v58  ;;  %3662 = vmatprep.subr.bf16.mxu1 %v4540_v57  ;;  %v1463_v58 = vld [vmem:[#allocation2 + $0x1f8] sm:$0xff]  ;;  %v4561_v57 = vcombine.low %v1450_v30, %v1454_v18  ;;  %v4570_v26 = vcombine.high %v1458_v42, %v1462_v46 }
 0x1e2   : > { %3143 = vmatprep.mubr.bf16.mxu0 %v6240_v43  ;;  %3369 = vmatprep.mubr.bf16.mxu1 %v6240_v43  ;;  %v4572_v38 = vcombine.high %v1459_v60, %v1463_v58  ;;  %v4571_v36 = vcombine.low %v1459_v60, %v1463_v58  ;;  %v1490_v58 = vld [vmem:[#allocation2 + $0x2d0] sm:$0xff] }
 0x1e4   : > { %3437 = vmatpush1.bf16.msra.mxu0 %v4537_v17  ;;  %3663 = vmatpush1.bf16.msra.mxu1 %v4539_v20  ;;  %v1470_v17 = vld [vmem:[#allocation2 + $0x230] sm:$0xff]  ;;  %v1467_v20 = vld [vmem:[#allocation2 + $0x218] sm:$0xff] }
 0x1e5   : > { %3438 = vmatprep.subr.bf16.mxu0 %v4546_v6  ;;  %3664 = vmatprep.subr.bf16.mxu1 %v4548_v9  ;;  %v1471_v6 = vld [vmem:[#allocation2 + $0x238] sm:$0xff]  ;;  %v4569_v9 = vcombine.low %v1458_v42, %v1462_v46  ;;  %v4578_v23 = vcombine.high %v1466_v62, %v1470_v17 }
 0x1e6   : > { %v4580_v11 = vcombine.high %v1467_v20, %v1471_v6  ;;  %v4579_v30 = vcombine.low %v1467_v20, %v1471_v6  ;;  %v1498_v6 = vld [vmem:[#allocation2 + $0x310] sm:$0xff] }
 0x1e7   : > { %3144 = vmatmul.mubr.bf16.gmra.mrb[72].mxu0 %v6232_v31  ;;  %3370 = vmatmul.mubr.bf16.gmra.mrb[72].mxu1 %v6232_v31 }
 0x1e8   : > { %3439 = vmatpush1.bf16.msra.mxu0 %v4545_v14  ;;  %3665 = vmatpush1.bf16.msra.mxu1 %v4547_v15  ;;  %v1478_v14 = vld [vmem:[#allocation2 + $0x270] sm:$0xff]  ;;  %v1475_v15 = vld [vmem:[#allocation2 + $0x258] sm:$0xff] }
 0x1e9   : > { %3440 = vmatprep.subr.bf16.mxu0 %v4554_v41  ;;  %3666 = vmatprep.subr.bf16.mxu1 %v4556_v7  ;;  %v1479_v41 = vld [vmem:[#allocation2 + $0x278] sm:$0xff]  ;;  %v4577_v7 = vcombine.low %v1466_v62, %v1470_v17  ;;  %v4586_v18 = vcombine.high %v1474_v47, %v1478_v14 }
 0x1ea   : > { %3153 = vmatprep.mubr.bf16.mxu0 %v6292_v44  ;;  %3379 = vmatprep.mubr.bf16.mxu1 %v6292_v44  ;;  %v4588_v28 = vcombine.high %v1475_v15, %v1479_v41  ;;  %v4587_v42 = vcombine.low %v1475_v15, %v1479_v41  ;;  %v1506_v41 = vld [vmem:[#allocation2 + $0x350] sm:$0xff] }
 0x1ec   : > { %3441 = vmatpush1.bf16.msra.mxu0 %v4553_v12  ;;  %3667 = vmatpush1.bf16.msra.mxu1 %v4555_v35  ;;  %v1486_v12 = vld [vmem:[#allocation2 + $0x2b0] sm:$0xff]  ;;  %v1483_v35 = vld [vmem:[#allocation2 + $0x298] sm:$0xff] }
 0x1ed   : > { %3442 = vmatprep.subr.bf16.mxu0 %v4562_v21  ;;  %3668 = vmatprep.subr.bf16.mxu1 %v4564_v59  ;;  %v1487_v21 = vld [vmem:[#allocation2 + $0x2b8] sm:$0xff]  ;;  %v4585_v59 = vcombine.low %v1474_v47, %v1478_v14  ;;  %v4594_v46 = vcombine.high %v1482_v40, %v1486_v12 }
 0x1ee   : > { %v4596_v60 = vcombine.high %v1483_v35, %v1487_v21  ;;  %v4595_v62 = vcombine.low %v1483_v35, %v1487_v21  ;;  %v1514_v21 = vld [vmem:[#allocation2 + $0x390] sm:$0xff] }
 0x1ef   : > { %3154 = vmatmul.mubr.bf16.gmra.mrb[76].mxu0 %v6284_v48  ;;  %3380 = vmatmul.mubr.bf16.gmra.mrb[76].mxu1 %v6284_v48 }
 0x1f0   : > { %3443 = vmatpush1.bf16.msra.mxu0 %v4561_v57  ;;  %3669 = vmatpush1.bf16.msra.mxu1 %v4563_v10  ;;  %v1494_v57 = vld [vmem:[#allocation2 + $0x2f0] sm:$0xff]  ;;  %v1491_v10 = vld [vmem:[#allocation2 + $0x2d8] sm:$0xff] }
 0x1f1   : > { %3444 = vmatprep.subr.bf16.mxu0 %v4570_v26  ;;  %3670 = vmatprep.subr.bf16.mxu1 %v4572_v38  ;;  %v1495_v26 = vld [vmem:[#allocation2 + $0x2f8] sm:$0xff]  ;;  %v4593_v38 = vcombine.low %v1482_v40, %v1486_v12  ;;  %v4602_v17 = vcombine.high %v1490_v58, %v1494_v57 }
 0x1f2   : > { %3163 = vmatprep.mubr.bf16.mxu0 %v6344_v2  ;;  %3389 = vmatprep.mubr.bf16.mxu1 %v6344_v2  ;;  %v4604_v20 = vcombine.high %v1491_v10, %v1495_v26  ;;  %v4603_v47 = vcombine.low %v1491_v10, %v1495_v26  ;;  %v1522_v26 = vld [vmem:[#allocation2 + $0x3d0] sm:$0xff] }
 0x1f4   : > { %3445 = vmatpush1.bf16.msra.mxu0 %v4569_v9  ;;  %3671 = vmatpush1.bf16.msra.mxu1 %v4571_v36  ;;  %v1502_v9 = vld [vmem:[#allocation2 + $0x330] sm:$0xff]  ;;  %v1499_v36 = vld [vmem:[#allocation2 + $0x318] sm:$0xff] }
 0x1f5   : > { %3446 = vmatprep.subr.bf16.mxu0 %v4578_v23  ;;  %3672 = vmatprep.subr.bf16.mxu1 %v4580_v11  ;;  %v1503_v23 = vld [vmem:[#allocation2 + $0x338] sm:$0xff]  ;;  %v4601_v11 = vcombine.low %v1490_v58, %v1494_v57  ;;  %v4610_v14 = vcombine.high %v1498_v6, %v1502_v9 }
 0x1f6   : > { %v4612_v15 = vcombine.high %v1499_v36, %v1503_v23  ;;  %v4611_v40 = vcombine.low %v1499_v36, %v1503_v23  ;;  %v1530_v23 = vld [vmem:[#allocation2 + $0x410] sm:$0xff] }
 0x1f7   : > { %3164 = vmatmul.mubr.bf16.gmra.mrb[80].mxu0 %v6336_v19  ;;  %3390 = vmatmul.mubr.bf16.gmra.mrb[80].mxu1 %v6336_v19 }
 0x1f8   : > { %3447 = vmatpush1.bf16.msra.mxu0 %v4577_v7  ;;  %3673 = vmatpush1.bf16.msra.mxu1 %v4579_v30  ;;  %v1510_v7 = vld [vmem:[#allocation2 + $0x370] sm:$0xff]  ;;  %v1507_v30 = vld [vmem:[#allocation2 + $0x358] sm:$0xff] }
 0x1f9   : > { %3448 = vmatprep.subr.bf16.mxu0 %v4586_v18  ;;  %3674 = vmatprep.subr.bf16.mxu1 %v4588_v28  ;;  %v1511_v18 = vld [vmem:[#allocation2 + $0x378] sm:$0xff]  ;;  %v4609_v28 = vcombine.low %v1498_v6, %v1502_v9  ;;  %v4618_v12 = vcombine.high %v1506_v41, %v1510_v7 }
 0x1fa   : > { %3173 = vmatprep.mubr.bf16.mxu0 %v6386_v50  ;;  %3399 = vmatprep.mubr.bf16.mxu1 %v6386_v50  ;;  %v4620_v35 = vcombine.high %v1507_v30, %v1511_v18  ;;  %v4619_v58 = vcombine.low %v1507_v30, %v1511_v18  ;;  %v1538_v18 = vld [vmem:[#allocation2 + $0x450] sm:$0xff] }
 0x1fc   : > { %3449 = vmatpush1.bf16.msra.mxu0 %v4585_v59  ;;  %3675 = vmatpush1.bf16.msra.mxu1 %v4587_v42  ;;  %v1518_v59 = vld [vmem:[#allocation2 + $0x3b0] sm:$0xff]  ;;  %v1515_v42 = vld [vmem:[#allocation2 + $0x398] sm:$0xff] }
 0x1fd   : > { %3450 = vmatprep.subr.bf16.mxu0 %v4594_v46  ;;  %3676 = vmatprep.subr.bf16.mxu1 %v4596_v60  ;;  %v1519_v46 = vld [vmem:[#allocation2 + $0x3b8] sm:$0xff]  ;;  %v4617_v60 = vcombine.low %v1506_v41, %v1510_v7  ;;  %v4626_v57 = vcombine.high %v1514_v21, %v1518_v59 }
 0x1fe   : > { %v4628_v10 = vcombine.high %v1515_v42, %v1519_v46  ;;  %v4627_v6 = vcombine.low %v1515_v42, %v1519_v46  ;;  %v1550_v46 = vld [vmem:[#allocation2 + $0x4b0] sm:$0xff] }
 0x1ff   : > { %3174 = vmatmul.mubr.bf16.gmra.mrb[84].mxu0 %v6384_v24  ;;  %3400 = vmatmul.mubr.bf16.gmra.mrb[84].mxu1 %v6384_v24 }
 0x200   : > { %3451 = vmatpush1.bf16.msra.mxu0 %v4593_v38  ;;  %3677 = vmatpush1.bf16.msra.mxu1 %v4595_v62  ;;  %v1526_v38 = vld [vmem:[#allocation2 + $0x3f0] sm:$0xff]  ;;  %v1523_v62 = vld [vmem:[#allocation2 + $0x3d8] sm:$0xff] }
 0x201   : > { %3452 = vmatprep.subr.bf16.mxu0 %v4602_v17  ;;  %3678 = vmatprep.subr.bf16.mxu1 %v4604_v20  ;;  %v1527_v17 = vld [vmem:[#allocation2 + $0x3f8] sm:$0xff]  ;;  %v4625_v20 = vcombine.low %v1514_v21, %v1518_v59  ;;  %v4634_v9 = vcombine.high %v1522_v26, %v1526_v38 }
 0x202   : > { %3183 = vmatprep.mubr.bf16.mxu0 %v6404_v25  ;;  %3409 = vmatprep.mubr.bf16.mxu1 %v6404_v25  ;;  %v4636_v36 = vcombine.high %v1523_v62, %v1527_v17  ;;  %v4635_v41 = vcombine.low %v1523_v62, %v1527_v17  ;;  %v1554_v62 = vld [vmem:[#allocation2 + $0x4d0] sm:$0xff] }
 0x203   : > { %v1558_v17 = vld [vmem:[#allocation2 + $0x4f0] sm:$0xff] }
 0x204   : > { %3453 = vmatpush1.bf16.msra.mxu0 %v4601_v11  ;;  %3679 = vmatpush1.bf16.msra.mxu1 %v4603_v47  ;;  %v1534_v11 = vld [vmem:[#allocation2 + $0x430] sm:$0xff]  ;;  %v1531_v47 = vld [vmem:[#allocation2 + $0x418] sm:$0xff] }
 0x205   : > { %3454 = vmatprep.subr.bf16.mxu0 %v4610_v14  ;;  %3680 = vmatprep.subr.bf16.mxu1 %v4612_v15  ;;  %v1535_v14 = vld [vmem:[#allocation2 + $0x438] sm:$0xff]  ;;  %v4633_v15 = vcombine.low %v1522_v26, %v1526_v38  ;;  %v4642_v7 = vcombine.high %v1530_v23, %v1534_v11 }
 0x206   : > { %v4644_v30 = vcombine.high %v1531_v47, %v1535_v14  ;;  %v4643_v21 = vcombine.low %v1531_v47, %v1535_v14  ;;  %v1563_v47 = vld [vmem:[#allocation2 + $0x518] sm:$0xff] }
 0x207   : > { %3184 = vmatmul.mubr.bf16.gmra.mrb[88].mxu0 %v6402_v0  ;;  %3410 = vmatmul.mubr.bf16.gmra.mrb[88].mxu1 %v6402_v0  ;;  %v1567_v14 = vld [vmem:[#allocation2 + $0x538] sm:$0xff] }
 0x208   : > { %3455 = vmatpush1.bf16.msra.mxu0 %v4609_v28  ;;  %3681 = vmatpush1.bf16.msra.mxu1 %v4611_v40  ;;  %v1542_v28 = vld [vmem:[#allocation2 + $0x470] sm:$0xff]  ;;  %v1539_v40 = vld [vmem:[#allocation2 + $0x458] sm:$0xff] }
 0x209   : > { %3456 = vmatprep.subr.bf16.mxu0 %v4618_v12  ;;  %3682 = vmatprep.subr.bf16.mxu1 %v4620_v35  ;;  %v1543_v12 = vld [vmem:[#allocation2 + $0x478] sm:$0xff]  ;;  %v4641_v35 = vcombine.low %v1530_v23, %v1534_v11  ;;  %v4650_v59 = vcombine.high %v1538_v18, %v1542_v28  ;;  %v1562_v23 = vld [vmem:[#allocation2 + $0x510] sm:$0xff] }
 0x20a   : > { %3193 = vmatprep.mubr.bf16.mxu0 %v6416_v3  ;;  %3419 = vmatprep.mubr.bf16.mxu1 %v6416_v3  ;;  %v4652_v42 = vcombine.high %v1539_v40, %v1543_v12  ;;  %v1566_v11 = vld [vmem:[#allocation2 + $0x530] sm:$0xff] }
 0x20c   : > { %3457 = vmatpush1.bf16.msra.mxu0 %v4617_v60  ;;  %3683 = vmatpush1.bf16.msra.mxu1 %v4619_v58  ;;  %v1547_v60 = vld [vmem:[#allocation2 + $0x498] sm:$0xff] }
 0x20d   : > { %3458 = vmatprep.subr.bf16.mxu0 %v4626_v57  ;;  %3684 = vmatprep.subr.bf16.mxu1 %v4628_v10  ;;  %v1551_v58 = vld [vmem:[#allocation2 + $0x4b8] sm:$0xff]  ;;  %v4649_v57 = vcombine.low %v1538_v18, %v1542_v28  ;;  %v4651_v10 = vcombine.low %v1539_v40, %v1543_v12  ;;  %v1570_v18 = vld [vmem:[#allocation2 + $0x550] sm:$0xff] }
 0x20e   : > { %v4660_v38 = vcombine.high %v1547_v60, %v1551_v58  ;;  %v1574_v28 = vld [vmem:[#allocation2 + $0x570] sm:$0xff]  ;;  %v1571_v40 = vld [vmem:[#allocation2 + $0x558] sm:$0xff] }
 0x20f   : > { %3194 = vmatmul.mubr.bf16.gmra.mrb[92].mxu0 %v6414_v33  ;;  %3420 = vmatmul.mubr.bf16.gmra.mrb[92].mxu1 %v6414_v33  ;;  %v1575_v12 = vld [vmem:[#allocation2 + $0x578] sm:$0xff] }
 0x210   : > { %3459 = vmatpush1.bf16.msra.mxu0 %v4625_v20  ;;  %3462 = vmatprep.mubr.bf16.mxu0 %v6030_v13  ;;  %v1555_v20 = vld [vmem:[#allocation2 + $0x4d8] sm:$0xff] }
 0x211   : > { %3685 = vmatpush1.bf16.msra.mxu1 %v4627_v6  ;;  %3688 = vmatprep.mubr.bf16.mxu1 %v6030_v13  ;;  %v1546_v13 = vld [vmem:[#allocation2 + $0x490] sm:$0xff]  ;;  %v1559_v6 = vld [vmem:[#allocation2 + $0x4f8] sm:$0xff] }
 0x212   : > { %3460 = vmatprep.subr.bf16.mxu0 %v4634_v9  ;;  %3686 = vmatprep.subr.bf16.mxu1 %v4636_v36  ;;  %v4658_v26 = vcombine.high %v1546_v13, %v1550_v46  ;;  %v4659_v9 = vcombine.low %v1547_v60, %v1551_v58  ;;  %v4666_v36 = vcombine.high %v1554_v62, %v1558_v17 }
 0x213   : > { %v4681_v60 = vcombine.low %v1570_v18, %v1574_v28  ;;  %v4683_v58 = vcombine.low %v1571_v40, %v1575_v12 }
 0x214   : > { %3461 = vmatpush1.bf16.msra.mxu0 %v4633_v15  ;;  %v4665_v15 = vcombine.low %v1554_v62, %v1558_v17  ;;  %v1587_v62 = vld [vmem:[#allocation2 + $0x5d8] sm:$0xff] }
 0x215   : > { %3687 = vmatpush1.bf16.msra.mxu1 %v4635_v41  ;;  %3543 = vmatprep.subr.bf16.mxu0 %v4642_v7  ;;  %v4667_v41 = vcombine.low %v1555_v20, %v1559_v6  ;;  %v4674_v7 = vcombine.high %v1562_v23, %v1566_v11  ;;  %v1591_v17 = vld [vmem:[#allocation2 + $0x5f8] sm:$0xff] }
 0x216   : > { %3769 = vmatprep.subr.bf16.mxu1 %v4644_v30  ;;  %v4676_v30 = vcombine.high %v1563_v47, %v1567_v14 }
 0x217   : > { %3463 = vmatmul.mubr.bf16.vlgmr.msra.gmra.mrb[96].mxu0 %v6026_v5 }
 0x218   : > { %3689 = vmatmul.mubr.bf16.vlgmr.msra.gmra.mrb[96].mxu1 %v6026_v5  ;;  %3472 = vmatprep.mubr.bf16.mxu0 %v6098_v63  ;;  %v4657_v5 = vcombine.low %v1546_v13, %v1550_v46  ;;  %v1579_v13 = vld [vmem:[#allocation2 + $0x598] sm:$0xff] }
 0x219   : > { %3544 = vmatpush1.bf16.msra.mxu0 %v4641_v35  ;;  %3698 = vmatprep.mubr.bf16.mxu1 %v6098_v63  ;;  %v4668_v63 = vcombine.high %v1555_v20, %v1559_v6  ;;  %v4675_v35 = vcombine.low %v1563_v47, %v1567_v14  ;;  %v1583_v46 = vld [vmem:[#allocation2 + $0x5b8] sm:$0xff] }
 0x21a   : > { %3770 = vmatpush1.bf16.msra.mxu1 %v4643_v21  ;;  %3545 = vmatprep.subr.bf16.mxu0 %v4650_v59  ;;  %v4682_v21 = vcombine.high %v1570_v18, %v1574_v28  ;;  %v1578_v59 = vld [vmem:[#allocation2 + $0x590] sm:$0xff]  ;;  %v4691_v20 = vcombine.low %v1579_v13, %v1583_v46 }
 0x21b   : > { %3771 = vmatprep.subr.bf16.mxu1 %v4652_v42  ;;  %v1582_v42 = vld [vmem:[#allocation2 + $0x5b0] sm:$0xff] }
 0x21d   : > { %3546 = vmatpush1.bf16.msra.mxu0 %v4649_v57  ;;  %v4690_v57 = vcombine.high %v1578_v59, %v1582_v42 }
 0x21e   : > { %3772 = vmatpush1.bf16.msra.mxu1 %v4651_v10  ;;  %3547 = vmatprep.subr.bf16.mxu0 %v4658_v26  ;;  %v4692_v10 = vcombine.high %v1579_v13, %v1583_v46  ;;  %v1586_v26 = vld [vmem:[#allocation2 + $0x5d0] sm:$0xff] }
 0x21f   : > { %3473 = vmatmul.mubr.bf16.gmra.mrb[100].mxu0 %v6091_v53  ;;  %3773 = vmatprep.subr.bf16.mxu1 %v4660_v38  ;;  %v1590_v38 = vld [vmem:[#allocation2 + $0x5f0] sm:$0xff] }
 0x220   : > { %3699 = vmatmul.mubr.bf16.gmra.mrb[100].mxu1 %v6091_v53  ;;  %3482 = vmatprep.mubr.bf16.mxu0 %v6150_v54  ;;  %v4673_v53 = vcombine.low %v1562_v23, %v1566_v11  ;;  %v4698_v6 = vcombine.high %v1586_v26, %v1590_v38  ;;  %v4697_v23 = vcombine.low %v1586_v26, %v1590_v38  ;;  %v1618_v13 = vld [vmem:[#allocation2 + $0x6d0] sm:$0xff] }
 0x221   : > { %3548 = vmatpush1.bf16.msra.mxu0 %v4657_v5  ;;  %3708 = vmatprep.mubr.bf16.mxu1 %v6150_v54  ;;  %v4684_v54 = vcombine.high %v1571_v40, %v1575_v12  ;;  %v1594_v5 = vld [vmem:[#allocation2 + $0x610] sm:$0xff]  ;;  %v4699_v11 = vcombine.low %v1587_v62, %v1591_v17 }
 0x222   : > { %3774 = vmatpush1.bf16.msra.mxu1 %v4659_v9  ;;  %3549 = vmatprep.subr.bf16.mxu0 %v4666_v36  ;;  %v1598_v9 = vld [vmem:[#allocation2 + $0x630] sm:$0xff]  ;;  %v1595_v36 = vld [vmem:[#allocation2 + $0x618] sm:$0xff] }
 0x223   : > { %3775 = vmatprep.subr.bf16.mxu1 %v4668_v63  ;;  %v1599_v63 = vld [vmem:[#allocation2 + $0x638] sm:$0xff]  ;;  %v4706_v47 = vcombine.high %v1594_v5, %v1598_v9  ;;  %v1610_v40 = vld [vmem:[#allocation2 + $0x690] sm:$0xff] }
 0x224   : > { %v4708_v14 = vcombine.high %v1595_v36, %v1599_v63  ;;  %v4707_v18 = vcombine.low %v1595_v36, %v1599_v63  ;;  %v1614_v12 = vld [vmem:[#allocation2 + $0x6b0] sm:$0xff]  ;;  %v1635_v36 = vld [vmem:[#allocation2 + $0x758] sm:$0xff] }
 0x225   : > { %3550 = vmatpush1.bf16.msra.mxu0 %v4665_v15  ;;  %v1602_v15 = vld [vmem:[#allocation2 + $0x650] sm:$0xff]  ;;  %v1639_v63 = vld [vmem:[#allocation2 + $0x778] sm:$0xff] }
 0x226   : > { %3776 = vmatpush1.bf16.msra.mxu1 %v4667_v41  ;;  %3551 = vmatprep.subr.bf16.mxu0 %v4674_v7  ;;  %v1606_v41 = vld [vmem:[#allocation2 + $0x670] sm:$0xff]  ;;  %v1603_v7 = vld [vmem:[#allocation2 + $0x658] sm:$0xff] }
 0x227   : > { %3483 = vmatmul.mubr.bf16.gmra.mrb[104].mxu0 %v6143_v52  ;;  %3777 = vmatprep.subr.bf16.mxu1 %v4676_v30  ;;  %v1607_v30 = vld [vmem:[#allocation2 + $0x678] sm:$0xff]  ;;  %v4714_v28 = vcombine.high %v1602_v15, %v1606_v41  ;;  %v1622_v46 = vld [vmem:[#allocation2 + $0x6f0] sm:$0xff] }
 0x228   : > { %3709 = vmatmul.mubr.bf16.gmra.mrb[104].mxu1 %v6143_v52  ;;  %3492 = vmatprep.mubr.bf16.mxu0 %v6202_v61  ;;  %v4689_v52 = vcombine.low %v1578_v59, %v1582_v42  ;;  %v4722_v59 = vcombine.high %v1610_v40, %v1614_v12  ;;  %v1626_v26 = vld [vmem:[#allocation2 + $0x710] sm:$0xff] }
 0x229   : > { %3552 = vmatpush1.bf16.msra.mxu0 %v4673_v53  ;;  %3718 = vmatprep.mubr.bf16.mxu1 %v6202_v61  ;;  %v4700_v61 = vcombine.high %v1587_v62, %v1591_v17  ;;  %v1611_v53 = vld [vmem:[#allocation2 + $0x698] sm:$0xff]  ;;  %v1630_v38 = vld [vmem:[#allocation2 + $0x730] sm:$0xff] }
 0x22a   : > { %3778 = vmatpush1.bf16.msra.mxu1 %v4675_v35  ;;  %3553 = vmatprep.subr.bf16.mxu0 %v4682_v21  ;;  %v1615_v35 = vld [vmem:[#allocation2 + $0x6b8] sm:$0xff]  ;;  %v4713_v21 = vcombine.low %v1602_v15, %v1606_v41 }
 0x22b   : > { %3779 = vmatprep.subr.bf16.mxu1 %v4684_v54  ;;  %v4715_v54 = vcombine.low %v1603_v7, %v1607_v30  ;;  %v4724_v42 = vcombine.high %v1611_v53, %v1615_v35  ;;  %v1627_v62 = vld [vmem:[#allocation2 + $0x718] sm:$0xff] }
 0x22c   : > { %v1631_v17 = vld [vmem:[#allocation2 + $0x738] sm:$0xff] }
 0x22d   : > { %3554 = vmatpush1.bf16.msra.mxu0 %v4681_v60  ;;  %v1619_v60 = vld [vmem:[#allocation2 + $0x6d8] sm:$0xff] }
 0x22e   : > { %3780 = vmatpush1.bf16.msra.mxu1 %v4683_v58  ;;  %3555 = vmatprep.subr.bf16.mxu0 %v4690_v57  ;;  %v1623_v58 = vld [vmem:[#allocation2 + $0x6f8] sm:$0xff]  ;;  %v4723_v57 = vcombine.low %v1611_v53, %v1615_v35 }
 0x22f   : > { %3493 = vmatmul.mubr.bf16.gmra.mrb[108].mxu0 %v6195_v51  ;;  %3781 = vmatprep.subr.bf16.mxu1 %v4692_v10  ;;  %v4730_v10 = vcombine.high %v1618_v13, %v1622_v46  ;;  %v1643_v15 = vld [vmem:[#allocation2 + $0x798] sm:$0xff] }
 0x230   : > { %3719 = vmatmul.mubr.bf16.gmra.mrb[108].mxu1 %v6195_v51  ;;  %3502 = vmatprep.mubr.bf16.mxu0 %v6254_v1  ;;  %v4705_v51 = vcombine.low %v1594_v5, %v1598_v9  ;;  %v1634_v5 = vld [vmem:[#allocation2 + $0x750] sm:$0xff]  ;;  %v1647_v41 = vld [vmem:[#allocation2 + $0x7b8] sm:$0xff] }
 0x231   : > { %3556 = vmatpush1.bf16.msra.mxu0 %v4689_v52  ;;  %3728 = vmatprep.mubr.bf16.mxu1 %v6254_v1  ;;  %v4716_v1 = vcombine.high %v1603_v7, %v1607_v30  ;;  %v4729_v52 = vcombine.low %v1618_v13, %v1622_v46  ;;  %v1638_v9 = vld [vmem:[#allocation2 + $0x770] sm:$0xff]  ;;  %v4747_v30 = vcombine.low %v1635_v36, %v1639_v63 }
 0x232   : > { %3782 = vmatpush1.bf16.msra.mxu1 %v4691_v20  ;;  %3557 = vmatprep.subr.bf16.mxu0 %v4698_v6  ;;  %v4731_v20 = vcombine.low %v1619_v60, %v1623_v58  ;;  %v4738_v6 = vcombine.high %v1626_v26, %v1630_v38  ;;  %v4745_v7 = vcombine.low %v1634_v5, %v1638_v9 }
 0x233   : > { %3783 = vmatprep.subr.bf16.mxu1 %v4700_v61  ;;  %v4740_v61 = vcombine.high %v1627_v62, %v1631_v17  ;;  %v4755_v53 = vcombine.low %v1643_v15, %v1647_v41 }
 0x235   : > { %3558 = vmatpush1.bf16.msra.mxu0 %v4697_v23  ;;  %v4739_v23 = vcombine.low %v1627_v62, %v1631_v17 }
 0x236   : > { %3784 = vmatpush1.bf16.msra.mxu1 %v4699_v11  ;;  %3559 = vmatprep.subr.bf16.mxu0 %v4706_v47  ;;  %v4746_v11 = vcombine.high %v1634_v5, %v1638_v9  ;;  %v1642_v47 = vld [vmem:[#allocation2 + $0x790] sm:$0xff] }
 0x237   : > { %3503 = vmatmul.mubr.bf16.gmra.mrb[112].mxu0 %v6247_v49  ;;  %3785 = vmatprep.subr.bf16.mxu1 %v4708_v14  ;;  %v1646_v14 = vld [vmem:[#allocation2 + $0x7b0] sm:$0xff] }
 0x238   : > { %3729 = vmatmul.mubr.bf16.gmra.mrb[112].mxu1 %v6247_v49  ;;  %3512 = vmatprep.mubr.bf16.mxu0 %v6306_v22  ;;  %v4721_v49 = vcombine.low %v1610_v40, %v1614_v12  ;;  %v1651_v40 = vld [vmem:[#allocation2 + $0x7d8] sm:$0xff] }
 0x239   : > { %3560 = vmatpush1.bf16.msra.mxu0 %v4705_v51  ;;  %3738 = vmatprep.mubr.bf16.mxu1 %v6306_v22  ;;  %v4732_v22 = vcombine.high %v1619_v60, %v1623_v58  ;;  %v4754_v51 = vcombine.high %v1642_v47, %v1646_v14  ;;  %v1655_v12 = vld [vmem:[#allocation2 + $0x7f8] sm:$0xff] }
 0x23a   : > { %3786 = vmatpush1.bf16.msra.mxu1 %v4707_v18  ;;  %3561 = vmatprep.subr.bf16.mxu0 %v4714_v28  ;;  %v4756_v18 = vcombine.high %v1643_v15, %v1647_v41  ;;  %v1650_v28 = vld [vmem:[#allocation2 + $0x7d0] sm:$0xff] }
 0x23b   : > { %3787 = vmatprep.subr.bf16.mxu1 %v4716_v1  ;;  %v1654_v1 = vld [vmem:[#allocation2 + $0x7f0] sm:$0xff] }
 0x23c   : > { %v4762_v35 = vcombine.high %v1650_v28, %v1654_v1 }
 0x23d   : > { %3562 = vmatpush1.bf16.msra.mxu0 %v4713_v21  ;;  %v4761_v21 = vcombine.low %v1650_v28, %v1654_v1 }
 0x23e   : > { %3788 = vmatpush1.bf16.msra.mxu1 %v4715_v54  ;;  %3563 = vmatprep.subr.bf16.mxu0 %v4722_v59  ;;  %v4763_v54 = vcombine.low %v1651_v40, %v1655_v12 }
 0x23f   : > { %3513 = vmatmul.mubr.bf16.gmra.mrb[116].mxu0 %v6299_v16  ;;  %3789 = vmatprep.subr.bf16.mxu1 %v4724_v42 }
 0x240   : > { %3739 = vmatmul.mubr.bf16.gmra.mrb[116].mxu1 %v6299_v16  ;;  %3522 = vmatprep.mubr.bf16.mxu0 %v6358_v34  ;;  %v4737_v16 = vcombine.low %v1626_v26, %v1630_v38 }
 0x241   : > { %3564 = vmatpush1.bf16.msra.mxu0 %v4721_v49  ;;  %3748 = vmatprep.mubr.bf16.mxu1 %v6358_v34  ;;  %v4748_v34 = vcombine.high %v1635_v36, %v1639_v63 }
 0x242   : > { %3790 = vmatpush1.bf16.msra.mxu1 %v4723_v57  ;;  %3565 = vmatprep.subr.bf16.mxu0 %v4730_v10 }
 0x243   : > { %3791 = vmatprep.subr.bf16.mxu1 %v4732_v22 }
 0x245   : > { %3566 = vmatpush1.bf16.msra.mxu0 %v4729_v52 }
 0x246   : > { %3792 = vmatpush1.bf16.msra.mxu1 %v4731_v20  ;;  %3567 = vmatprep.subr.bf16.mxu0 %v4738_v6 }
 0x247   : > { %3523 = vmatmul.mubr.bf16.gmra.mrb[120].mxu0 %v6351_v27  ;;  %3793 = vmatprep.subr.bf16.mxu1 %v4740_v61 }
 0x248   : > { %3749 = vmatmul.mubr.bf16.gmra.mrb[120].mxu1 %v6351_v27  ;;  %3532 = vmatprep.mubr.bf16.mxu0 %v6394_v45  ;;  %v4753_v27 = vcombine.low %v1642_v47, %v1646_v14 }
 0x249   : > { %3568 = vmatpush1.bf16.msra.mxu0 %v4737_v16  ;;  %3758 = vmatprep.mubr.bf16.mxu1 %v6394_v45  ;;  %v4764_v45 = vcombine.high %v1651_v40, %v1655_v12 }
 0x24a   : > { %3794 = vmatpush1.bf16.msra.mxu1 %v4739_v23  ;;  %3569 = vmatprep.subr.bf16.mxu0 %v4746_v11 }
 0x24b   : > { %3795 = vmatprep.subr.bf16.mxu1 %v4748_v34 }
 0x24d   : > { %3570 = vmatpush1.bf16.msra.mxu0 %v4745_v7 }
 0x24e   : > { %3796 = vmatpush1.bf16.msra.mxu1 %v4747_v30  ;;  %3571 = vmatprep.subr.bf16.mxu0 %v4754_v51 }
 0x24f   : > { %3533 = vmatmul.mubr.bf16.gmra.mrb[124].mxu0 %v6389_v4  ;;  %3797 = vmatprep.subr.bf16.mxu1 %v4756_v18 }
 0x250   : > { %3759 = vmatmul.mubr.bf16.gmra.mrb[124].mxu1 %v6389_v4  ;;  %3575 = vmatprep.mubr.bf16.mxu0 %v6136_v39  ;;  %v6513_v4 = vld [vmem:[%s6815_s4] sm:$0xff] }
 0x251   : > { %3572 = vmatpush1.bf16.msra.mxu0 %v4753_v27  ;;  %3801 = vmatprep.mubr.bf16.mxu1 %v6136_v39  ;;  %v6523_v39 = vrot.slane %v6513_v4, %v389_v8 }
 0x252   : > { %3798 = vmatpush1.bf16.msra.mxu1 %v4755_v53  ;;  %3573 = vmatprep.subr.bf16.mxu0 %v4762_v35 }
 0x253   : > { %3799 = vmatprep.subr.bf16.mxu1 %v4764_v45 }
 0x255   : > { %3574 = vmatpush1.bf16.msra.mxu0 %v4761_v21 }
 0x256   : > { %3800 = vmatpush1.bf16.msra.mxu1 %v4763_v54 }
 0x258   : > { %3576 = vmatmul.mubr.bf16.vlgmr.msra.gmra.mrb[96].mxu0 %v6128_v32 }
 0x259   : > { %3802 = vmatmul.mubr.bf16.vlgmr.msra.gmra.mrb[96].mxu1 %v6128_v32  ;;  %3585 = vmatprep.mubr.bf16.mxu0 %v6188_v37  ;;  %v6518_v32 = vrot.slane %v6513_v4, %v381_v56 }
 0x25a   : > { %3811 = vmatprep.mubr.bf16.mxu1 %v6188_v37 }
 0x260   : > { %3586 = vmatmul.mubr.bf16.gmra.mrb[100].mxu0 %v6180_v29 }
 0x261   : > { %3812 = vmatmul.mubr.bf16.gmra.mrb[100].mxu1 %v6180_v29  ;;  %3595 = vmatprep.mubr.bf16.mxu0 %v6240_v43  ;;  %v6861_v29 = vsub.s32 1, %v5849_v55 }
 0x262   : > { %3821 = vmatprep.mubr.bf16.mxu1 %v6240_v43 }
 0x263   : > { %v6528_v37 = vrot.slane %v6513_v4, %v6861_v29 }
 0x268   : > { %3596 = vmatmul.mubr.bf16.gmra.mrb[104].mxu0 %v6232_v31 }
 0x269   : > { %3822 = vmatmul.mubr.bf16.gmra.mrb[104].mxu1 %v6232_v31  ;;  %3605 = vmatprep.mubr.bf16.mxu0 %v6292_v44  ;;  %v6862_v31 = vsub.s32 3, %v5849_v55 }
 0x26a   : > { %3831 = vmatprep.mubr.bf16.mxu1 %v6292_v44 }
 0x26b   : > { %v6533_v43 = vrot.slane %v6513_v4, %v6862_v31 }
 0x270   : > { %3606 = vmatmul.mubr.bf16.gmra.mrb[108].mxu0 %v6284_v48 }
 0x271   : > { %3832 = vmatmul.mubr.bf16.gmra.mrb[108].mxu1 %v6284_v48  ;;  %3615 = vmatprep.mubr.bf16.mxu0 %v6344_v2 }
 0x272   : > { %3841 = vmatprep.mubr.bf16.mxu1 %v6344_v2 }
 0x278   : > { %3616 = vmatmul.mubr.bf16.gmra.mrb[112].mxu0 %v6336_v19 }
 0x279   : > { %3842 = vmatmul.mubr.bf16.gmra.mrb[112].mxu1 %v6336_v19  ;;  %3625 = vmatprep.mubr.bf16.mxu0 %v6386_v50 }
 0x27a   : > { %3851 = vmatprep.mubr.bf16.mxu1 %v6386_v50 }
 0x280   : > { %3626 = vmatmul.mubr.bf16.gmra.mrb[116].mxu0 %v6384_v24 }
 0x281   : > { %3852 = vmatmul.mubr.bf16.gmra.mrb[116].mxu1 %v6384_v24  ;;  %3635 = vmatprep.mubr.bf16.mxu0 %v6404_v25 }
 0x282   : > { %3861 = vmatprep.mubr.bf16.mxu1 %v6404_v25 }
 0x288   : > { %3636 = vmatmul.mubr.bf16.gmra.mrb[120].mxu0 %v6402_v0 }
 0x289   : > { %3862 = vmatmul.mubr.bf16.gmra.mrb[120].mxu1 %v6402_v0  ;;  %3645 = vmatprep.mubr.bf16.mxu0 %v6416_v3 }
 0x28a   : > { %3871 = vmatprep.mubr.bf16.mxu1 %v6416_v3 }
 0x290   : > { %3646 = vmatmul.mubr.bf16.gmra.mrb[124].mxu0 %v6414_v33 }
 0x291   : > { %3872 = vmatmul.mubr.bf16.gmra.mrb[124].mxu1 %v6414_v33 }
 0x2aa   : > { %v3125_v48 = vpop.f32.mrb[64].mxu0  ;;  %v3351_v44 = vpop.f32.mrb[64].mxu1 }
 0x2ab   : > { %v4778_v56 = vadd.f32 %v3125_v48, %v6518_v32  ;;  %v4810_v19 = vadd.f32 %v3351_v44, %v6523_v39  ;;  %v3127_v2 = vpop.f32.mrb[65].mxu0  ;;  %v3353_v24 = vpop.f32.mrb[65].mxu1 }
 0x2ac   : > { %v4779_v8 = vadd.f32 %v3127_v2, %v6528_v37  ;;  %v4811_v50 = vadd.f32 %v3353_v24, %v6533_v43  ;;  %v3129_v0 = vpop.f32.mrb[66].mxu0  ;;  %v3355_v25 = vpop.f32.mrb[66].mxu1 }
 0x2ad   : > { %v4780_v33 = vadd.f32 %v3129_v0, %v6518_v32  ;;  %v4812_v3 = vadd.f32 %v3355_v25, %v6523_v39  ;;  %v3131_v59 = vpop.f32.mrb[67].mxu0  ;;  %v3357_v42 = vpop.f32.mrb[67].mxu1  ;;  %v3882_v60 = vmax.f32 %v4778_v56, 0.0  ;;  %v3884_v58 = vmax.f32 %v4810_v19, 0.0 }
 0x2ae   : > { %v4781_v13 = vadd.f32 %v3131_v59, %v6528_v37  ;;  %v4813_v46 = vadd.f32 %v3357_v42, %v6533_v43  ;;  %v3883_v10 = vmax.f32 %v4779_v8, 0.0  ;;  %v3885_v22 = vmax.f32 %v4811_v50, 0.0 }
 0x2af   : > { %v3890_v49 = vmax.f32 %v4780_v33, 0.0  ;;  %v3892_v57 = vmax.f32 %v4812_v3, 0.0 }
 0x2b0   : > { %v3891_v26 = vmax.f32 %v4781_v13, 0.0  ;;  %v3893_v38 = vmax.f32 %v4813_v46, 0.0 }
 0x2b1   : > { %v4011_v62 = vadd.f32 %v3890_v49, %v3882_v60  ;;  %v4053_v17 = vadd.f32 %v3892_v57, %v3884_v58 }
 0x2b2   : > { %v4032_v52 = vadd.f32 %v3891_v26, %v3883_v10  ;;  %v4074_v20 = vadd.f32 %v3893_v38, %v3885_v22  ;;  %v3135_v6 = vpop.f32.mrb[68].mxu0  ;;  %v3361_v61 = vpop.f32.mrb[68].mxu1 }
 0x2b3   : > { %v4782_v5 = vadd.f32 %v3135_v6, %v6518_v32  ;;  %v4814_v9 = vadd.f32 %v3361_v61, %v6523_v39  ;;  %v3137_v36 = vpop.f32.mrb[69].mxu0  ;;  %v3363_v63 = vpop.f32.mrb[69].mxu1 }
 0x2b4   : > { %v4783_v16 = vadd.f32 %v3137_v36, %v6528_v37  ;;  %v4815_v23 = vadd.f32 %v3363_v63, %v6533_v43  ;;  %v3139_v11 = vpop.f32.mrb[70].mxu0  ;;  %v3365_v34 = vpop.f32.mrb[70].mxu1 }
 0x2b5   : > { %v3898_v47 = vmax.f32 %v4782_v5, 0.0  ;;  %v3900_v14 = vmax.f32 %v4814_v9, 0.0  ;;  %v4784_v15 = vadd.f32 %v3139_v11, %v6518_v32  ;;  %v4816_v41 = vadd.f32 %v3365_v34, %v6523_v39  ;;  %v3141_v7 = vpop.f32.mrb[71].mxu0  ;;  %v3367_v30 = vpop.f32.mrb[71].mxu1 }
 0x2b6   : > { %v3899_v51 = vmax.f32 %v4783_v16, 0.0  ;;  %v3901_v18 = vmax.f32 %v4815_v23, 0.0  ;;  %v4785_v28 = vadd.f32 %v3141_v7, %v6528_v37  ;;  %v4817_v1 = vadd.f32 %v3367_v30, %v6533_v43 }
 0x2b7   : > { %v4012_v40 = vadd.f32 %v4011_v62, %v3898_v47  ;;  %v4054_v12 = vadd.f32 %v4053_v17, %v3900_v14  ;;  %v3906_v27 = vmax.f32 %v4784_v15, 0.0  ;;  %v3908_v53 = vmax.f32 %v4816_v41, 0.0 }
 0x2b8   : > { %v4033_v35 = vadd.f32 %v4032_v52, %v3899_v51  ;;  %v4075_v45 = vadd.f32 %v4074_v20, %v3901_v18  ;;  %v3907_v21 = vmax.f32 %v4785_v28, 0.0  ;;  %v3909_v54 = vmax.f32 %v4817_v1, 0.0 }
 0x2b9   : > { %v4013_v29 = vadd.f32 %v4012_v40, %v3906_v27  ;;  %v4055_v31 = vadd.f32 %v4054_v12, %v3908_v53 }
 0x2ba   : > { %v4034_v48 = vadd.f32 %v4033_v35, %v3907_v21  ;;  %v4076_v44 = vadd.f32 %v4075_v45, %v3909_v54  ;;  %v3145_v56 = vpop.f32.mrb[72].mxu0  ;;  %v3371_v19 = vpop.f32.mrb[72].mxu1 }
 0x2bb   : > { %v4786_v2 = vadd.f32 %v3145_v56, %v6518_v32  ;;  %v4818_v24 = vadd.f32 %v3371_v19, %v6523_v39  ;;  %v3147_v8 = vpop.f32.mrb[73].mxu0  ;;  %v3373_v50 = vpop.f32.mrb[73].mxu1 }
 0x2bc   : > { %v4787_v0 = vadd.f32 %v3147_v8, %v6528_v37  ;;  %v4819_v25 = vadd.f32 %v3373_v50, %v6533_v43  ;;  %v3149_v33 = vpop.f32.mrb[74].mxu0  ;;  %v3375_v3 = vpop.f32.mrb[74].mxu1 }
 0x2bd   : > { %v3914_v59 = vmax.f32 %v4786_v2, 0.0  ;;  %v3916_v42 = vmax.f32 %v4818_v24, 0.0  ;;  %v4788_v13 = vadd.f32 %v3149_v33, %v6518_v32  ;;  %v4820_v46 = vadd.f32 %v3375_v3, %v6523_v39  ;;  %v3151_v60 = vpop.f32.mrb[75].mxu0  ;;  %v3377_v58 = vpop.f32.mrb[75].mxu1 }
 0x2be   : > { %v3915_v49 = vmax.f32 %v4787_v0, 0.0  ;;  %v3917_v57 = vmax.f32 %v4819_v25, 0.0  ;;  %v4789_v10 = vadd.f32 %v3151_v60, %v6528_v37  ;;  %v4821_v22 = vadd.f32 %v3377_v58, %v6533_v43 }
 0x2bf   : > { %v4014_v26 = vadd.f32 %v4013_v29, %v3914_v59  ;;  %v4056_v38 = vadd.f32 %v4055_v31, %v3916_v42  ;;  %v3922_v62 = vmax.f32 %v4788_v13, 0.0  ;;  %v3924_v17 = vmax.f32 %v4820_v46, 0.0 }
 0x2c0   : > { %v4035_v52 = vadd.f32 %v4034_v48, %v3915_v49  ;;  %v4077_v20 = vadd.f32 %v4076_v44, %v3917_v57  ;;  %v3923_v6 = vmax.f32 %v4789_v10, 0.0  ;;  %v3925_v61 = vmax.f32 %v4821_v22, 0.0 }
 0x2c1   : > { %v4015_v5 = vadd.f32 %v4014_v26, %v3922_v62  ;;  %v4057_v9 = vadd.f32 %v4056_v38, %v3924_v17 }
 0x2c2   : > { %v4036_v36 = vadd.f32 %v4035_v52, %v3923_v6  ;;  %v4078_v63 = vadd.f32 %v4077_v20, %v3925_v61  ;;  %v3155_v16 = vpop.f32.mrb[76].mxu0  ;;  %v3381_v23 = vpop.f32.mrb[76].mxu1 }
 0x2c3   : > { %v4790_v11 = vadd.f32 %v3155_v16, %v6518_v32  ;;  %v4822_v34 = vadd.f32 %v3381_v23, %v6523_v39  ;;  %v3157_v47 = vpop.f32.mrb[77].mxu0  ;;  %v3383_v14 = vpop.f32.mrb[77].mxu1 }
 0x2c4   : > { %v4791_v15 = vadd.f32 %v3157_v47, %v6528_v37  ;;  %v4823_v41 = vadd.f32 %v3383_v14, %v6533_v43  ;;  %v3159_v7 = vpop.f32.mrb[78].mxu0  ;;  %v3385_v30 = vpop.f32.mrb[78].mxu1 }
 0x2c5   : > { %v3930_v51 = vmax.f32 %v4790_v11, 0.0  ;;  %v3932_v18 = vmax.f32 %v4822_v34, 0.0  ;;  %v4792_v28 = vadd.f32 %v3159_v7, %v6518_v32  ;;  %v4824_v1 = vadd.f32 %v3385_v30, %v6523_v39  ;;  %v3161_v40 = vpop.f32.mrb[79].mxu0  ;;  %v3387_v12 = vpop.f32.mrb[79].mxu1 }
 0x2c6   : > { %v3931_v27 = vmax.f32 %v4791_v15, 0.0  ;;  %v3933_v53 = vmax.f32 %v4823_v41, 0.0  ;;  %v4793_v35 = vadd.f32 %v3161_v40, %v6528_v37  ;;  %v4825_v45 = vadd.f32 %v3387_v12, %v6533_v43 }
 0x2c7   : > { %v4016_v21 = vadd.f32 %v4015_v5, %v3930_v51  ;;  %v4058_v54 = vadd.f32 %v4057_v9, %v3932_v18  ;;  %v3938_v29 = vmax.f32 %v4792_v28, 0.0  ;;  %v3940_v31 = vmax.f32 %v4824_v1, 0.0 }
 0x2c8   : > { %v4037_v48 = vadd.f32 %v4036_v36, %v3931_v27  ;;  %v4079_v44 = vadd.f32 %v4078_v63, %v3933_v53  ;;  %v3939_v56 = vmax.f32 %v4793_v35, 0.0  ;;  %v3941_v19 = vmax.f32 %v4825_v45, 0.0 }
 0x2c9   : > { %v4017_v2 = vadd.f32 %v4016_v21, %v3938_v29  ;;  %v4059_v24 = vadd.f32 %v4058_v54, %v3940_v31 }
 0x2ca   : > { %v4038_v8 = vadd.f32 %v4037_v48, %v3939_v56  ;;  %v4080_v50 = vadd.f32 %v4079_v44, %v3941_v19  ;;  %v3165_v0 = vpop.f32.mrb[80].mxu0  ;;  %v3391_v25 = vpop.f32.mrb[80].mxu1 }
 0x2cb   : > { %v4794_v33 = vadd.f32 %v3165_v0, %v6518_v32  ;;  %v4826_v3 = vadd.f32 %v3391_v25, %v6523_v39  ;;  %v3167_v59 = vpop.f32.mrb[81].mxu0  ;;  %v3393_v42 = vpop.f32.mrb[81].mxu1 }
 0x2cc   : > { %v4795_v13 = vadd.f32 %v3167_v59, %v6528_v37  ;;  %v4827_v46 = vadd.f32 %v3393_v42, %v6533_v43  ;;  %v3169_v60 = vpop.f32.mrb[82].mxu0  ;;  %v3395_v58 = vpop.f32.mrb[82].mxu1 }
 0x2cd   : > { %v3946_v49 = vmax.f32 %v4794_v33, 0.0  ;;  %v3948_v57 = vmax.f32 %v4826_v3, 0.0  ;;  %v4796_v10 = vadd.f32 %v3169_v60, %v6518_v32  ;;  %v4828_v22 = vadd.f32 %v3395_v58, %v6523_v39  ;;  %v3171_v26 = vpop.f32.mrb[83].mxu0  ;;  %v3397_v38 = vpop.f32.mrb[83].mxu1 }
 0x2ce   : > { %v3947_v62 = vmax.f32 %v4795_v13, 0.0  ;;  %v3949_v17 = vmax.f32 %v4827_v46, 0.0  ;;  %v4797_v52 = vadd.f32 %v3171_v26, %v6528_v37  ;;  %v4829_v20 = vadd.f32 %v3397_v38, %v6533_v43 }
 0x2cf   : > { %v4018_v6 = vadd.f32 %v4017_v2, %v3946_v49  ;;  %v4060_v61 = vadd.f32 %v4059_v24, %v3948_v57  ;;  %v3954_v5 = vmax.f32 %v4796_v10, 0.0  ;;  %v3956_v9 = vmax.f32 %v4828_v22, 0.0 }
 0x2d0   : > { %v4039_v36 = vadd.f32 %v4038_v8, %v3947_v62  ;;  %v4081_v63 = vadd.f32 %v4080_v50, %v3949_v17  ;;  %v3955_v16 = vmax.f32 %v4797_v52, 0.0  ;;  %v3957_v23 = vmax.f32 %v4829_v20, 0.0 }
 0x2d1   : > { %v4019_v11 = vadd.f32 %v4018_v6, %v3954_v5  ;;  %v4061_v34 = vadd.f32 %v4060_v61, %v3956_v9 }
 0x2d2   : > { %v4040_v47 = vadd.f32 %v4039_v36, %v3955_v16  ;;  %v4082_v14 = vadd.f32 %v4081_v63, %v3957_v23  ;;  %v3175_v15 = vpop.f32.mrb[84].mxu0  ;;  %v3401_v41 = vpop.f32.mrb[84].mxu1 }
 0x2d3   : > { %v4798_v7 = vadd.f32 %v3175_v15, %v6518_v32  ;;  %v4830_v30 = vadd.f32 %v3401_v41, %v6523_v39  ;;  %v3177_v51 = vpop.f32.mrb[85].mxu0  ;;  %v3403_v18 = vpop.f32.mrb[85].mxu1 }
 0x2d4   : > { %v4799_v28 = vadd.f32 %v3177_v51, %v6528_v37  ;;  %v4831_v1 = vadd.f32 %v3403_v18, %v6533_v43  ;;  %v3179_v40 = vpop.f32.mrb[86].mxu0  ;;  %v3405_v12 = vpop.f32.mrb[86].mxu1 }
 0x2d5   : > { %v3962_v27 = vmax.f32 %v4798_v7, 0.0  ;;  %v3964_v53 = vmax.f32 %v4830_v30, 0.0  ;;  %v4800_v35 = vadd.f32 %v3179_v40, %v6518_v32  ;;  %v4832_v45 = vadd.f32 %v3405_v12, %v6523_v39  ;;  %v3181_v21 = vpop.f32.mrb[87].mxu0  ;;  %v3407_v54 = vpop.f32.mrb[87].mxu1 }
 0x2d6   : > { %v3963_v29 = vmax.f32 %v4799_v28, 0.0  ;;  %v3965_v31 = vmax.f32 %v4831_v1, 0.0  ;;  %v4801_v48 = vadd.f32 %v3181_v21, %v6528_v37  ;;  %v4833_v44 = vadd.f32 %v3407_v54, %v6533_v43 }
 0x2d7   : > { %v4020_v56 = vadd.f32 %v4019_v11, %v3962_v27  ;;  %v4062_v19 = vadd.f32 %v4061_v34, %v3964_v53  ;;  %v3970_v2 = vmax.f32 %v4800_v35, 0.0  ;;  %v3972_v24 = vmax.f32 %v4832_v45, 0.0 }
 0x2d8   : > { %v4041_v8 = vadd.f32 %v4040_v47, %v3963_v29  ;;  %v4083_v50 = vadd.f32 %v4082_v14, %v3965_v31  ;;  %v3971_v0 = vmax.f32 %v4801_v48, 0.0  ;;  %v3973_v25 = vmax.f32 %v4833_v44, 0.0 }
 0x2d9   : > { %v4021_v33 = vadd.f32 %v4020_v56, %v3970_v2  ;;  %v4063_v3 = vadd.f32 %v4062_v19, %v3972_v24 }
 0x2da   : > { %v4042_v59 = vadd.f32 %v4041_v8, %v3971_v0  ;;  %v4084_v42 = vadd.f32 %v4083_v50, %v3973_v25  ;;  %v3185_v13 = vpop.f32.mrb[88].mxu0  ;;  %v3411_v46 = vpop.f32.mrb[88].mxu1 }
 0x2db   : > { %v4802_v60 = vadd.f32 %v3185_v13, %v6518_v32  ;;  %v4834_v58 = vadd.f32 %v3411_v46, %v6523_v39  ;;  %v3187_v49 = vpop.f32.mrb[89].mxu0  ;;  %v3413_v57 = vpop.f32.mrb[89].mxu1 }
 0x2dc   : > { %v4803_v10 = vadd.f32 %v3187_v49, %v6528_v37  ;;  %v4835_v22 = vadd.f32 %v3413_v57, %v6533_v43  ;;  %v3189_v26 = vpop.f32.mrb[90].mxu0  ;;  %v3415_v38 = vpop.f32.mrb[90].mxu1 }
 0x2dd   : > { %v3978_v62 = vmax.f32 %v4802_v60, 0.0  ;;  %v3980_v17 = vmax.f32 %v4834_v58, 0.0  ;;  %v4804_v52 = vadd.f32 %v3189_v26, %v6518_v32  ;;  %v4836_v20 = vadd.f32 %v3415_v38, %v6523_v39  ;;  %v3191_v6 = vpop.f32.mrb[91].mxu0  ;;  %v3417_v61 = vpop.f32.mrb[91].mxu1 }
 0x2de   : > { %v3979_v5 = vmax.f32 %v4803_v10, 0.0  ;;  %v3981_v9 = vmax.f32 %v4835_v22, 0.0  ;;  %v4805_v36 = vadd.f32 %v3191_v6, %v6528_v37  ;;  %v4837_v63 = vadd.f32 %v3417_v61, %v6533_v43 }
 0x2df   : > { %v4022_v16 = vadd.f32 %v4021_v33, %v3978_v62  ;;  %v4064_v23 = vadd.f32 %v4063_v3, %v3980_v17  ;;  %v3986_v11 = vmax.f32 %v4804_v52, 0.0  ;;  %v3988_v34 = vmax.f32 %v4836_v20, 0.0 }
 0x2e0   : > { %v4043_v47 = vadd.f32 %v4042_v59, %v3979_v5  ;;  %v4085_v14 = vadd.f32 %v4084_v42, %v3981_v9  ;;  %v3987_v15 = vmax.f32 %v4805_v36, 0.0  ;;  %v3989_v41 = vmax.f32 %v4837_v63, 0.0 }
 0x2e1   : > { %v4023_v7 = vadd.f32 %v4022_v16, %v3986_v11  ;;  %v4065_v30 = vadd.f32 %v4064_v23, %v3988_v34 }
 0x2e2   : > { %v4044_v51 = vadd.f32 %v4043_v47, %v3987_v15  ;;  %v4086_v18 = vadd.f32 %v4085_v14, %v3989_v41  ;;  %v3195_v28 = vpop.f32.mrb[92].mxu0  ;;  %v3421_v1 = vpop.f32.mrb[92].mxu1 }
 0x2e3   : > { %v4806_v40 = vadd.f32 %v3195_v28, %v6518_v32  ;;  %v4838_v12 = vadd.f32 %v3421_v1, %v6523_v39  ;;  %v3197_v27 = vpop.f32.mrb[93].mxu0  ;;  %v3423_v53 = vpop.f32.mrb[93].mxu1 }
 0x2e4   : > { %v4807_v35 = vadd.f32 %v3197_v27, %v6528_v37  ;;  %v4839_v45 = vadd.f32 %v3423_v53, %v6533_v43  ;;  %v3199_v21 = vpop.f32.mrb[94].mxu0  ;;  %v3425_v54 = vpop.f32.mrb[94].mxu1  ;;  %v6864_v53 = vsub.s32 6, %v5849_v55 }
 0x2e5   : > { %v3994_v29 = vmax.f32 %v4806_v40, 0.0  ;;  %v3996_v31 = vmax.f32 %v4838_v12, 0.0  ;;  %v4808_v48 = vadd.f32 %v3199_v21, %v6518_v32  ;;  %v4840_v44 = vadd.f32 %v3425_v54, %v6523_v39  ;;  %v3201_v56 = vpop.f32.mrb[95].mxu0  ;;  %v3427_v19 = vpop.f32.mrb[95].mxu1 }
 0x2e6   : > { %v3995_v2 = vmax.f32 %v4807_v35, 0.0  ;;  %v3997_v24 = vmax.f32 %v4839_v45, 0.0  ;;  %v4809_v8 = vadd.f32 %v3201_v56, %v6528_v37  ;;  %v4841_v50 = vadd.f32 %v3427_v19, %v6533_v43 }
 0x2e7   : > { %v4024_v0 = vadd.f32 %v4023_v7, %v3994_v29  ;;  %v4066_v25 = vadd.f32 %v4065_v30, %v3996_v31  ;;  %v4002_v33 = vmax.f32 %v4808_v48, 0.0  ;;  %v4004_v3 = vmax.f32 %v4840_v44, 0.0 }
 0x2e8   : > { %v4045_v59 = vadd.f32 %v4044_v51, %v3995_v2  ;;  %v4087_v42 = vadd.f32 %v4086_v18, %v3997_v24  ;;  %v4003_v13 = vmax.f32 %v4809_v8, 0.0  ;;  %v4005_v46 = vmax.f32 %v4841_v50, 0.0 }
 0x2e9   : > { %v4025_v60 = vadd.f32 %v4024_v0, %v4002_v33  ;;  %v4067_v32 = vadd.f32 %v4066_v25, %v4004_v3  ;;  %v5349_v43 = vmov 1966171168   ;;  %v6863_v12 = vsub.s32 4, %v5849_v55 }
 0x2ea   : > { %v4046_v58 = vadd.f32 %v4045_v59, %v4003_v13  ;;  %v4088_v39 = vadd.f32 %v4087_v42, %v4005_v46  ;;  %v4192_v62 = vunpack.c.l.s4 %v5349_v43  ;;  %v6618_v35 = vrot.slane %v6513_v4, %v6864_v53 }
 0x2eb   : > { %v4026_v49 = vrot.slane %v4025_v60, 4  ;;  %v4068_v57 = vrot.slane %v4067_v32, 4  ;;  %v6613_v27 = vrot.slane %v6513_v4, %v6863_v12  ;;  %v6865_v45 = vsub.s32 5, %v5849_v55 }
 0x2ec   : > { %v4047_v10 = vrot.slane %v4046_v58, 4  ;;  %v4089_v22 = vrot.slane %v4088_v39, 4  ;;  %v4193_v63 = vunpack.c.0.s8 %v4192_v62  ;;  %v6866_v54 = vsub.s32 7, %v5849_v55 }
 0x2ed   : > { %v4027_v26 = vadd.f32 %v4026_v49, %v4025_v60  ;;  %v4069_v37 = vadd.f32 %v4068_v57, %v4067_v32  ;;  %v6623_v21 = vrot.slane %v6513_v4, %v6865_v45 }
 0x2ee   : > { %v4048_v38 = vadd.f32 %v4047_v10, %v4046_v58  ;;  %v4090_v17 = vadd.f32 %v4089_v22, %v4088_v39  ;;  %v6600_v7 = vsub.s32 %v4193_v63, %v5849_v55  ;;  %v6628_v29 = vrot.slane %v6513_v4, %v6866_v54 }
 0x2ef   : > { %v4028_v52 = vrot.slane %v4027_v26, 2  ;;  %v4070_v20 = vrot.slane %v4069_v37, 2 }
 0x2f0   : > { %v4049_v6 = vrot.slane %v4048_v38, 2  ;;  %v4091_v61 = vrot.slane %v4090_v17, 2 }
 0x2f1   : > { %v4029_v5 = vadd.f32 %v4028_v52, %v4027_v26  ;;  %v4071_v9 = vadd.f32 %v4070_v20, %v4069_v37 }
 0x2f2   : > { %v4050_v36 = vadd.f32 %v4049_v6, %v4048_v38  ;;  %v4092_v16 = vadd.f32 %v4091_v61, %v4090_v17 }
 0x2f3   : > { %v4030_v23 = vrot.slane %v4029_v5, 1  ;;  %v4072_v11 = vrot.slane %v4071_v9, 1 }
 0x2f4   : > { %v4051_v34 = vrot.slane %v4050_v36, 1  ;;  %v4093_v47 = vrot.slane %v4092_v16, 1 }
 0x2f5   : > { %v4031_v14 = vadd.f32 %v4030_v23, %v4029_v5  ;;  %v4073_v15 = vadd.f32 %v4072_v11, %v4071_v9 }
 0x2f6   : > { %v4052_v41 = vadd.f32 %v4051_v34, %v4050_v36  ;;  %v4094_v30 = vadd.f32 %v4093_v47, %v4092_v16 }
 0x2f8   : > { %v4187_v51 = vcombine.low %v4031_v14, %v4052_v41  ;;  %v4188_v18 = vcombine.low %v4073_v15, %v4094_v30 }
 0x2fa   : > { %v6603_v28 = vrot.slane %v4187_v51, %v6600_v7  ;;  %v6606_v1 = vrot.slane %v4188_v18, %v6600_v7 }
 0x2fc   : > { %v4219_v40 = vcombine.low %v6603_v28, %v6606_v1 }
 0x32b   : > { %v3577_v31 = vpop.f32.mrb[96].mxu0 }
 0x32c   : > { %v4842_v48 = vadd.f32 %v3577_v31, %v6613_v27  ;;  %v3803_v44 = vpop.f32.mrb[96].mxu1  ;;  %v3579_v56 = vpop.f32.mrb[97].mxu0 }
 0x32d   : > { %v4874_v19 = vadd.f32 %v3803_v44, %v6618_v35  ;;  %v4843_v2 = vadd.f32 %v3579_v56, %v6623_v21  ;;  %v3805_v24 = vpop.f32.mrb[97].mxu1  ;;  %v3581_v8 = vpop.f32.mrb[98].mxu0 }
 0x32e   : > { %v4875_v50 = vadd.f32 %v3805_v24, %v6628_v29  ;;  %v4844_v0 = vadd.f32 %v3581_v8, %v6613_v27  ;;  %v3807_v25 = vpop.f32.mrb[98].mxu1  ;;  %v3583_v55 = vpop.f32.mrb[99].mxu0  ;;  %v3886_v59 = vmax.f32 %v4842_v48, 0.0 }
 0x32f   : > { %v4876_v4 = vadd.f32 %v3807_v25, %v6618_v35  ;;  %v4845_v33 = vadd.f32 %v3583_v55, %v6623_v21  ;;  %v3809_v3 = vpop.f32.mrb[99].mxu1  ;;  %v3888_v46 = vmax.f32 %v4874_v19, 0.0  ;;  %v3887_v60 = vmax.f32 %v4843_v2, 0.0 }
 0x330   : > { %v3894_v42 = vmax.f32 %v4844_v0, 0.0  ;;  %v4877_v13 = vadd.f32 %v3809_v3, %v6628_v29  ;;  %v3889_v39 = vmax.f32 %v4875_v50, 0.0 }
 0x331   : > { %v3896_v32 = vmax.f32 %v4876_v4, 0.0  ;;  %v3895_v58 = vmax.f32 %v4845_v33, 0.0 }
 0x332   : > { %v4095_v49 = vadd.f32 %v3894_v42, %v3886_v59  ;;  %v3897_v57 = vmax.f32 %v4877_v13, 0.0 }
 0x333   : > { %v4137_v10 = vadd.f32 %v3896_v32, %v3888_v46  ;;  %v4116_v22 = vadd.f32 %v3895_v58, %v3887_v60  ;;  %v3587_v26 = vpop.f32.mrb[100].mxu0 }
 0x334   : > { %v4158_v37 = vadd.f32 %v3897_v57, %v3889_v39  ;;  %v4846_v38 = vadd.f32 %v3587_v26, %v6613_v27  ;;  %v3813_v43 = vpop.f32.mrb[100].mxu1  ;;  %v3589_v62 = vpop.f32.mrb[101].mxu0 }
 0x335   : > { %v4878_v17 = vadd.f32 %v3813_v43, %v6618_v35  ;;  %v4847_v52 = vadd.f32 %v3589_v62, %v6623_v21  ;;  %v3815_v20 = vpop.f32.mrb[101].mxu1  ;;  %v3591_v6 = vpop.f32.mrb[102].mxu0 }
 0x336   : > { %v3902_v61 = vmax.f32 %v4846_v38, 0.0  ;;  %v4879_v5 = vadd.f32 %v3815_v20, %v6628_v29  ;;  %v4848_v9 = vadd.f32 %v3591_v6, %v6613_v27  ;;  %v3817_v36 = vpop.f32.mrb[102].mxu1  ;;  %v3593_v63 = vpop.f32.mrb[103].mxu0 }
 0x337   : > { %v3904_v16 = vmax.f32 %v4878_v17, 0.0  ;;  %v3903_v23 = vmax.f32 %v4847_v52, 0.0  ;;  %v4880_v11 = vadd.f32 %v3817_v36, %v6618_v35  ;;  %v4849_v34 = vadd.f32 %v3593_v63, %v6623_v21  ;;  %v3819_v47 = vpop.f32.mrb[103].mxu1 }
 0x338   : > { %v4096_v14 = vadd.f32 %v4095_v49, %v3902_v61  ;;  %v3905_v15 = vmax.f32 %v4879_v5, 0.0  ;;  %v3910_v41 = vmax.f32 %v4848_v9, 0.0  ;;  %v4881_v30 = vadd.f32 %v3819_v47, %v6628_v29 }
 0x339   : > { %v4138_v51 = vadd.f32 %v4137_v10, %v3904_v16  ;;  %v4117_v18 = vadd.f32 %v4116_v22, %v3903_v23  ;;  %v3912_v12 = vmax.f32 %v4880_v11, 0.0  ;;  %v3911_v53 = vmax.f32 %v4849_v34, 0.0 }
 0x33a   : > { %v4159_v45 = vadd.f32 %v4158_v37, %v3905_v15  ;;  %v4097_v54 = vadd.f32 %v4096_v14, %v3910_v41  ;;  %v3913_v31 = vmax.f32 %v4881_v30, 0.0 }
 0x33b   : > { %v4139_v48 = vadd.f32 %v4138_v51, %v3912_v12  ;;  %v4118_v44 = vadd.f32 %v4117_v18, %v3911_v53  ;;  %v3597_v56 = vpop.f32.mrb[104].mxu0 }
 0x33c   : > { %v4160_v19 = vadd.f32 %v4159_v45, %v3913_v31  ;;  %v4850_v2 = vadd.f32 %v3597_v56, %v6613_v27  ;;  %v3823_v24 = vpop.f32.mrb[104].mxu1  ;;  %v3599_v8 = vpop.f32.mrb[105].mxu0 }
 0x33d   : > { %v4882_v50 = vadd.f32 %v3823_v24, %v6618_v35  ;;  %v4851_v0 = vadd.f32 %v3599_v8, %v6623_v21  ;;  %v3825_v25 = vpop.f32.mrb[105].mxu1  ;;  %v3601_v55 = vpop.f32.mrb[106].mxu0 }
 0x33e   : > { %v3918_v4 = vmax.f32 %v4850_v2, 0.0  ;;  %v4883_v33 = vadd.f32 %v3825_v25, %v6628_v29  ;;  %v4852_v3 = vadd.f32 %v3601_v55, %v6613_v27  ;;  %v3827_v59 = vpop.f32.mrb[106].mxu1  ;;  %v3603_v42 = vpop.f32.mrb[107].mxu0 }
 0x33f   : > { %v3920_v13 = vmax.f32 %v4882_v50, 0.0  ;;  %v3919_v46 = vmax.f32 %v4851_v0, 0.0  ;;  %v4884_v60 = vadd.f32 %v3827_v59, %v6618_v35  ;;  %v4853_v32 = vadd.f32 %v3603_v42, %v6623_v21  ;;  %v3829_v58 = vpop.f32.mrb[107].mxu1 }
 0x340   : > { %v4098_v39 = vadd.f32 %v4097_v54, %v3918_v4  ;;  %v3921_v49 = vmax.f32 %v4883_v33, 0.0  ;;  %v3926_v57 = vmax.f32 %v4852_v3, 0.0  ;;  %v4885_v10 = vadd.f32 %v3829_v58, %v6628_v29 }
 0x341   : > { %v4140_v22 = vadd.f32 %v4139_v48, %v3920_v13  ;;  %v4119_v26 = vadd.f32 %v4118_v44, %v3919_v46  ;;  %v3928_v37 = vmax.f32 %v4884_v60, 0.0  ;;  %v3927_v38 = vmax.f32 %v4853_v32, 0.0 }
 0x342   : > { %v4161_v43 = vadd.f32 %v4160_v19, %v3921_v49  ;;  %v4099_v62 = vadd.f32 %v4098_v39, %v3926_v57  ;;  %v3929_v17 = vmax.f32 %v4885_v10, 0.0 }
 0x343   : > { %v4141_v52 = vadd.f32 %v4140_v22, %v3928_v37  ;;  %v4120_v20 = vadd.f32 %v4119_v26, %v3927_v38  ;;  %v3607_v6 = vpop.f32.mrb[108].mxu0 }
 0x344   : > { %v4162_v61 = vadd.f32 %v4161_v43, %v3929_v17  ;;  %v4854_v5 = vadd.f32 %v3607_v6, %v6613_v27  ;;  %v3833_v9 = vpop.f32.mrb[108].mxu1  ;;  %v3609_v36 = vpop.f32.mrb[109].mxu0 }
 0x345   : > { %v4886_v63 = vadd.f32 %v3833_v9, %v6618_v35  ;;  %v4855_v16 = vadd.f32 %v3609_v36, %v6623_v21  ;;  %v3835_v23 = vpop.f32.mrb[109].mxu1  ;;  %v3611_v11 = vpop.f32.mrb[110].mxu0 }
 0x346   : > { %v3934_v34 = vmax.f32 %v4854_v5, 0.0  ;;  %v4887_v47 = vadd.f32 %v3835_v23, %v6628_v29  ;;  %v4856_v14 = vadd.f32 %v3611_v11, %v6613_v27  ;;  %v3837_v15 = vpop.f32.mrb[110].mxu1  ;;  %v3613_v41 = vpop.f32.mrb[111].mxu0 }
 0x347   : > { %v3936_v30 = vmax.f32 %v4886_v63, 0.0  ;;  %v3935_v51 = vmax.f32 %v4855_v16, 0.0  ;;  %v4888_v18 = vadd.f32 %v3837_v15, %v6618_v35  ;;  %v4857_v12 = vadd.f32 %v3613_v41, %v6623_v21  ;;  %v3839_v53 = vpop.f32.mrb[111].mxu1 }
 0x348   : > { %v4100_v45 = vadd.f32 %v4099_v62, %v3934_v34  ;;  %v3937_v54 = vmax.f32 %v4887_v47, 0.0  ;;  %v3942_v31 = vmax.f32 %v4856_v14, 0.0  ;;  %v4889_v48 = vadd.f32 %v3839_v53, %v6628_v29 }
 0x349   : > { %v4142_v44 = vadd.f32 %v4141_v52, %v3936_v30  ;;  %v4121_v56 = vadd.f32 %v4120_v20, %v3935_v51  ;;  %v3944_v19 = vmax.f32 %v4888_v18, 0.0  ;;  %v3943_v2 = vmax.f32 %v4857_v12, 0.0 }
 0x34a   : > { %v4163_v24 = vadd.f32 %v4162_v61, %v3937_v54  ;;  %v4101_v8 = vadd.f32 %v4100_v45, %v3942_v31  ;;  %v3945_v50 = vmax.f32 %v4889_v48, 0.0 }
 0x34b   : > { %v4143_v0 = vadd.f32 %v4142_v44, %v3944_v19  ;;  %v4122_v25 = vadd.f32 %v4121_v56, %v3943_v2  ;;  %v3617_v55 = vpop.f32.mrb[112].mxu0 }
 0x34c   : > { %v4164_v4 = vadd.f32 %v4163_v24, %v3945_v50  ;;  %v4858_v33 = vadd.f32 %v3617_v55, %v6613_v27  ;;  %v3843_v3 = vpop.f32.mrb[112].mxu1  ;;  %v3619_v59 = vpop.f32.mrb[113].mxu0 }
 0x34d   : > { %v4890_v42 = vadd.f32 %v3843_v3, %v6618_v35  ;;  %v4859_v13 = vadd.f32 %v3619_v59, %v6623_v21  ;;  %v3845_v46 = vpop.f32.mrb[113].mxu1  ;;  %v3621_v60 = vpop.f32.mrb[114].mxu0 }
 0x34e   : > { %v3950_v32 = vmax.f32 %v4858_v33, 0.0  ;;  %v4891_v58 = vadd.f32 %v3845_v46, %v6628_v29  ;;  %v4860_v39 = vadd.f32 %v3621_v60, %v6613_v27  ;;  %v3847_v49 = vpop.f32.mrb[114].mxu1  ;;  %v3623_v57 = vpop.f32.mrb[115].mxu0 }
 0x34f   : > { %v3952_v10 = vmax.f32 %v4890_v42, 0.0  ;;  %v3951_v22 = vmax.f32 %v4859_v13, 0.0  ;;  %v4892_v26 = vadd.f32 %v3847_v49, %v6618_v35  ;;  %v4861_v37 = vadd.f32 %v3623_v57, %v6623_v21  ;;  %v3849_v38 = vpop.f32.mrb[115].mxu1 }
 0x350   : > { %v4102_v43 = vadd.f32 %v4101_v8, %v3950_v32  ;;  %v3953_v62 = vmax.f32 %v4891_v58, 0.0  ;;  %v3958_v17 = vmax.f32 %v4860_v39, 0.0  ;;  %v4893_v52 = vadd.f32 %v3849_v38, %v6628_v29 }
 0x351   : > { %v4144_v20 = vadd.f32 %v4143_v0, %v3952_v10  ;;  %v4123_v6 = vadd.f32 %v4122_v25, %v3951_v22  ;;  %v3960_v61 = vmax.f32 %v4892_v26, 0.0  ;;  %v3959_v5 = vmax.f32 %v4861_v37, 0.0 }
 0x352   : > { %v4165_v9 = vadd.f32 %v4164_v4, %v3953_v62  ;;  %v4103_v36 = vadd.f32 %v4102_v43, %v3958_v17  ;;  %v3961_v63 = vmax.f32 %v4893_v52, 0.0 }
 0x353   : > { %v4145_v16 = vadd.f32 %v4144_v20, %v3960_v61  ;;  %v4124_v23 = vadd.f32 %v4123_v6, %v3959_v5  ;;  %v3627_v11 = vpop.f32.mrb[116].mxu0 }
 0x354   : > { %v4166_v34 = vadd.f32 %v4165_v9, %v3961_v63  ;;  %v4862_v47 = vadd.f32 %v3627_v11, %v6613_v27  ;;  %v3853_v14 = vpop.f32.mrb[116].mxu1  ;;  %v3629_v15 = vpop.f32.mrb[117].mxu0 }
 0x355   : > { %v4894_v41 = vadd.f32 %v3853_v14, %v6618_v35  ;;  %v4863_v30 = vadd.f32 %v3629_v15, %v6623_v21  ;;  %v3855_v51 = vpop.f32.mrb[117].mxu1  ;;  %v3631_v18 = vpop.f32.mrb[118].mxu0 }
 0x356   : > { %v3966_v12 = vmax.f32 %v4862_v47, 0.0  ;;  %v4895_v53 = vadd.f32 %v3855_v51, %v6628_v29  ;;  %v4864_v45 = vadd.f32 %v3631_v18, %v6613_v27  ;;  %v3857_v54 = vpop.f32.mrb[118].mxu1  ;;  %v3633_v31 = vpop.f32.mrb[119].mxu0 }
 0x357   : > { %v3968_v48 = vmax.f32 %v4894_v41, 0.0  ;;  %v3967_v44 = vmax.f32 %v4863_v30, 0.0  ;;  %v4896_v56 = vadd.f32 %v3857_v54, %v6618_v35  ;;  %v4865_v19 = vadd.f32 %v3633_v31, %v6623_v21  ;;  %v3859_v2 = vpop.f32.mrb[119].mxu1 }
 0x358   : > { %v4104_v24 = vadd.f32 %v4103_v36, %v3966_v12  ;;  %v3969_v8 = vmax.f32 %v4895_v53, 0.0  ;;  %v3974_v50 = vmax.f32 %v4864_v45, 0.0  ;;  %v4897_v0 = vadd.f32 %v3859_v2, %v6628_v29 }
 0x359   : > { %v4146_v25 = vadd.f32 %v4145_v16, %v3968_v48  ;;  %v4125_v55 = vadd.f32 %v4124_v23, %v3967_v44  ;;  %v3976_v4 = vmax.f32 %v4896_v56, 0.0  ;;  %v3975_v33 = vmax.f32 %v4865_v19, 0.0 }
 0x35a   : > { %v4167_v3 = vadd.f32 %v4166_v34, %v3969_v8  ;;  %v4105_v59 = vadd.f32 %v4104_v24, %v3974_v50  ;;  %v3977_v42 = vmax.f32 %v4897_v0, 0.0 }
 0x35b   : > { %v4147_v13 = vadd.f32 %v4146_v25, %v3976_v4  ;;  %v4126_v46 = vadd.f32 %v4125_v55, %v3975_v33  ;;  %v3637_v60 = vpop.f32.mrb[120].mxu0 }
 0x35c   : > { %v4168_v32 = vadd.f32 %v4167_v3, %v3977_v42  ;;  %v4866_v58 = vadd.f32 %v3637_v60, %v6613_v27  ;;  %v3863_v39 = vpop.f32.mrb[120].mxu1  ;;  %v3639_v49 = vpop.f32.mrb[121].mxu0 }
 0x35d   : > { %v4898_v57 = vadd.f32 %v3863_v39, %v6618_v35  ;;  %v4867_v10 = vadd.f32 %v3639_v49, %v6623_v21  ;;  %v3865_v22 = vpop.f32.mrb[121].mxu1  ;;  %v3641_v26 = vpop.f32.mrb[122].mxu0 }
 0x35e   : > { %v3982_v37 = vmax.f32 %v4866_v58, 0.0  ;;  %v4899_v38 = vadd.f32 %v3865_v22, %v6628_v29  ;;  %v4868_v43 = vadd.f32 %v3641_v26, %v6613_v27  ;;  %v3867_v62 = vpop.f32.mrb[122].mxu1  ;;  %v3643_v17 = vpop.f32.mrb[123].mxu0 }
 0x35f   : > { %v3984_v52 = vmax.f32 %v4898_v57, 0.0  ;;  %v3983_v20 = vmax.f32 %v4867_v10, 0.0  ;;  %v4900_v6 = vadd.f32 %v3867_v62, %v6618_v35  ;;  %v4869_v61 = vadd.f32 %v3643_v17, %v6623_v21  ;;  %v3869_v5 = vpop.f32.mrb[123].mxu1 }
 0x360   : > { %v4106_v9 = vadd.f32 %v4105_v59, %v3982_v37  ;;  %v3985_v36 = vmax.f32 %v4899_v38, 0.0  ;;  %v3990_v63 = vmax.f32 %v4868_v43, 0.0  ;;  %v4901_v16 = vadd.f32 %v3869_v5, %v6628_v29 }
 0x361   : > { %v4148_v23 = vadd.f32 %v4147_v13, %v3984_v52  ;;  %v4127_v11 = vadd.f32 %v4126_v46, %v3983_v20  ;;  %v3992_v34 = vmax.f32 %v4900_v6, 0.0  ;;  %v3991_v47 = vmax.f32 %v4869_v61, 0.0 }
 0x362   : > { %v4169_v14 = vadd.f32 %v4168_v32, %v3985_v36  ;;  %v4107_v15 = vadd.f32 %v4106_v9, %v3990_v63  ;;  %v3993_v41 = vmax.f32 %v4901_v16, 0.0 }
 0x363   : > { %v4149_v30 = vadd.f32 %v4148_v23, %v3992_v34  ;;  %v4128_v51 = vadd.f32 %v4127_v11, %v3991_v47  ;;  %v3647_v18 = vpop.f32.mrb[124].mxu0 }
 0x364   : > { %v4170_v12 = vadd.f32 %v4169_v14, %v3993_v41  ;;  %v4870_v53 = vadd.f32 %v3647_v18, %v6613_v27  ;;  %v3873_v45 = vpop.f32.mrb[124].mxu1  ;;  %v3649_v54 = vpop.f32.mrb[125].mxu0 }
 0x365   : > { %v4902_v31 = vadd.f32 %v3873_v45, %v6618_v35  ;;  %v4871_v48 = vadd.f32 %v3649_v54, %v6623_v21  ;;  %v3875_v44 = vpop.f32.mrb[125].mxu1  ;;  %v3651_v56 = vpop.f32.mrb[126].mxu0  ;;  %v4010_v54 = vld [vmem:[%s5565_s23] sm:$0xff] }
 0x366   : > { %v3998_v19 = vmax.f32 %v4870_v53, 0.0  ;;  %v4903_v2 = vadd.f32 %v3875_v44, %v6628_v29  ;;  %v4872_v24 = vadd.f32 %v3651_v56, %v6613_v27  ;;  %v3877_v8 = vpop.f32.mrb[126].mxu1  ;;  %v3653_v50 = vpop.f32.mrb[127].mxu0  ;;  %v4227_v53 = vrot.slane %v4219_v40, %v6600_v7 }
 0x367   : > { %v4000_v0 = vmax.f32 %v4902_v31, 0.0  ;;  %v3999_v25 = vmax.f32 %v4871_v48, 0.0  ;;  %v4904_v55 = vadd.f32 %v3877_v8, %v6618_v35  ;;  %v4873_v4 = vadd.f32 %v3653_v50, %v6623_v21  ;;  %v3879_v33 = vpop.f32.mrb[127].mxu1 }
 0x368   : > { %v4108_v3 = vadd.f32 %v4107_v15, %v3998_v19  ;;  %v4001_v59 = vmax.f32 %v4903_v2, 0.0  ;;  %v4006_v42 = vmax.f32 %v4872_v24, 0.0  ;;  %v4905_v13 = vadd.f32 %v3879_v33, %v6628_v29 }
 0x369   : > { %v4150_v46 = vadd.f32 %v4149_v30, %v4000_v0  ;;  %v4129_v60 = vadd.f32 %v4128_v51, %v3999_v25  ;;  %v4008_v32 = vmax.f32 %v4904_v55, 0.0  ;;  %v4007_v58 = vmax.f32 %v4873_v4, 0.0 }
 0x36a   : > { %v4171_v39 = vadd.f32 %v4170_v12, %v4001_v59  ;;  %v4109_v27 = vadd.f32 %v4108_v3, %v4006_v42  ;;  %v4009_v49 = vmax.f32 %v4905_v13, 0.0 }
 0x36b   : > { %v4151_v57 = vadd.f32 %v4150_v46, %v4008_v32  ;;  %v4130_v10 = vadd.f32 %v4129_v60, %v4007_v58 }
 0x36c   : > { %v4110_v22 = vrot.slane %v4109_v27, 4  ;;  %v4172_v26 = vadd.f32 %v4171_v39, %v4009_v49 }
 0x36d   : > { %v4152_v35 = vrot.slane %v4151_v57, 4  ;;  %v4131_v37 = vrot.slane %v4130_v10, 4 }
 0x36e   : > { %v4111_v21 = vadd.f32 %v4110_v22, %v4109_v27  ;;  %v4173_v38 = vrot.slane %v4172_v26, 4 }
 0x36f   : > { %v4153_v43 = vadd.f32 %v4152_v35, %v4151_v57  ;;  %v4132_v62 = vadd.f32 %v4131_v37, %v4130_v10 }
 0x370   : > { %v4112_v17 = vrot.slane %v4111_v21, 2  ;;  %v4174_v52 = vadd.f32 %v4173_v38, %v4172_v26 }
 0x371   : > { %v4154_v29 = vrot.slane %v4153_v43, 2  ;;  %v4133_v20 = vrot.slane %v4132_v62, 2 }
 0x372   : > { %v4113_v6 = vadd.f32 %v4112_v17, %v4111_v21  ;;  %v4175_v61 = vrot.slane %v4174_v52, 2 }
 0x373   : > { %v4155_v5 = vadd.f32 %v4154_v29, %v4153_v43  ;;  %v4134_v9 = vadd.f32 %v4133_v20, %v4132_v62 }
 0x374   : > { %v4114_v36 = vrot.slane %v4113_v6, 1  ;;  %v4176_v63 = vadd.f32 %v4175_v61, %v4174_v52 }
 0x375   : > { %v4156_v16 = vrot.slane %v4155_v5, 1  ;;  %v4135_v23 = vrot.slane %v4134_v9, 1 }
 0x376   : > { %v4115_v11 = vadd.f32 %v4114_v36, %v4113_v6  ;;  %v4177_v34 = vrot.slane %v4176_v63, 1 }
 0x377   : > { %v4157_v47 = vadd.f32 %v4156_v16, %v4155_v5  ;;  %v4136_v14 = vadd.f32 %v4135_v23, %v4134_v9 }
 0x378   : > { %v4178_v15 = vadd.f32 %v4177_v34, %v4176_v63 }
 0x379   : > { %v4189_v41 = vcombine.low %v4115_v11, %v4136_v14 }
 0x37a   : > { %v4190_v30 = vcombine.low %v4157_v47, %v4178_v15 }
 0x37b   : > { %v4211_v51 = vrot.slane %v4189_v41, %v6600_v7 }
 0x37c   : > { %v4218_v18 = vrot.slane %v4190_v30, %v6600_v7 }
 0x37e   : > { %v4220_v12 = vcombine.low %v4211_v51, %v4218_v18 }
 0x380   : > { %v4234_v45 = vrot.slane %v4220_v12, %v6600_v7  ;;  %4242 = sbr.rel (%p4765_p13) target bundleno = 913 (0x391), region = 52 }
 0x382   : > { %v4235_v31 = vcombine.low %v4227_v53, %v4234_v45 }
 0x384   : > { %v4237_v48 = vadd.f32 %v4235_v31, %v4010_v54 }
 0x386   : > { %4238 = vst [vmem:[%s5565_s23] sm:$0xff] %v4237_v48 }
 0x38d   : > { %v4243_v44 = vld [vmem:[%s5565_s23] sm:$0xff] }
 0x38e   : > { %v4244_v56 = vmul.f32 0.00390625, %v4243_v44 }
 0x390   : > { %4245 = vst [vmem:[%s5565_s23] sm:$0xff] %v4244_v56 }
 0x391 PF: > { %s4776_s10 = sshll.u32 %s5326_s27, 6  ;;  %s4770_s11 = sshll.u32 %s5330_s28, 7 }
 0x392   : > { %s4268_s20 = sshll.u32 %s5563_s3, 4  ;;  %s4265_s16 = sadd.s32 %s4776_s10, %s4770_s11  ;;  %s6711_s20 = int_to_ptr.vmem [resolvable:$true] %s4268_s20 }
 0x393   : > { %s4771_s14 = sshll.u32 %s4265_s16, 7  ;;  %s6720_s13 = scalar_lea.sflag [#allocation4], %s286_s26 }
 0x394   : > { %s6716_s19 = scalar_lea.hbm %s6816_s5, %s4771_s14  ;;  %s5188_s30 = scalar_lea.vmem %s6711_s20, 8192 }
 0x395   : > { %p5189_p4 = scmp.ne.s32.totalorder %s6711_s20, %s5188_s30  ;;  %p6867_p2 = scmp.ne.s32.totalorder %s6845_s15, 0 }
 0x396   : > { %s5350_s3 = smov [#allocation5]  }
 0x397   : > { %p5190_p6 = pnand %p5189_p4, %p6867_p2  ;;  %s5192_s27 = sshll.u32 %s5350_s3, 4  ;;  %s5193_s27 = int_to_ptr.vmem [resolvable:$false] %s5192_s27 }
 0x398   : > { %s5194_s8 = scalar_lea.vmem %s5193_s27, 16384  ;;  %p5195_p11 = scmp.lt.s32.totalorder %s6711_s20, %s5193_s27 }
 0x399   : > { %p5191_p9 = pneg %p5190_p6  ;;  %p5196_p0 = scmp.lt.s32.totalorder %s5194_s8, %s5188_s30 }
 0x39b   : > { %p5197_p1 = por %p5196_p0, %p5195_p11 }
 0x39d   : > { %p5198_p5 = pnand %p5197_p1, %p5191_p9 }
 0x39f   : > { %5201 = shalt.err (!%p5198_p5)
}
 0x3a0   : > { %s5202_s26 = scalar_lea.hbm %s6716_s19, 8192  ;;  %s5206_s14 = scalar_lea.hbm %s6816_s5, 32768 }
 0x3a1   : > { %p5203_p8 = scmp.ne.s32.totalorder %s6716_s19, %s5202_s26  ;;  %p5207_p7 = scmp.lt.u32.totalorder %s6716_s19, %s6816_s5 }
 0x3a2   : > { %p5208_p12 = scmp.lt.u32.totalorder %s5206_s14, %s5202_s26  ;;  %p5210_p4 = scmp.lt.u32.totalorder %s5202_s26, %s6716_s19 }
 0x3a3   : > { %p5204_p10 = pnand %p5203_p8, %p6867_p2 }
 0x3a4   : > { %p5209_p13 = por %p5208_p12, %p5207_p7 }
 0x3a5   : > { %p5205_p3 = pneg %p5204_p10 }
 0x3a6   : > { %p5211_p6 = por %p5210_p4, %p5209_p13 }
 0x3a8   : > { %p5212_p9 = pnand %p5211_p6, %p5205_p3 }
 0x3aa   : > { %5215 = shalt.err (!%p5212_p9)
}
 0x3ab   : > { %s5351_s30 = smov 512   ;;  %s5352_s3 = smov 32  }
 0x3ac   : > { %5038 = dma.vmem_to_hbm [thread:$0]  (%p6867_p2), %s6711_s20, 8192, %s6716_s19, %s6720_s13, %s5351_s30, %s5351_s30, %s5352_s3  }
 0x3ad   : > { %s6749_s26 = scalar_lea.hbm %s6817_s6, %s4770_s11  ;;  %s4285_s10 = sshll.u32 %s5565_s23, 4  ;;  %s4286_s10 = int_to_ptr.vmem [resolvable:$true] %s4285_s10 }
 0x3ae   : > { %s6868_s16 = sand.u32 1, %s5306_s22   ;;  %s5216_s12 = scalar_lea.vmem %s4286_s10, 128 }
 0x3af   : > { %s4252_s14 = scalar_lea.sflag [#allocation7], %s6868_s16  ;;  %p5217_p11 = scmp.ne.s32.totalorder %s4286_s10, %s5216_s12 }
 0x3b0   : > { %p6869_p0 = scmp.ne.s32.totalorder %s6849_s9, 0  ;;  %s5353_s17 = smov [#allocation6]  }
 0x3b1   : > { %s5220_s0 = sshll.u32 %s5353_s17, 4  ;;  %s5221_s0 = int_to_ptr.vmem [resolvable:$false] %s5220_s0 }
 0x3b2   : > { %p5218_p1 = pnand %p5217_p11, %p6869_p0  ;;  %s5222_s15 = scalar_lea.vmem %s5221_s0, 256 }
 0x3b3   : > { %p5223_p2 = scmp.lt.s32.totalorder %s4286_s10, %s5221_s0  ;;  %p5224_p8 = scmp.lt.s32.totalorder %s5222_s15, %s5216_s12 }
 0x3b4   : > { %p5219_p5 = pneg %p5218_p1 }
 0x3b5   : > { %p5225_p10 = por %p5224_p8, %p5223_p2 }
 0x3b7   : > { %p5226_p3 = pnand %p5225_p10, %p5219_p5 }
 0x3b9   : > { %5229 = shalt.err (!%p5226_p3)
}
 0x3ba   : > { %s5230_s23 = scalar_lea.hbm %s6749_s26, 128  ;;  %s5234_s20 = scalar_lea.hbm %s6817_s6, 256 }
 0x3bb   : > { %p5231_p7 = scmp.ne.s32.totalorder %s6749_s26, %s5230_s23  ;;  %p5235_p4 = scmp.lt.u32.totalorder %s6749_s26, %s6817_s6 }
 0x3bc   : > { %p5236_p6 = scmp.lt.u32.totalorder %s5234_s20, %s5230_s23  ;;  %p5238_p11 = scmp.lt.u32.totalorder %s5230_s23, %s6749_s26 }
 0x3bd   : > { %p5232_p12 = pnand %p5231_p7, %p6869_p0 }
 0x3be   : > { %p5237_p9 = por %p5236_p6, %p5235_p4 }
 0x3bf   : > { %p5233_p13 = pneg %p5232_p12 }
 0x3c0   : > { %p5239_p1 = por %p5238_p11, %p5237_p9 }
 0x3c2   : > { %p5240_p5 = pnand %p5239_p1, %p5233_p13 }
 0x3c4   : > { %5243 = shalt.err (!%p5240_p5)
}
 0x3c5   : > { %5039 = dma.vmem_to_hbm [thread:$0]  (%p6869_p0), %s4286_s10, 128, %s6749_s26, %s4252_s14  }
 0x3c6 PF: > { %p5055_p2 = scmp.ge.s32.totalorder %s5342_s7, 2  ;;  %s4297_s13 = sand.u32 1, %s5314_s24  }
 0x3c7   : > { %p6870_p8 = scmp.ne.s32.totalorder %s6848_s18, 0  ;;  %s4298_s30 = scalar_lea.sflag [#allocation4], %s4297_s13 }
 0x3c9   : > { %p5047_p10 = pnand %p5055_p2, %p6870_p8 }
 0x3cb   : > { %5293 = dma.done.wait (!%p5047_p10), %s4298_s30, 8192  }
 0x3cc   : > { %5295 = vsyncadd (!%p5047_p10), %s4298_s30, 4294959104  ;;  %s4306_s3 = sand.u32 1, %s5302_s21   ;;  %p6871_p3 = scmp.ne.s32.totalorder %s6852_s29, 0 }
 0x3cd   : > { %s4307_s27 = scalar_lea.sflag [#allocation7], %s4306_s3 }
 0x3ce   : > { %p5050_p7 = pnand %p5055_p2, %p6871_p3 }
 0x3d0   : > { %5297 = dma.done.wait (!%p5050_p7), %s4307_s27, 128  }
 0x3d1   : > { %5299 = vsyncadd (!%p5050_p7), %s4307_s27, 4294967168  ;;  %s24_s7 = sadd.s32 1, %s5342_s7   ;;  %s6872_s9 = sld [smem:[#allocation11_spill]] }
 0x3d2   : > { %p21_p0 = scmp.ge.s32.totalorder %s24_s7, 6   ;;  %s6873_s23 = sld [smem:[#allocation17_spill]] }
 0x3d3   : > { %s6874_s18 = sld [smem:[#allocation12_spill]]  ;;  %s6875_s26 = sld [smem:[#allocation18_spill]] }
 0x3d4   : > { %s6876_s27 = sld [smem:[#allocation13_spill]]  ;;  %s6877_s28 = sld [smem:[#allocation14_spill]] }
 0x3d5   : > { %s6878_s29 = sld [smem:[#allocation15_spill]]  ;;  %s6879_s30 = sld [smem:[#allocation16_spill]] }
 0x3d6   : > { %s6880_s21 = smov %s5306_s22  ;;  %s6882_s24 = smov %s5318_s25 }
 0x3d7   : > { %s6881_s22 = smov %s6872_s9  ;;  %23 = sbr.rel (!%p21_p0) target bundleno = 13 (0xd), region = 105 }
 0x3d9   : > { %s6883_s25 = smov %s6874_s18 }
 0x3de   :  { %4312 = vsyncpa [#allocation3], 1 }
 0x3df   :  { %4314 = vsyncpa [#allocation3 + $0x1], 1 }
 0x3e0   :  { %4315 = vsyncpa [#allocation4], 1 }
 0x3e1   :  { %4317 = vsyncpa [#allocation4 + $0x1], 1 }
 0x3e2   :  { %4318 = vsyncpa [#allocation7], 1 }
 0x3e3   :  { %4320 = vsyncpa [#allocation7 + $0x1], 1 }

</bundles_post_ra>
